<compile_context>
chip_gen: v5e
topology: v5e:2x2
jax: 0.10.0
libtpu: 0.0.40
codegen_flags: <defaults>
</compile_context>

<pallas_src>
from functools import partial

import numpy as np
import jax
import jax.numpy as jnp
from jax.experimental import pallas as pl
from jax.experimental.pallas import tpu as pltpu

N_BINS = 15
LANE = 128
SUB = 8


def _ice_kernel(n_ref, p_ref, y_ref, out_ref,
                cnt_acc, sp_acc, sy_acc, ysum_acc,
                *, n_bins, block_rows):
    i = pl.program_id(0)
    nblk = pl.num_programs(0)

    # ---- init accumulators on the first grid step -------------------------
    @pl.when(i == 0)
    def _init():
        cnt_acc[...] = jnp.zeros_like(cnt_acc)
        sp_acc[...] = jnp.zeros_like(sp_acc)
        sy_acc[...] = jnp.zeros_like(sy_acc)
        ysum_acc[...] = jnp.zeros_like(ysum_acc)

    # ---- per-tile accumulation (VPU only) ----------------------------------
    p = p_ref[...]                       # (block_rows, 128) f32
    y = y_ref[...]                       # (block_rows, 128) f32

    n_valid = n_ref[0]                   # SMEM scalar (int32)
    row_idx = jax.lax.broadcasted_iota(jnp.int32, (block_rows, LANE), 0)
    lane_idx = jax.lax.broadcasted_iota(jnp.int32, (block_rows, LANE), 1)
    gidx = (i * block_rows + row_idx) * LANE + lane_idx
    valid = gidx < n_valid

    # Mask once; padded / partial-block garbage becomes p=-1 (no bin), y=0.
    p_safe = jnp.where(valid, p, -1.0)
    y_safe = jnp.where(valid, y, 0.0)

    # One-pass bin id: floor(p*n_bins) clamped so p==1.0 (and the 1.01 upper
    # edge of the last bin) lands in bin n_bins-1.  Negative p -> no bin.
    bid = jnp.minimum(jnp.floor(p_safe * n_bins), n_bins - 1).astype(jnp.int32)

    k = block_rows // SUB
    p3 = p_safe.reshape(k, SUB, LANE)
    y3 = y_safe.reshape(k, SUB, LANE)
    b3 = bid.reshape(k, SUB, LANE)

    # frac_pos numerator (total y sum) accumulated in the same pass.
    ysum_acc[...] += jnp.sum(y3, axis=0)

    for b in range(n_bins):
        m = b3 == b                               # single equality per bin
        mf = m.astype(jnp.float32)
        cnt_acc[b] += jnp.sum(mf, axis=0)                    # (8,128) VPU adds
        sp_acc[b] += jnp.sum(jnp.where(m, p3, 0.0), axis=0)  # (8,128)
        sy_acc[b] += jnp.sum(mf * y3, axis=0)                # (8,128)

    # ---- finalize on the last grid step ------------------------------------
    @pl.when(i == nblk - 1)
    def _fin():
        n_f = n_valid.astype(jnp.float32)
        frac_pos = jnp.sum(ysum_acc[...], keepdims=True) / n_f   # (1, 1)
        e1 = 2.0 * frac_pos
        e2 = 0.5 + frac_pos

        num = jnp.zeros((1, 1), jnp.float32)
        den = jnp.zeros((1, 1), jnp.float32)
        for b in range(n_bins):
            cnt = jnp.sum(cnt_acc[b], keepdims=True)    # (1, 1)
            sp = jnp.sum(sp_acc[b], keepdims=True)
            sy = jnp.sum(sy_acc[b], keepdims=True)

            has = cnt > 0.0
            log_cnt = jnp.log(jnp.maximum(cnt, 1.0))
            # cnt**e via exp(e*log(cnt)); empty bin: 0**e = 0 for e>0, 1 if e==0
            pow1 = jnp.where(has, jnp.exp(e1 * log_cnt),
                             jnp.where(e1 == 0.0, 1.0, 0.0))
            pow2 = jnp.where(has, jnp.exp(e2 * log_cnt), 0.0)   # e2 >= 0.5 > 0
            w = 0.5 * (pow1 + pow2)

            safe_cnt = jnp.maximum(cnt, 1.0)
            diff = jnp.abs(sp / safe_cnt - sy / safe_cnt)

            num = num + jnp.where(has, diff * w, 0.0)   # NaN bins dropped
            den = den + w

        out_ref[...] = num / den


def ice_strong(pred_probas, y_true, n_bins=N_BINS, max_block_rows=1024):
    """Pallas TPU implementation of ICE_strong.forward."""
    n = int(pred_probas.shape[0])
    if n == 0:
        return jnp.float32(jnp.nan)

    tile = LANE * SUB
    n_pad = ((n + tile - 1) // tile) * tile

    p = pred_probas.astype(jnp.float32)
    y = y_true.astype(jnp.float32)
    if n_pad != n:
        # Only the reshape-divisibility pad remains; padded values are never
        # read (masked in-kernel via the iota validity test against n_valid).
        p = jnp.pad(p, (0, n_pad - n))
        y = jnp.pad(y, (0, n_pad - n))

    rows = n_pad // LANE                       # multiple of 8
    p2 = p.reshape(rows, LANE)
    y2 = y.reshape(rows, LANE)

    block_rows = min(max_block_rows, rows)     # multiple of 8
    num_blocks = (rows + block_rows - 1) // block_rows

    n_arr = jnp.array([n], dtype=jnp.int32)

    grid_spec = pltpu.PrefetchScalarGridSpec(
        num_scalar_prefetch=1,
        grid=(num_blocks,),
        in_specs=[
            pl.BlockSpec((block_rows, LANE), lambda i, n_ref: (i, 0)),
            pl.BlockSpec((block_rows, LANE), lambda i, n_ref: (i, 0)),
        ],
        out_specs=pl.BlockSpec((1, 1), lambda i, n_ref: (0, 0)),
        scratch_shapes=[
            pltpu.VMEM((n_bins, SUB, LANE), jnp.float32),  # per-bin count
            pltpu.VMEM((n_bins, SUB, LANE), jnp.float32),  # per-bin sum(p)
            pltpu.VMEM((n_bins, SUB, LANE), jnp.float32),  # per-bin sum(y)
            pltpu.VMEM((SUB, LANE), jnp.float32),          # total sum(y)
        ],
    )

    out = pl.pallas_call(
        partial(_ice_kernel, n_bins=n_bins, block_rows=block_rows),
        out_shape=jax.ShapeDtypeStruct((1, 1), jnp.float32),
        grid_spec=grid_spec,
        compiler_params=pltpu.CompilerParams(
            dimension_semantics=("arbitrary",),
            vmem_limit_bytes=32 * 1024 * 1024,
        ),
        cost_estimate=pl.CostEstimate(
            flops=9 * n_bins * n_pad,
            transcendentals=2 * n_bins,
            bytes_accessed=8 * n_pad + 8,
        ),
    )(n_arr, p2, y2)
    return out[0, 0]


def _ice_reference_numpy(pred_probas, y_true, n_bins=N_BINS):
    """Pure numpy re-implementation of the PyTorch forward (for checking)."""
    pred_probas = np.asarray(pred_probas, dtype=np.float64)
    y_true = np.asarray(y_true, dtype=np.float64)
    bins = np.linspace(0, 1, n_bins + 1)
    frac_pos = y_true.sum() / y_true.shape[0]
    total, sum_weights = 0.0, 0.0
    for b in range(n_bins):
        lo, hi = bins[b], bins[b + 1]
        if hi == 1:
            hi = 1.01
        m = (pred_probas >= lo) & (pred_probas < hi)
        cnt = int(m.sum())
        w = (cnt ** (2 * frac_pos) + cnt ** (0.5 + frac_pos)) / 2
        sum_weights += w
        if cnt > 0:
            total += abs(pred_probas[m].mean() - y_true[m].mean()) * w
    return total / sum_weights


if __name__ == "__main__":
    key = jax.random.PRNGKey(0)
    k1, k2 = jax.random.split(key)

    N = 1000  # number of (confidence, correctness) samples
    pred_probas = jax.random.uniform(k1, (N,), dtype=jnp.float32)
    y_true = (jax.random.uniform(k2, (N,)) < pred_probas).astype(jnp.float32)

    result = ice_strong(pred_probas, y_true)
    result = jax.block_until_ready(result)

    ref = _ice_reference_numpy(np.array(pred_probas), np.array(y_true))
    assert np.isfinite(float(result))
    assert np.isclose(float(result), ref, rtol=1e-3, atol=1e-4), (float(result), ref)

    print("KERNEL_OK")
</pallas_src>

<mosaic_0001>
module attributes {stable_mosaic.version = 11 : i64} {
  func.func @_ice_kernel(%arg0: i32, %arg1: memref<1xi32, #tpu.memory_space<smem>>, %arg2: memref<8x128xf32, #tpu.memory_space<vmem>>, %arg3: memref<8x128xf32, #tpu.memory_space<vmem>>, %arg4: memref<1x1xf32, #tpu.memory_space<vmem>>, %arg5: memref<15x8x128xf32, #tpu.memory_space<vmem>>, %arg6: memref<15x8x128xf32, #tpu.memory_space<vmem>>, %arg7: memref<15x8x128xf32, #tpu.memory_space<vmem>>, %arg8: memref<8x128xf32, #tpu.memory_space<vmem>>) attributes {dimension_semantics = [#tpu.dimension_semantics<arbitrary>], iteration_bounds = array<i64: 1>, scalar_prefetch = 1 : i64, scratch_operands = 4 : i64, tpu.core_type = #tpu.core_type<tc>, window_params = [{transform_indices = @transform_0, window_bounds = array<i64: 8, 128>}, {transform_indices = @transform_1, window_bounds = array<i64: 8, 128>}, {pipeline_mode = #tpu.pipeline_mode<synchronous>, transform_indices = @transform_2, window_bounds = array<i64: 1, 1>}]} {
    %c0_i32 = arith.constant 0 : i32
    %0 = arith.cmpi eq, %arg0, %c0_i32 : i32
    %1 = arith.extui %0 : i1 to i32
    %c0_i32_0 = arith.constant 0 : i32
    %2 = arith.cmpi ne, %1, %c0_i32_0 : i32
    scf.if %2 {
      %cst_333 = arith.constant 0.000000e+00 : f32
      %456 = vector.broadcast %cst_333 : f32 to vector<15x8x128xf32>
      %c0_334 = arith.constant 0 : index
      %c0_335 = arith.constant 0 : index
      %c0_336 = arith.constant 0 : index
      %457 = vector.load %arg5[%c0_334, %c0_335, %c0_336] : memref<15x8x128xf32, #tpu.memory_space<vmem>>, vector<15x8x128xf32>
      tpu.vector_store %arg5[%c0_334, %c0_335, %c0_336], %456 {strides = array<i32>} : memref<15x8x128xf32, #tpu.memory_space<vmem>>, vector<15x8x128xf32>,
      %cst_337 = arith.constant 0.000000e+00 : f32
      %458 = vector.broadcast %cst_337 : f32 to vector<15x8x128xf32>
      %c0_338 = arith.constant 0 : index
      %c0_339 = arith.constant 0 : index
      %c0_340 = arith.constant 0 : index
      %459 = vector.load %arg6[%c0_338, %c0_339, %c0_340] : memref<15x8x128xf32, #tpu.memory_space<vmem>>, vector<15x8x128xf32>
      tpu.vector_store %arg6[%c0_338, %c0_339, %c0_340], %458 {strides = array<i32>} : memref<15x8x128xf32, #tpu.memory_space<vmem>>, vector<15x8x128xf32>,
      %cst_341 = arith.constant 0.000000e+00 : f32
      %460 = vector.broadcast %cst_341 : f32 to vector<15x8x128xf32>
      %c0_342 = arith.constant 0 : index
      %c0_343 = arith.constant 0 : index
      %c0_344 = arith.constant 0 : index
      %461 = vector.load %arg7[%c0_342, %c0_343, %c0_344] : memref<15x8x128xf32, #tpu.memory_space<vmem>>, vector<15x8x128xf32>
      tpu.vector_store %arg7[%c0_342, %c0_343, %c0_344], %460 {strides = array<i32>} : memref<15x8x128xf32, #tpu.memory_space<vmem>>, vector<15x8x128xf32>,
      %cst_345 = arith.constant 0.000000e+00 : f32
      %462 = vector.broadcast %cst_345 : f32 to vector<8x128xf32>
      %c0_346 = arith.constant 0 : index
      %c0_347 = arith.constant 0 : index
      %463 = vector.load %arg8[%c0_346, %c0_347] : memref<8x128xf32, #tpu.memory_space<vmem>>, vector<8x128xf32>
      tpu.vector_store %arg8[%c0_346, %c0_347], %462 {strides = array<i32>} : memref<8x128xf32, #tpu.memory_space<vmem>>, vector<8x128xf32>,
    } else {
    }
    %c0 = arith.constant 0 : index
    %c0_1 = arith.constant 0 : index
    %3 = vector.load %arg2[%c0, %c0_1] : memref<8x128xf32, #tpu.memory_space<vmem>>, vector<8x128xf32>
    %c0_2 = arith.constant 0 : index
    %c0_3 = arith.constant 0 : index
    %4 = vector.load %arg3[%c0_2, %c0_3] : memref<8x128xf32, #tpu.memory_space<vmem>>, vector<8x128xf32>
    %c0_4 = arith.constant 0 : index
    %5 = memref.load %arg1[%c0_4] : memref<1xi32, #tpu.memory_space<smem>>
    %6 = tpu.iota {dimensions = array<i32: 0>} : vector<8x128xi32>
    %7 = tpu.iota {dimensions = array<i32: 1>} : vector<8x128xi32>
    %c8_i32 = arith.constant 8 : i32
    %8 = arith.muli %arg0, %c8_i32 : i32
    %9 = vector.broadcast %8 : i32 to vector<8x128xi32>
    %10 = arith.addi %9, %6 : vector<8x128xi32>
    %c128_i32 = arith.constant 128 : i32
    %11 = vector.broadcast %c128_i32 : i32 to vector<8x128xi32>
    %12 = arith.muli %10, %11 : vector<8x128xi32>
    %13 = arith.addi %12, %7 : vector<8x128xi32>
    %14 = vector.broadcast %5 : i32 to vector<8x128xi32>
    %15 = arith.cmpi slt, %13, %14 : vector<8x128xi32>
    %cst = arith.constant -1.000000e+00 : f32
    %16 = vector.broadcast %cst : f32 to vector<8x128xf32>
    %17 = arith.select %15, %3, %16 : vector<8x128xi1>, vector<8x128xf32>
    %cst_5 = arith.constant 0.000000e+00 : f32
    %18 = vector.broadcast %cst_5 : f32 to vector<8x128xf32>
    %19 = arith.select %15, %4, %18 : vector<8x128xi1>, vector<8x128xf32>
    %cst_6 = arith.constant 1.500000e+01 : f32
    %20 = vector.broadcast %cst_6 : f32 to vector<8x128xf32>
    %21 = arith.mulf %17, %20 : vector<8x128xf32>
    %22 = math.floor %21 : vector<8x128xf32>
    %cst_7 = arith.constant 1.400000e+01 : f32
    %23 = vector.broadcast %cst_7 : f32 to vector<8x128xf32>
    %24 = arith.minimumf %22, %23 : vector<8x128xf32>
    %25 = arith.fptosi %24 : vector<8x128xf32> to vector<8x128xi32>
    %26 = vector.shape_cast %17 : vector<8x128xf32> to vector<1x8x128xf32>
    %27 = vector.shape_cast %19 : vector<8x128xf32> to vector<1x8x128xf32>
    %28 = vector.shape_cast %25 : vector<8x128xi32> to vector<1x8x128xi32>
    %c0_8 = arith.constant 0 : index
    %c0_9 = arith.constant 0 : index
    %29 = vector.load %arg8[%c0_8, %c0_9] : memref<8x128xf32, #tpu.memory_space<vmem>>, vector<8x128xf32>
    %cst_10 = arith.constant dense<0.000000e+00> : vector<8x128xf32>
    %30 = vector.multi_reduction <add>, %27, %cst_10 [0] : vector<1x8x128xf32> to vector<8x128xf32>
    %31 = arith.addf %29, %30 : vector<8x128xf32>
    %c0_11 = arith.constant 0 : index
    %c0_12 = arith.constant 0 : index
    %32 = vector.load %arg8[%c0_11, %c0_12] : memref<8x128xf32, #tpu.memory_space<vmem>>, vector<8x128xf32>
    tpu.vector_store %arg8[%c0_11, %c0_12], %31 {strides = array<i32>} : memref<8x128xf32, #tpu.memory_space<vmem>>, vector<8x128xf32>,
    %c0_i32_13 = arith.constant 0 : i32
    %33 = vector.broadcast %c0_i32_13 : i32 to vector<1x8x128xi32>
    %34 = arith.cmpi eq, %28, %33 : vector<1x8x128xi32>
    %35 = arith.extui %34 : vector<1x8x128xi1> to vector<1x8x128xi32>
    %36 = arith.sitofp %35 : vector<1x8x128xi32> to vector<1x8x128xf32>
    %c0_14 = arith.constant 0 : index
    %c0_15 = arith.constant 0 : index
    %c0_16 = arith.constant 0 : index
    %37 = vector.load %arg5[%c0_14, %c0_15, %c0_16] : memref<15x8x128xf32, #tpu.memory_space<vmem>>, vector<1x8x128xf32>
    %38 = vector.shape_cast %37 : vector<1x8x128xf32> to vector<8x128xf32>
    %cst_17 = arith.constant dense<0.000000e+00> : vector<8x128xf32>
    %39 = vector.multi_reduction <add>, %36, %cst_17 [0] : vector<1x8x128xf32> to vector<8x128xf32>
    %40 = arith.addf %38, %39 : vector<8x128xf32>
    %c0_18 = arith.constant 0 : index
    %c0_19 = arith.constant 0 : index
    %c0_20 = arith.constant 0 : index
    %41 = vector.load %arg5[%c0_18, %c0_19, %c0_20] : memref<15x8x128xf32, #tpu.memory_space<vmem>>, vector<1x8x128xf32>
    %42 = vector.shape_cast %41 : vector<1x8x128xf32> to vector<8x128xf32>
    %43 = vector.shape_cast %40 : vector<8x128xf32> to vector<1x8x128xf32>
    tpu.vector_store %arg5[%c0_18, %c0_19, %c0_20], %43 {strides = array<i32>} : memref<15x8x128xf32, #tpu.memory_space<vmem>>, vector<1x8x128xf32>,
    %c0_21 = arith.constant 0 : index
    %c0_22 = arith.constant 0 : index
    %c0_23 = arith.constant 0 : index
    %44 = vector.load %arg6[%c0_21, %c0_22, %c0_23] : memref<15x8x128xf32, #tpu.memory_space<vmem>>, vector<1x8x128xf32>
    %45 = vector.shape_cast %44 : vector<1x8x128xf32> to vector<8x128xf32>
    %cst_24 = arith.constant 0.000000e+00 : f32
    %46 = vector.broadcast %cst_24 : f32 to vector<1x8x128xf32>
    %47 = arith.select %34, %26, %46 : vector<1x8x128xi1>, vector<1x8x128xf32>
    %cst_25 = arith.constant dense<0.000000e+00> : vector<8x128xf32>
    %48 = vector.multi_reduction <add>, %47, %cst_25 [0] : vector<1x8x128xf32> to vector<8x128xf32>
    %49 = arith.addf %45, %48 : vector<8x128xf32>
    %c0_26 = arith.constant 0 : index
    %c0_27 = arith.constant 0 : index
    %c0_28 = arith.constant 0 : index
    %50 = vector.load %arg6[%c0_26, %c0_27, %c0_28] : memref<15x8x128xf32, #tpu.memory_space<vmem>>, vector<1x8x128xf32>
    %51 = vector.shape_cast %50 : vector<1x8x128xf32> to vector<8x128xf32>
    %52 = vector.shape_cast %49 : vector<8x128xf32> to vector<1x8x128xf32>
    tpu.vector_store %arg6[%c0_26, %c0_27, %c0_28], %52 {strides = array<i32>} : memref<15x8x128xf32, #tpu.memory_space<vmem>>, vector<1x8x128xf32>,
    %c0_29 = arith.constant 0 : index
    %c0_30 = arith.constant 0 : index
    %c0_31 = arith.constant 0 : index
    %53 = vector.load %arg7[%c0_29, %c0_30, %c0_31] : memref<15x8x128xf32, #tpu.memory_space<vmem>>, vector<1x8x128xf32>
    %54 = vector.shape_cast %53 : vector<1x8x128xf32> to vector<8x128xf32>
    %55 = arith.mulf %36, %27 : vector<1x8x128xf32>
    %cst_32 = arith.constant dense<0.000000e+00> : vector<8x128xf32>
    %56 = vector.multi_reduction <add>, %55, %cst_32 [0] : vector<1x8x128xf32> to vector<8x128xf32>
    %57 = arith.addf %54, %56 : vector<8x128xf32>
    %c0_33 = arith.constant 0 : index
    %c0_34 = arith.constant 0 : index
    %c0_35 = arith.constant 0 : index
    %58 = vector.load %arg7[%c0_33, %c0_34, %c0_35] : memref<15x8x128xf32, #tpu.memory_space<vmem>>, vector<1x8x128xf32>
    %59 = vector.shape_cast %58 : vector<1x8x128xf32> to vector<8x128xf32>
    %60 = vector.shape_cast %57 : vector<8x128xf32> to vector<1x8x128xf32>
    tpu.vector_store %arg7[%c0_33, %c0_34, %c0_35], %60 {strides = array<i32>} : memref<15x8x128xf32, #tpu.memory_space<vmem>>, vector<1x8x128xf32>,
    %c1_i32 = arith.constant 1 : i32
    %61 = vector.broadcast %c1_i32 : i32 to vector<1x8x128xi32>
    %62 = arith.cmpi eq, %28, %61 : vector<1x8x128xi32>
    %63 = arith.extui %62 : vector<1x8x128xi1> to vector<1x8x128xi32>
    %64 = arith.sitofp %63 : vector<1x8x128xi32> to vector<1x8x128xf32>
    %c1 = arith.constant 1 : index
    %c0_36 = arith.constant 0 : index
    %c0_37 = arith.constant 0 : index
    %65 = vector.load %arg5[%c1, %c0_36, %c0_37] : memref<15x8x128xf32, #tpu.memory_space<vmem>>, vector<1x8x128xf32>
    %66 = vector.shape_cast %65 : vector<1x8x128xf32> to vector<8x128xf32>
    %cst_38 = arith.constant dense<0.000000e+00> : vector<8x128xf32>
    %67 = vector.multi_reduction <add>, %64, %cst_38 [0] : vector<1x8x128xf32> to vector<8x128xf32>
    %68 = arith.addf %66, %67 : vector<8x128xf32>
    %c1_39 = arith.constant 1 : index
    %c0_40 = arith.constant 0 : index
    %c0_41 = arith.constant 0 : index
    %69 = vector.load %arg5[%c1_39, %c0_40, %c0_41] : memref<15x8x128xf32, #tpu.memory_space<vmem>>, vector<1x8x128xf32>
    %70 = vector.shape_cast %69 : vector<1x8x128xf32> to vector<8x128xf32>
    %71 = vector.shape_cast %68 : vector<8x128xf32> to vector<1x8x128xf32>
    tpu.vector_store %arg5[%c1_39, %c0_40, %c0_41], %71 {strides = array<i32>} : memref<15x8x128xf32, #tpu.memory_space<vmem>>, vector<1x8x128xf32>,
    %c1_42 = arith.constant 1 : index
    %c0_43 = arith.constant 0 : index
    %c0_44 = arith.constant 0 : index
    %72 = vector.load %arg6[%c1_42, %c0_43, %c0_44] : memref<15x8x128xf32, #tpu.memory_space<vmem>>, vector<1x8x128xf32>
    %73 = vector.shape_cast %72 : vector<1x8x128xf32> to vector<8x128xf32>
    %cst_45 = arith.constant 0.000000e+00 : f32
    %74 = vector.broadcast %cst_45 : f32 to vector<1x8x128xf32>
    %75 = arith.select %62, %26, %74 : vector<1x8x128xi1>, vector<1x8x128xf32>
    %cst_46 = arith.constant dense<0.000000e+00> : vector<8x128xf32>
    %76 = vector.multi_reduction <add>, %75, %cst_46 [0] : vector<1x8x128xf32> to vector<8x128xf32>
    %77 = arith.addf %73, %76 : vector<8x128xf32>
    %c1_47 = arith.constant 1 : index
    %c0_48 = arith.constant 0 : index
    %c0_49 = arith.constant 0 : index
    %78 = vector.load %arg6[%c1_47, %c0_48, %c0_49] : memref<15x8x128xf32, #tpu.memory_space<vmem>>, vector<1x8x128xf32>
    %79 = vector.shape_cast %78 : vector<1x8x128xf32> to vector<8x128xf32>
    %80 = vector.shape_cast %77 : vector<8x128xf32> to vector<1x8x128xf32>
    tpu.vector_store %arg6[%c1_47, %c0_48, %c0_49], %80 {strides = array<i32>} : memref<15x8x128xf32, #tpu.memory_space<vmem>>, vector<1x8x128xf32>,
    %c1_50 = arith.constant 1 : index
    %c0_51 = arith.constant 0 : index
    %c0_52 = arith.constant 0 : index
    %81 = vector.load %arg7[%c1_50, %c0_51, %c0_52] : memref<15x8x128xf32, #tpu.memory_space<vmem>>, vector<1x8x128xf32>
    %82 = vector.shape_cast %81 : vector<1x8x128xf32> to vector<8x128xf32>
    %83 = arith.mulf %64, %27 : vector<1x8x128xf32>
    %cst_53 = arith.constant dense<0.000000e+00> : vector<8x128xf32>
    %84 = vector.multi_reduction <add>, %83, %cst_53 [0] : vector<1x8x128xf32> to vector<8x128xf32>
    %85 = arith.addf %82, %84 : vector<8x128xf32>
    %c1_54 = arith.constant 1 : index
    %c0_55 = arith.constant 0 : index
    %c0_56 = arith.constant 0 : index
    %86 = vector.load %arg7[%c1_54, %c0_55, %c0_56] : memref<15x8x128xf32, #tpu.memory_space<vmem>>, vector<1x8x128xf32>
    %87 = vector.shape_cast %86 : vector<1x8x128xf32> to vector<8x128xf32>
    %88 = vector.shape_cast %85 : vector<8x128xf32> to vector<1x8x128xf32>
    tpu.vector_store %arg7[%c1_54, %c0_55, %c0_56], %88 {strides = array<i32>} : memref<15x8x128xf32, #tpu.memory_space<vmem>>, vector<1x8x128xf32>,
    %c2_i32 = arith.constant 2 : i32
    %89 = vector.broadcast %c2_i32 : i32 to vector<1x8x128xi32>
    %90 = arith.cmpi eq, %28, %89 : vector<1x8x128xi32>
    %91 = arith.extui %90 : vector<1x8x128xi1> to vector<1x8x128xi32>
    %92 = arith.sitofp %91 : vector<1x8x128xi32> to vector<1x8x128xf32>
    %c2 = arith.constant 2 : index
    %c0_57 = arith.constant 0 : index
    %c0_58 = arith.constant 0 : index
    %93 = vector.load %arg5[%c2, %c0_57, %c0_58] : memref<15x8x128xf32, #tpu.memory_space<vmem>>, vector<1x8x128xf32>
    %94 = vector.shape_cast %93 : vector<1x8x128xf32> to vector<8x128xf32>
    %cst_59 = arith.constant dense<0.000000e+00> : vector<8x128xf32>
    %95 = vector.multi_reduction <add>, %92, %cst_59 [0] : vector<1x8x128xf32> to vector<8x128xf32>
    %96 = arith.addf %94, %95 : vector<8x128xf32>
    %c2_60 = arith.constant 2 : index
    %c0_61 = arith.constant 0 : index
    %c0_62 = arith.constant 0 : index
    %97 = vector.load %arg5[%c2_60, %c0_61, %c0_62] : memref<15x8x128xf32, #tpu.memory_space<vmem>>, vector<1x8x128xf32>
    %98 = vector.shape_cast %97 : vector<1x8x128xf32> to vector<8x128xf32>
    %99 = vector.shape_cast %96 : vector<8x128xf32> to vector<1x8x128xf32>
    tpu.vector_store %arg5[%c2_60, %c0_61, %c0_62], %99 {strides = array<i32>} : memref<15x8x128xf32, #tpu.memory_space<vmem>>, vector<1x8x128xf32>,
    %c2_63 = arith.constant 2 : index
    %c0_64 = arith.constant 0 : index
    %c0_65 = arith.constant 0 : index
    %100 = vector.load %arg6[%c2_63, %c0_64, %c0_65] : memref<15x8x128xf32, #tpu.memory_space<vmem>>, vector<1x8x128xf32>
    %101 = vector.shape_cast %100 : vector<1x8x128xf32> to vector<8x128xf32>
    %cst_66 = arith.constant 0.000000e+00 : f32
    %102 = vector.broadcast %cst_66 : f32 to vector<1x8x128xf32>
    %103 = arith.select %90, %26, %102 : vector<1x8x128xi1>, vector<1x8x128xf32>
    %cst_67 = arith.constant dense<0.000000e+00> : vector<8x128xf32>
    %104 = vector.multi_reduction <add>, %103, %cst_67 [0] : vector<1x8x128xf32> to vector<8x128xf32>
    %105 = arith.addf %101, %104 : vector<8x128xf32>
    %c2_68 = arith.constant 2 : index
    %c0_69 = arith.constant 0 : index
    %c0_70 = arith.constant 0 : index
    %106 = vector.load %arg6[%c2_68, %c0_69, %c0_70] : memref<15x8x128xf32, #tpu.memory_space<vmem>>, vector<1x8x128xf32>
    %107 = vector.shape_cast %106 : vector<1x8x128xf32> to vector<8x128xf32>
    %108 = vector.shape_cast %105 : vector<8x128xf32> to vector<1x8x128xf32>
    tpu.vector_store %arg6[%c2_68, %c0_69, %c0_70], %108 {strides = array<i32>} : memref<15x8x128xf32, #tpu.memory_space<vmem>>, vector<1x8x128xf32>,
    %c2_71 = arith.constant 2 : index
    %c0_72 = arith.constant 0 : index
    %c0_73 = arith.constant 0 : index
    %109 = vector.load %arg7[%c2_71, %c0_72, %c0_73] : memref<15x8x128xf32, #tpu.memory_space<vmem>>, vector<1x8x128xf32>
    %110 = vector.shape_cast %109 : vector<1x8x128xf32> to vector<8x128xf32>
    %111 = arith.mulf %92, %27 : vector<1x8x128xf32>
    %cst_74 = arith.constant dense<0.000000e+00> : vector<8x128xf32>
    %112 = vector.multi_reduction <add>, %111, %cst_74 [0] : vector<1x8x128xf32> to vector<8x128xf32>
    %113 = arith.addf %110, %112 : vector<8x128xf32>
    %c2_75 = arith.constant 2 : index
    %c0_76 = arith.constant 0 : index
    %c0_77 = arith.constant 0 : index
    %114 = vector.load %arg7[%c2_75, %c0_76, %c0_77] : memref<15x8x128xf32, #tpu.memory_space<vmem>>, vector<1x8x128xf32>
    %115 = vector.shape_cast %114 : vector<1x8x128xf32> to vector<8x128xf32>
    %116 = vector.shape_cast %113 : vector<8x128xf32> to vector<1x8x128xf32>
    tpu.vector_store %arg7[%c2_75, %c0_76, %c0_77], %116 {strides = array<i32>} : memref<15x8x128xf32, #tpu.memory_space<vmem>>, vector<1x8x128xf32>,
    %c3_i32 = arith.constant 3 : i32
    %117 = vector.broadcast %c3_i32 : i32 to vector<1x8x128xi32>
    %118 = arith.cmpi eq, %28, %117 : vector<1x8x128xi32>
    %119 = arith.extui %118 : vector<1x8x128xi1> to vector<1x8x128xi32>
    %120 = arith.sitofp %119 : vector<1x8x128xi32> to vector<1x8x128xf32>
    %c3 = arith.constant 3 : index
    %c0_78 = arith.constant 0 : index
    %c0_79 = arith.constant 0 : index
    %121 = vector.load %arg5[%c3, %c0_78, %c0_79] : memref<15x8x128xf32, #tpu.memory_space<vmem>>, vector<1x8x128xf32>
    %122 = vector.shape_cast %121 : vector<1x8x128xf32> to vector<8x128xf32>
    %cst_80 = arith.constant dense<0.000000e+00> : vector<8x128xf32>
    %123 = vector.multi_reduction <add>, %120, %cst_80 [0] : vector<1x8x128xf32> to vector<8x128xf32>
    %124 = arith.addf %122, %123 : vector<8x128xf32>
    %c3_81 = arith.constant 3 : index
    %c0_82 = arith.constant 0 : index
    %c0_83 = arith.constant 0 : index
    %125 = vector.load %arg5[%c3_81, %c0_82, %c0_83] : memref<15x8x128xf32, #tpu.memory_space<vmem>>, vector<1x8x128xf32>
    %126 = vector.shape_cast %125 : vector<1x8x128xf32> to vector<8x128xf32>
    %127 = vector.shape_cast %124 : vector<8x128xf32> to vector<1x8x128xf32>
    tpu.vector_store %arg5[%c3_81, %c0_82, %c0_83], %127 {strides = array<i32>} : memref<15x8x128xf32, #tpu.memory_space<vmem>>, vector<1x8x128xf32>,
    %c3_84 = arith.constant 3 : index
    %c0_85 = arith.constant 0 : index
    %c0_86 = arith.constant 0 : index
    %128 = vector.load %arg6[%c3_84, %c0_85, %c0_86] : memref<15x8x128xf32, #tpu.memory_space<vmem>>, vector<1x8x128xf32>
    %129 = vector.shape_cast %128 : vector<1x8x128xf32> to vector<8x128xf32>
    %cst_87 = arith.constant 0.000000e+00 : f32
    %130 = vector.broadcast %cst_87 : f32 to vector<1x8x128xf32>
    %131 = arith.select %118, %26, %130 : vector<1x8x128xi1>, vector<1x8x128xf32>
    %cst_88 = arith.constant dense<0.000000e+00> : vector<8x128xf32>
    %132 = vector.multi_reduction <add>, %131, %cst_88 [0] : vector<1x8x128xf32> to vector<8x128xf32>
    %133 = arith.addf %129, %132 : vector<8x128xf32>
    %c3_89 = arith.constant 3 : index
    %c0_90 = arith.constant 0 : index
    %c0_91 = arith.constant 0 : index
    %134 = vector.load %arg6[%c3_89, %c0_90, %c0_91] : memref<15x8x128xf32, #tpu.memory_space<vmem>>, vector<1x8x128xf32>
    %135 = vector.shape_cast %134 : vector<1x8x128xf32> to vector<8x128xf32>
    %136 = vector.shape_cast %133 : vector<8x128xf32> to vector<1x8x128xf32>
    tpu.vector_store %arg6[%c3_89, %c0_90, %c0_91], %136 {strides = array<i32>} : memref<15x8x128xf32, #tpu.memory_space<vmem>>, vector<1x8x128xf32>,
    %c3_92 = arith.constant 3 : index
    %c0_93 = arith.constant 0 : index
    %c0_94 = arith.constant 0 : index
    %137 = vector.load %arg7[%c3_92, %c0_93, %c0_94] : memref<15x8x128xf32, #tpu.memory_space<vmem>>, vector<1x8x128xf32>
    %138 = vector.shape_cast %137 : vector<1x8x128xf32> to vector<8x128xf32>
    %139 = arith.mulf %120, %27 : vector<1x8x128xf32>
    %cst_95 = arith.constant dense<0.000000e+00> : vector<8x128xf32>
    %140 = vector.multi_reduction <add>, %139, %cst_95 [0] : vector<1x8x128xf32> to vector<8x128xf32>
    %141 = arith.addf %138, %140 : vector<8x128xf32>
    %c3_96 = arith.constant 3 : index
    %c0_97 = arith.constant 0 : index
    %c0_98 = arith.constant 0 : index
    %142 = vector.load %arg7[%c3_96, %c0_97, %c0_98] : memref<15x8x128xf32, #tpu.memory_space<vmem>>, vector<1x8x128xf32>
    %143 = vector.shape_cast %142 : vector<1x8x128xf32> to vector<8x128xf32>
    %144 = vector.shape_cast %141 : vector<8x128xf32> to vector<1x8x128xf32>
    tpu.vector_store %arg7[%c3_96, %c0_97, %c0_98], %144 {strides = array<i32>} : memref<15x8x128xf32, #tpu.memory_space<vmem>>, vector<1x8x128xf32>,
    %c4_i32 = arith.constant 4 : i32
    %145 = vector.broadcast %c4_i32 : i32 to vector<1x8x128xi32>
    %146 = arith.cmpi eq, %28, %145 : vector<1x8x128xi32>
    %147 = arith.extui %146 : vector<1x8x128xi1> to vector<1x8x128xi32>
    %148 = arith.sitofp %147 : vector<1x8x128xi32> to vector<1x8x128xf32>
    %c4 = arith.constant 4 : index
    %c0_99 = arith.constant 0 : index
    %c0_100 = arith.constant 0 : index
    %149 = vector.load %arg5[%c4, %c0_99, %c0_100] : memref<15x8x128xf32, #tpu.memory_space<vmem>>, vector<1x8x128xf32>
    %150 = vector.shape_cast %149 : vector<1x8x128xf32> to vector<8x128xf32>
    %cst_101 = arith.constant dense<0.000000e+00> : vector<8x128xf32>
    %151 = vector.multi_reduction <add>, %148, %cst_101 [0] : vector<1x8x128xf32> to vector<8x128xf32>
    %152 = arith.addf %150, %151 : vector<8x128xf32>
    %c4_102 = arith.constant 4 : index
    %c0_103 = arith.constant 0 : index
    %c0_104 = arith.constant 0 : index
    %153 = vector.load %arg5[%c4_102, %c0_103, %c0_104] : memref<15x8x128xf32, #tpu.memory_space<vmem>>, vector<1x8x128xf32>
    %154 = vector.shape_cast %153 : vector<1x8x128xf32> to vector<8x128xf32>
    %155 = vector.shape_cast %152 : vector<8x128xf32> to vector<1x8x128xf32>
    tpu.vector_store %arg5[%c4_102, %c0_103, %c0_104], %155 {strides = array<i32>} : memref<15x8x128xf32, #tpu.memory_space<vmem>>, vector<1x8x128xf32>,
    %c4_105 = arith.constant 4 : index
    %c0_106 = arith.constant 0 : index
    %c0_107 = arith.constant 0 : index
    %156 = vector.load %arg6[%c4_105, %c0_106, %c0_107] : memref<15x8x128xf32, #tpu.memory_space<vmem>>, vector<1x8x128xf32>
    %157 = vector.shape_cast %156 : vector<1x8x128xf32> to vector<8x128xf32>
    %cst_108 = arith.constant 0.000000e+00 : f32
    %158 = vector.broadcast %cst_108 : f32 to vector<1x8x128xf32>
    %159 = arith.select %146, %26, %158 : vector<1x8x128xi1>, vector<1x8x128xf32>
    %cst_109 = arith.constant dense<0.000000e+00> : vector<8x128xf32>
    %160 = vector.multi_reduction <add>, %159, %cst_109 [0] : vector<1x8x128xf32> to vector<8x128xf32>
    %161 = arith.addf %157, %160 : vector<8x128xf32>
    %c4_110 = arith.constant 4 : index
    %c0_111 = arith.constant 0 : index
    %c0_112 = arith.constant 0 : index
    %162 = vector.load %arg6[%c4_110, %c0_111, %c0_112] : memref<15x8x128xf32, #tpu.memory_space<vmem>>, vector<1x8x128xf32>
    %163 = vector.shape_cast %162 : vector<1x8x128xf32> to vector<8x128xf32>
    %164 = vector.shape_cast %161 : vector<8x128xf32> to vector<1x8x128xf32>
    tpu.vector_store %arg6[%c4_110, %c0_111, %c0_112], %164 {strides = array<i32>} : memref<15x8x128xf32, #tpu.memory_space<vmem>>, vector<1x8x128xf32>,
    %c4_113 = arith.constant 4 : index
    %c0_114 = arith.constant 0 : index
    %c0_115 = arith.constant 0 : index
    %165 = vector.load %arg7[%c4_113, %c0_114, %c0_115] : memref<15x8x128xf32, #tpu.memory_space<vmem>>, vector<1x8x128xf32>
    %166 = vector.shape_cast %165 : vector<1x8x128xf32> to vector<8x128xf32>
    %167 = arith.mulf %148, %27 : vector<1x8x128xf32>
    %cst_116 = arith.constant dense<0.000000e+00> : vector<8x128xf32>
    %168 = vector.multi_reduction <add>, %167, %cst_116 [0] : vector<1x8x128xf32> to vector<8x128xf32>
    %169 = arith.addf %166, %168 : vector<8x128xf32>
    %c4_117 = arith.constant 4 : index
    %c0_118 = arith.constant 0 : index
    %c0_119 = arith.constant 0 : index
    %170 = vector.load %arg7[%c4_117, %c0_118, %c0_119] : memref<15x8x128xf32, #tpu.memory_space<vmem>>, vector<1x8x128xf32>
    %171 = vector.shape_cast %170 : vector<1x8x128xf32> to vector<8x128xf32>
    %172 = vector.shape_cast %169 : vector<8x128xf32> to vector<1x8x128xf32>
    tpu.vector_store %arg7[%c4_117, %c0_118, %c0_119], %172 {strides = array<i32>} : memref<15x8x128xf32, #tpu.memory_space<vmem>>, vector<1x8x128xf32>,
    %c5_i32 = arith.constant 5 : i32
    %173 = vector.broadcast %c5_i32 : i32 to vector<1x8x128xi32>
    %174 = arith.cmpi eq, %28, %173 : vector<1x8x128xi32>
    %175 = arith.extui %174 : vector<1x8x128xi1> to vector<1x8x128xi32>
    %176 = arith.sitofp %175 : vector<1x8x128xi32> to vector<1x8x128xf32>
    %c5 = arith.constant 5 : index
    %c0_120 = arith.constant 0 : index
    %c0_121 = arith.constant 0 : index
    %177 = vector.load %arg5[%c5, %c0_120, %c0_121] : memref<15x8x128xf32, #tpu.memory_space<vmem>>, vector<1x8x128xf32>
    %178 = vector.shape_cast %177 : vector<1x8x128xf32> to vector<8x128xf32>
    %cst_122 = arith.constant dense<0.000000e+00> : vector<8x128xf32>
    %179 = vector.multi_reduction <add>, %176, %cst_122 [0] : vector<1x8x128xf32> to vector<8x128xf32>
    %180 = arith.addf %178, %179 : vector<8x128xf32>
    %c5_123 = arith.constant 5 : index
    %c0_124 = arith.constant 0 : index
    %c0_125 = arith.constant 0 : index
    %181 = vector.load %arg5[%c5_123, %c0_124, %c0_125] : memref<15x8x128xf32, #tpu.memory_space<vmem>>, vector<1x8x128xf32>
    %182 = vector.shape_cast %181 : vector<1x8x128xf32> to vector<8x128xf32>
    %183 = vector.shape_cast %180 : vector<8x128xf32> to vector<1x8x128xf32>
    tpu.vector_store %arg5[%c5_123, %c0_124, %c0_125], %183 {strides = array<i32>} : memref<15x8x128xf32, #tpu.memory_space<vmem>>, vector<1x8x128xf32>,
    %c5_126 = arith.constant 5 : index
    %c0_127 = arith.constant 0 : index
    %c0_128 = arith.constant 0 : index
    %184 = vector.load %arg6[%c5_126, %c0_127, %c0_128] : memref<15x8x128xf32, #tpu.memory_space<vmem>>, vector<1x8x128xf32>
    %185 = vector.shape_cast %184 : vector<1x8x128xf32> to vector<8x128xf32>
    %cst_129 = arith.constant 0.000000e+00 : f32
    %186 = vector.broadcast %cst_129 : f32 to vector<1x8x128xf32>
    %187 = arith.select %174, %26, %186 : vector<1x8x128xi1>, vector<1x8x128xf32>
    %cst_130 = arith.constant dense<0.000000e+00> : vector<8x128xf32>
    %188 = vector.multi_reduction <add>, %187, %cst_130 [0] : vector<1x8x128xf32> to vector<8x128xf32>
    %189 = arith.addf %185, %188 : vector<8x128xf32>
    %c5_131 = arith.constant 5 : index
    %c0_132 = arith.constant 0 : index
    %c0_133 = arith.constant 0 : index
    %190 = vector.load %arg6[%c5_131, %c0_132, %c0_133] : memref<15x8x128xf32, #tpu.memory_space<vmem>>, vector<1x8x128xf32>
    %191 = vector.shape_cast %190 : vector<1x8x128xf32> to vector<8x128xf32>
    %192 = vector.shape_cast %189 : vector<8x128xf32> to vector<1x8x128xf32>
    tpu.vector_store %arg6[%c5_131, %c0_132, %c0_133], %192 {strides = array<i32>} : memref<15x8x128xf32, #tpu.memory_space<vmem>>, vector<1x8x128xf32>,
    %c5_134 = arith.constant 5 : index
    %c0_135 = arith.constant 0 : index
    %c0_136 = arith.constant 0 : index
    %193 = vector.load %arg7[%c5_134, %c0_135, %c0_136] : memref<15x8x128xf32, #tpu.memory_space<vmem>>, vector<1x8x128xf32>
    %194 = vector.shape_cast %193 : vector<1x8x128xf32> to vector<8x128xf32>
    %195 = arith.mulf %176, %27 : vector<1x8x128xf32>
    %cst_137 = arith.constant dense<0.000000e+00> : vector<8x128xf32>
    %196 = vector.multi_reduction <add>, %195, %cst_137 [0] : vector<1x8x128xf32> to vector<8x128xf32>
    %197 = arith.addf %194, %196 : vector<8x128xf32>
    %c5_138 = arith.constant 5 : index
    %c0_139 = arith.constant 0 : index
    %c0_140 = arith.constant 0 : index
    %198 = vector.load %arg7[%c5_138, %c0_139, %c0_140] : memref<15x8x128xf32, #tpu.memory_space<vmem>>, vector<1x8x128xf32>
    %199 = vector.shape_cast %198 : vector<1x8x128xf32> to vector<8x128xf32>
    %200 = vector.shape_cast %197 : vector<8x128xf32> to vector<1x8x128xf32>
    tpu.vector_store %arg7[%c5_138, %c0_139, %c0_140], %200 {strides = array<i32>} : memref<15x8x128xf32, #tpu.memory_space<vmem>>, vector<1x8x128xf32>,
    %c6_i32 = arith.constant 6 : i32
    %201 = vector.broadcast %c6_i32 : i32 to vector<1x8x128xi32>
    %202 = arith.cmpi eq, %28, %201 : vector<1x8x128xi32>
    %203 = arith.extui %202 : vector<1x8x128xi1> to vector<1x8x128xi32>
    %204 = arith.sitofp %203 : vector<1x8x128xi32> to vector<1x8x128xf32>
    %c6 = arith.constant 6 : index
    %c0_141 = arith.constant 0 : index
    %c0_142 = arith.constant 0 : index
    %205 = vector.load %arg5[%c6, %c0_141, %c0_142] : memref<15x8x128xf32, #tpu.memory_space<vmem>>, vector<1x8x128xf32>
    %206 = vector.shape_cast %205 : vector<1x8x128xf32> to vector<8x128xf32>
    %cst_143 = arith.constant dense<0.000000e+00> : vector<8x128xf32>
    %207 = vector.multi_reduction <add>, %204, %cst_143 [0] : vector<1x8x128xf32> to vector<8x128xf32>
    %208 = arith.addf %206, %207 : vector<8x128xf32>
    %c6_144 = arith.constant 6 : index
    %c0_145 = arith.constant 0 : index
    %c0_146 = arith.constant 0 : index
    %209 = vector.load %arg5[%c6_144, %c0_145, %c0_146] : memref<15x8x128xf32, #tpu.memory_space<vmem>>, vector<1x8x128xf32>
    %210 = vector.shape_cast %209 : vector<1x8x128xf32> to vector<8x128xf32>
    %211 = vector.shape_cast %208 : vector<8x128xf32> to vector<1x8x128xf32>
    tpu.vector_store %arg5[%c6_144, %c0_145, %c0_146], %211 {strides = array<i32>} : memref<15x8x128xf32, #tpu.memory_space<vmem>>, vector<1x8x128xf32>,
    %c6_147 = arith.constant 6 : index
    %c0_148 = arith.constant 0 : index
    %c0_149 = arith.constant 0 : index
    %212 = vector.load %arg6[%c6_147, %c0_148, %c0_149] : memref<15x8x128xf32, #tpu.memory_space<vmem>>, vector<1x8x128xf32>
    %213 = vector.shape_cast %212 : vector<1x8x128xf32> to vector<8x128xf32>
    %cst_150 = arith.constant 0.000000e+00 : f32
    %214 = vector.broadcast %cst_150 : f32 to vector<1x8x128xf32>
    %215 = arith.select %202, %26, %214 : vector<1x8x128xi1>, vector<1x8x128xf32>
    %cst_151 = arith.constant dense<0.000000e+00> : vector<8x128xf32>
    %216 = vector.multi_reduction <add>, %215, %cst_151 [0] : vector<1x8x128xf32> to vector<8x128xf32>
    %217 = arith.addf %213, %216 : vector<8x128xf32>
    %c6_152 = arith.constant 6 : index
    %c0_153 = arith.constant 0 : index
    %c0_154 = arith.constant 0 : index
    %218 = vector.load %arg6[%c6_152, %c0_153, %c0_154] : memref<15x8x128xf32, #tpu.memory_space<vmem>>, vector<1x8x128xf32>
    %219 = vector.shape_cast %218 : vector<1x8x128xf32> to vector<8x128xf32>
    %220 = vector.shape_cast %217 : vector<8x128xf32> to vector<1x8x128xf32>
    tpu.vector_store %arg6[%c6_152, %c0_153, %c0_154], %220 {strides = array<i32>} : memref<15x8x128xf32, #tpu.memory_space<vmem>>, vector<1x8x128xf32>,
    %c6_155 = arith.constant 6 : index
    %c0_156 = arith.constant 0 : index
    %c0_157 = arith.constant 0 : index
    %221 = vector.load %arg7[%c6_155, %c0_156, %c0_157] : memref<15x8x128xf32, #tpu.memory_space<vmem>>, vector<1x8x128xf32>
    %222 = vector.shape_cast %221 : vector<1x8x128xf32> to vector<8x128xf32>
    %223 = arith.mulf %204, %27 : vector<1x8x128xf32>
    %cst_158 = arith.constant dense<0.000000e+00> : vector<8x128xf32>
    %224 = vector.multi_reduction <add>, %223, %cst_158 [0] : vector<1x8x128xf32> to vector<8x128xf32>
    %225 = arith.addf %222, %224 : vector<8x128xf32>
    %c6_159 = arith.constant 6 : index
    %c0_160 = arith.constant 0 : index
    %c0_161 = arith.constant 0 : index
    %226 = vector.load %arg7[%c6_159, %c0_160, %c0_161] : memref<15x8x128xf32, #tpu.memory_space<vmem>>, vector<1x8x128xf32>
    %227 = vector.shape_cast %226 : vector<1x8x128xf32> to vector<8x128xf32>
    %228 = vector.shape_cast %225 : vector<8x128xf32> to vector<1x8x128xf32>
    tpu.vector_store %arg7[%c6_159, %c0_160, %c0_161], %228 {strides = array<i32>} : memref<15x8x128xf32, #tpu.memory_space<vmem>>, vector<1x8x128xf32>,
    %c7_i32 = arith.constant 7 : i32
    %229 = vector.broadcast %c7_i32 : i32 to vector<1x8x128xi32>
    %230 = arith.cmpi eq, %28, %229 : vector<1x8x128xi32>
    %231 = arith.extui %230 : vector<1x8x128xi1> to vector<1x8x128xi32>
    %232 = arith.sitofp %231 : vector<1x8x128xi32> to vector<1x8x128xf32>
    %c7 = arith.constant 7 : index
    %c0_162 = arith.constant 0 : index
    %c0_163 = arith.constant 0 : index
    %233 = vector.load %arg5[%c7, %c0_162, %c0_163] : memref<15x8x128xf32, #tpu.memory_space<vmem>>, vector<1x8x128xf32>
    %234 = vector.shape_cast %233 : vector<1x8x128xf32> to vector<8x128xf32>
    %cst_164 = arith.constant dense<0.000000e+00> : vector<8x128xf32>
    %235 = vector.multi_reduction <add>, %232, %cst_164 [0] : vector<1x8x128xf32> to vector<8x128xf32>
    %236 = arith.addf %234, %235 : vector<8x128xf32>
    %c7_165 = arith.constant 7 : index
    %c0_166 = arith.constant 0 : index
    %c0_167 = arith.constant 0 : index
    %237 = vector.load %arg5[%c7_165, %c0_166, %c0_167] : memref<15x8x128xf32, #tpu.memory_space<vmem>>, vector<1x8x128xf32>
    %238 = vector.shape_cast %237 : vector<1x8x128xf32> to vector<8x128xf32>
    %239 = vector.shape_cast %236 : vector<8x128xf32> to vector<1x8x128xf32>
    tpu.vector_store %arg5[%c7_165, %c0_166, %c0_167], %239 {strides = array<i32>} : memref<15x8x128xf32, #tpu.memory_space<vmem>>, vector<1x8x128xf32>,
    %c7_168 = arith.constant 7 : index
    %c0_169 = arith.constant 0 : index
    %c0_170 = arith.constant 0 : index
    %240 = vector.load %arg6[%c7_168, %c0_169, %c0_170] : memref<15x8x128xf32, #tpu.memory_space<vmem>>, vector<1x8x128xf32>
    %241 = vector.shape_cast %240 : vector<1x8x128xf32> to vector<8x128xf32>
    %cst_171 = arith.constant 0.000000e+00 : f32
    %242 = vector.broadcast %cst_171 : f32 to vector<1x8x128xf32>
    %243 = arith.select %230, %26, %242 : vector<1x8x128xi1>, vector<1x8x128xf32>
    %cst_172 = arith.constant dense<0.000000e+00> : vector<8x128xf32>
    %244 = vector.multi_reduction <add>, %243, %cst_172 [0] : vector<1x8x128xf32> to vector<8x128xf32>
    %245 = arith.addf %241, %244 : vector<8x128xf32>
    %c7_173 = arith.constant 7 : index
    %c0_174 = arith.constant 0 : index
    %c0_175 = arith.constant 0 : index
    %246 = vector.load %arg6[%c7_173, %c0_174, %c0_175] : memref<15x8x128xf32, #tpu.memory_space<vmem>>, vector<1x8x128xf32>
    %247 = vector.shape_cast %246 : vector<1x8x128xf32> to vector<8x128xf32>
    %248 = vector.shape_cast %245 : vector<8x128xf32> to vector<1x8x128xf32>
    tpu.vector_store %arg6[%c7_173, %c0_174, %c0_175], %248 {strides = array<i32>} : memref<15x8x128xf32, #tpu.memory_space<vmem>>, vector<1x8x128xf32>,
    %c7_176 = arith.constant 7 : index
    %c0_177 = arith.constant 0 : index
    %c0_178 = arith.constant 0 : index
    %249 = vector.load %arg7[%c7_176, %c0_177, %c0_178] : memref<15x8x128xf32, #tpu.memory_space<vmem>>, vector<1x8x128xf32>
    %250 = vector.shape_cast %249 : vector<1x8x128xf32> to vector<8x128xf32>
    %251 = arith.mulf %232, %27 : vector<1x8x128xf32>
    %cst_179 = arith.constant dense<0.000000e+00> : vector<8x128xf32>
    %252 = vector.multi_reduction <add>, %251, %cst_179 [0] : vector<1x8x128xf32> to vector<8x128xf32>
    %253 = arith.addf %250, %252 : vector<8x128xf32>
    %c7_180 = arith.constant 7 : index
    %c0_181 = arith.constant 0 : index
    %c0_182 = arith.constant 0 : index
    %254 = vector.load %arg7[%c7_180, %c0_181, %c0_182] : memref<15x8x128xf32, #tpu.memory_space<vmem>>, vector<1x8x128xf32>
    %255 = vector.shape_cast %254 : vector<1x8x128xf32> to vector<8x128xf32>
    %256 = vector.shape_cast %253 : vector<8x128xf32> to vector<1x8x128xf32>
    tpu.vector_store %arg7[%c7_180, %c0_181, %c0_182], %256 {strides = array<i32>} : memref<15x8x128xf32, #tpu.memory_space<vmem>>, vector<1x8x128xf32>,
    %c8_i32_183 = arith.constant 8 : i32
    %257 = vector.broadcast %c8_i32_183 : i32 to vector<1x8x128xi32>
    %258 = arith.cmpi eq, %28, %257 : vector<1x8x128xi32>
    %259 = arith.extui %258 : vector<1x8x128xi1> to vector<1x8x128xi32>
    %260 = arith.sitofp %259 : vector<1x8x128xi32> to vector<1x8x128xf32>
    %c8 = arith.constant 8 : index
    %c0_184 = arith.constant 0 : index
    %c0_185 = arith.constant 0 : index
    %261 = vector.load %arg5[%c8, %c0_184, %c0_185] : memref<15x8x128xf32, #tpu.memory_space<vmem>>, vector<1x8x128xf32>
    %262 = vector.shape_cast %261 : vector<1x8x128xf32> to vector<8x128xf32>
    %cst_186 = arith.constant dense<0.000000e+00> : vector<8x128xf32>
    %263 = vector.multi_reduction <add>, %260, %cst_186 [0] : vector<1x8x128xf32> to vector<8x128xf32>
    %264 = arith.addf %262, %263 : vector<8x128xf32>
    %c8_187 = arith.constant 8 : index
    %c0_188 = arith.constant 0 : index
    %c0_189 = arith.constant 0 : index
    %265 = vector.load %arg5[%c8_187, %c0_188, %c0_189] : memref<15x8x128xf32, #tpu.memory_space<vmem>>, vector<1x8x128xf32>
    %266 = vector.shape_cast %265 : vector<1x8x128xf32> to vector<8x128xf32>
    %267 = vector.shape_cast %264 : vector<8x128xf32> to vector<1x8x128xf32>
    tpu.vector_store %arg5[%c8_187, %c0_188, %c0_189], %267 {strides = array<i32>} : memref<15x8x128xf32, #tpu.memory_space<vmem>>, vector<1x8x128xf32>,
    %c8_190 = arith.constant 8 : index
    %c0_191 = arith.constant 0 : index
    %c0_192 = arith.constant 0 : index
    %268 = vector.load %arg6[%c8_190, %c0_191, %c0_192] : memref<15x8x128xf32, #tpu.memory_space<vmem>>, vector<1x8x128xf32>
    %269 = vector.shape_cast %268 : vector<1x8x128xf32> to vector<8x128xf32>
    %cst_193 = arith.constant 0.000000e+00 : f32
    %270 = vector.broadcast %cst_193 : f32 to vector<1x8x128xf32>
    %271 = arith.select %258, %26, %270 : vector<1x8x128xi1>, vector<1x8x128xf32>
    %cst_194 = arith.constant dense<0.000000e+00> : vector<8x128xf32>
    %272 = vector.multi_reduction <add>, %271, %cst_194 [0] : vector<1x8x128xf32> to vector<8x128xf32>
    %273 = arith.addf %269, %272 : vector<8x128xf32>
    %c8_195 = arith.constant 8 : index
    %c0_196 = arith.constant 0 : index
    %c0_197 = arith.constant 0 : index
    %274 = vector.load %arg6[%c8_195, %c0_196, %c0_197] : memref<15x8x128xf32, #tpu.memory_space<vmem>>, vector<1x8x128xf32>
    %275 = vector.shape_cast %274 : vector<1x8x128xf32> to vector<8x128xf32>
    %276 = vector.shape_cast %273 : vector<8x128xf32> to vector<1x8x128xf32>
    tpu.vector_store %arg6[%c8_195, %c0_196, %c0_197], %276 {strides = array<i32>} : memref<15x8x128xf32, #tpu.memory_space<vmem>>, vector<1x8x128xf32>,
    %c8_198 = arith.constant 8 : index
    %c0_199 = arith.constant 0 : index
    %c0_200 = arith.constant 0 : index
    %277 = vector.load %arg7[%c8_198, %c0_199, %c0_200] : memref<15x8x128xf32, #tpu.memory_space<vmem>>, vector<1x8x128xf32>
    %278 = vector.shape_cast %277 : vector<1x8x128xf32> to vector<8x128xf32>
    %279 = arith.mulf %260, %27 : vector<1x8x128xf32>
    %cst_201 = arith.constant dense<0.000000e+00> : vector<8x128xf32>
    %280 = vector.multi_reduction <add>, %279, %cst_201 [0] : vector<1x8x128xf32> to vector<8x128xf32>
    %281 = arith.addf %278, %280 : vector<8x128xf32>
    %c8_202 = arith.constant 8 : index
    %c0_203 = arith.constant 0 : index
    %c0_204 = arith.constant 0 : index
    %282 = vector.load %arg7[%c8_202, %c0_203, %c0_204] : memref<15x8x128xf32, #tpu.memory_space<vmem>>, vector<1x8x128xf32>
    %283 = vector.shape_cast %282 : vector<1x8x128xf32> to vector<8x128xf32>
    %284 = vector.shape_cast %281 : vector<8x128xf32> to vector<1x8x128xf32>
    tpu.vector_store %arg7[%c8_202, %c0_203, %c0_204], %284 {strides = array<i32>} : memref<15x8x128xf32, #tpu.memory_space<vmem>>, vector<1x8x128xf32>,
    %c9_i32 = arith.constant 9 : i32
    %285 = vector.broadcast %c9_i32 : i32 to vector<1x8x128xi32>
    %286 = arith.cmpi eq, %28, %285 : vector<1x8x128xi32>
    %287 = arith.extui %286 : vector<1x8x128xi1> to vector<1x8x128xi32>
    %288 = arith.sitofp %287 : vector<1x8x128xi32> to vector<1x8x128xf32>
    %c9 = arith.constant 9 : index
    %c0_205 = arith.constant 0 : index
    %c0_206 = arith.constant 0 : index
    %289 = vector.load %arg5[%c9, %c0_205, %c0_206] : memref<15x8x128xf32, #tpu.memory_space<vmem>>, vector<1x8x128xf32>
    %290 = vector.shape_cast %289 : vector<1x8x128xf32> to vector<8x128xf32>
    %cst_207 = arith.constant dense<0.000000e+00> : vector<8x128xf32>
    %291 = vector.multi_reduction <add>, %288, %cst_207 [0] : vector<1x8x128xf32> to vector<8x128xf32>
    %292 = arith.addf %290, %291 : vector<8x128xf32>
    %c9_208 = arith.constant 9 : index
    %c0_209 = arith.constant 0 : index
    %c0_210 = arith.constant 0 : index
    %293 = vector.load %arg5[%c9_208, %c0_209, %c0_210] : memref<15x8x128xf32, #tpu.memory_space<vmem>>, vector<1x8x128xf32>
    %294 = vector.shape_cast %293 : vector<1x8x128xf32> to vector<8x128xf32>
    %295 = vector.shape_cast %292 : vector<8x128xf32> to vector<1x8x128xf32>
    tpu.vector_store %arg5[%c9_208, %c0_209, %c0_210], %295 {strides = array<i32>} : memref<15x8x128xf32, #tpu.memory_space<vmem>>, vector<1x8x128xf32>,
    %c9_211 = arith.constant 9 : index
    %c0_212 = arith.constant 0 : index
    %c0_213 = arith.constant 0 : index
    %296 = vector.load %arg6[%c9_211, %c0_212, %c0_213] : memref<15x8x128xf32, #tpu.memory_space<vmem>>, vector<1x8x128xf32>
    %297 = vector.shape_cast %296 : vector<1x8x128xf32> to vector<8x128xf32>
    %cst_214 = arith.constant 0.000000e+00 : f32
    %298 = vector.broadcast %cst_214 : f32 to vector<1x8x128xf32>
    %299 = arith.select %286, %26, %298 : vector<1x8x128xi1>, vector<1x8x128xf32>
    %cst_215 = arith.constant dense<0.000000e+00> : vector<8x128xf32>
    %300 = vector.multi_reduction <add>, %299, %cst_215 [0] : vector<1x8x128xf32> to vector<8x128xf32>
    %301 = arith.addf %297, %300 : vector<8x128xf32>
    %c9_216 = arith.constant 9 : index
    %c0_217 = arith.constant 0 : index
    %c0_218 = arith.constant 0 : index
    %302 = vector.load %arg6[%c9_216, %c0_217, %c0_218] : memref<15x8x128xf32, #tpu.memory_space<vmem>>, vector<1x8x128xf32>
    %303 = vector.shape_cast %302 : vector<1x8x128xf32> to vector<8x128xf32>
    %304 = vector.shape_cast %301 : vector<8x128xf32> to vector<1x8x128xf32>
    tpu.vector_store %arg6[%c9_216, %c0_217, %c0_218], %304 {strides = array<i32>} : memref<15x8x128xf32, #tpu.memory_space<vmem>>, vector<1x8x128xf32>,
    %c9_219 = arith.constant 9 : index
    %c0_220 = arith.constant 0 : index
    %c0_221 = arith.constant 0 : index
    %305 = vector.load %arg7[%c9_219, %c0_220, %c0_221] : memref<15x8x128xf32, #tpu.memory_space<vmem>>, vector<1x8x128xf32>
    %306 = vector.shape_cast %305 : vector<1x8x128xf32> to vector<8x128xf32>
    %307 = arith.mulf %288, %27 : vector<1x8x128xf32>
    %cst_222 = arith.constant dense<0.000000e+00> : vector<8x128xf32>
    %308 = vector.multi_reduction <add>, %307, %cst_222 [0] : vector<1x8x128xf32> to vector<8x128xf32>
    %309 = arith.addf %306, %308 : vector<8x128xf32>
    %c9_223 = arith.constant 9 : index
    %c0_224 = arith.constant 0 : index
    %c0_225 = arith.constant 0 : index
    %310 = vector.load %arg7[%c9_223, %c0_224, %c0_225] : memref<15x8x128xf32, #tpu.memory_space<vmem>>, vector<1x8x128xf32>
    %311 = vector.shape_cast %310 : vector<1x8x128xf32> to vector<8x128xf32>
    %312 = vector.shape_cast %309 : vector<8x128xf32> to vector<1x8x128xf32>
    tpu.vector_store %arg7[%c9_223, %c0_224, %c0_225], %312 {strides = array<i32>} : memref<15x8x128xf32, #tpu.memory_space<vmem>>, vector<1x8x128xf32>,
    %c10_i32 = arith.constant 10 : i32
    %313 = vector.broadcast %c10_i32 : i32 to vector<1x8x128xi32>
    %314 = arith.cmpi eq, %28, %313 : vector<1x8x128xi32>
    %315 = arith.extui %314 : vector<1x8x128xi1> to vector<1x8x128xi32>
    %316 = arith.sitofp %315 : vector<1x8x128xi32> to vector<1x8x128xf32>
    %c10 = arith.constant 10 : index
    %c0_226 = arith.constant 0 : index
    %c0_227 = arith.constant 0 : index
    %317 = vector.load %arg5[%c10, %c0_226, %c0_227] : memref<15x8x128xf32, #tpu.memory_space<vmem>>, vector<1x8x128xf32>
    %318 = vector.shape_cast %317 : vector<1x8x128xf32> to vector<8x128xf32>
    %cst_228 = arith.constant dense<0.000000e+00> : vector<8x128xf32>
    %319 = vector.multi_reduction <add>, %316, %cst_228 [0] : vector<1x8x128xf32> to vector<8x128xf32>
    %320 = arith.addf %318, %319 : vector<8x128xf32>
    %c10_229 = arith.constant 10 : index
    %c0_230 = arith.constant 0 : index
    %c0_231 = arith.constant 0 : index
    %321 = vector.load %arg5[%c10_229, %c0_230, %c0_231] : memref<15x8x128xf32, #tpu.memory_space<vmem>>, vector<1x8x128xf32>
    %322 = vector.shape_cast %321 : vector<1x8x128xf32> to vector<8x128xf32>
    %323 = vector.shape_cast %320 : vector<8x128xf32> to vector<1x8x128xf32>
    tpu.vector_store %arg5[%c10_229, %c0_230, %c0_231], %323 {strides = array<i32>} : memref<15x8x128xf32, #tpu.memory_space<vmem>>, vector<1x8x128xf32>,
    %c10_232 = arith.constant 10 : index
    %c0_233 = arith.constant 0 : index
    %c0_234 = arith.constant 0 : index
    %324 = vector.load %arg6[%c10_232, %c0_233, %c0_234] : memref<15x8x128xf32, #tpu.memory_space<vmem>>, vector<1x8x128xf32>
    %325 = vector.shape_cast %324 : vector<1x8x128xf32> to vector<8x128xf32>
    %cst_235 = arith.constant 0.000000e+00 : f32
    %326 = vector.broadcast %cst_235 : f32 to vector<1x8x128xf32>
    %327 = arith.select %314, %26, %326 : vector<1x8x128xi1>, vector<1x8x128xf32>
    %cst_236 = arith.constant dense<0.000000e+00> : vector<8x128xf32>
    %328 = vector.multi_reduction <add>, %327, %cst_236 [0] : vector<1x8x128xf32> to vector<8x128xf32>
    %329 = arith.addf %325, %328 : vector<8x128xf32>
    %c10_237 = arith.constant 10 : index
    %c0_238 = arith.constant 0 : index
    %c0_239 = arith.constant 0 : index
    %330 = vector.load %arg6[%c10_237, %c0_238, %c0_239] : memref<15x8x128xf32, #tpu.memory_space<vmem>>, vector<1x8x128xf32>
    %331 = vector.shape_cast %330 : vector<1x8x128xf32> to vector<8x128xf32>
    %332 = vector.shape_cast %329 : vector<8x128xf32> to vector<1x8x128xf32>
    tpu.vector_store %arg6[%c10_237, %c0_238, %c0_239], %332 {strides = array<i32>} : memref<15x8x128xf32, #tpu.memory_space<vmem>>, vector<1x8x128xf32>,
    %c10_240 = arith.constant 10 : index
    %c0_241 = arith.constant 0 : index
    %c0_242 = arith.constant 0 : index
    %333 = vector.load %arg7[%c10_240, %c0_241, %c0_242] : memref<15x8x128xf32, #tpu.memory_space<vmem>>, vector<1x8x128xf32>
    %334 = vector.shape_cast %333 : vector<1x8x128xf32> to vector<8x128xf32>
    %335 = arith.mulf %316, %27 : vector<1x8x128xf32>
    %cst_243 = arith.constant dense<0.000000e+00> : vector<8x128xf32>
    %336 = vector.multi_reduction <add>, %335, %cst_243 [0] : vector<1x8x128xf32> to vector<8x128xf32>
    %337 = arith.addf %334, %336 : vector<8x128xf32>
    %c10_244 = arith.constant 10 : index
    %c0_245 = arith.constant 0 : index
    %c0_246 = arith.constant 0 : index
    %338 = vector.load %arg7[%c10_244, %c0_245, %c0_246] : memref<15x8x128xf32, #tpu.memory_space<vmem>>, vector<1x8x128xf32>
    %339 = vector.shape_cast %338 : vector<1x8x128xf32> to vector<8x128xf32>
    %340 = vector.shape_cast %337 : vector<8x128xf32> to vector<1x8x128xf32>
    tpu.vector_store %arg7[%c10_244, %c0_245, %c0_246], %340 {strides = array<i32>} : memref<15x8x128xf32, #tpu.memory_space<vmem>>, vector<1x8x128xf32>,
    %c11_i32 = arith.constant 11 : i32
    %341 = vector.broadcast %c11_i32 : i32 to vector<1x8x128xi32>
    %342 = arith.cmpi eq, %28, %341 : vector<1x8x128xi32>
    %343 = arith.extui %342 : vector<1x8x128xi1> to vector<1x8x128xi32>
    %344 = arith.sitofp %343 : vector<1x8x128xi32> to vector<1x8x128xf32>
    %c11 = arith.constant 11 : index
    %c0_247 = arith.constant 0 : index
    %c0_248 = arith.constant 0 : index
    %345 = vector.load %arg5[%c11, %c0_247, %c0_248] : memref<15x8x128xf32, #tpu.memory_space<vmem>>, vector<1x8x128xf32>
    %346 = vector.shape_cast %345 : vector<1x8x128xf32> to vector<8x128xf32>
    %cst_249 = arith.constant dense<0.000000e+00> : vector<8x128xf32>
    %347 = vector.multi_reduction <add>, %344, %cst_249 [0] : vector<1x8x128xf32> to vector<8x128xf32>
    %348 = arith.addf %346, %347 : vector<8x128xf32>
    %c11_250 = arith.constant 11 : index
    %c0_251 = arith.constant 0 : index
    %c0_252 = arith.constant 0 : index
    %349 = vector.load %arg5[%c11_250, %c0_251, %c0_252] : memref<15x8x128xf32, #tpu.memory_space<vmem>>, vector<1x8x128xf32>
    %350 = vector.shape_cast %349 : vector<1x8x128xf32> to vector<8x128xf32>
    %351 = vector.shape_cast %348 : vector<8x128xf32> to vector<1x8x128xf32>
    tpu.vector_store %arg5[%c11_250, %c0_251, %c0_252], %351 {strides = array<i32>} : memref<15x8x128xf32, #tpu.memory_space<vmem>>, vector<1x8x128xf32>,
    %c11_253 = arith.constant 11 : index
    %c0_254 = arith.constant 0 : index
    %c0_255 = arith.constant 0 : index
    %352 = vector.load %arg6[%c11_253, %c0_254, %c0_255] : memref<15x8x128xf32, #tpu.memory_space<vmem>>, vector<1x8x128xf32>
    %353 = vector.shape_cast %352 : vector<1x8x128xf32> to vector<8x128xf32>
    %cst_256 = arith.constant 0.000000e+00 : f32
    %354 = vector.broadcast %cst_256 : f32 to vector<1x8x128xf32>
    %355 = arith.select %342, %26, %354 : vector<1x8x128xi1>, vector<1x8x128xf32>
    %cst_257 = arith.constant dense<0.000000e+00> : vector<8x128xf32>
    %356 = vector.multi_reduction <add>, %355, %cst_257 [0] : vector<1x8x128xf32> to vector<8x128xf32>
    %357 = arith.addf %353, %356 : vector<8x128xf32>
    %c11_258 = arith.constant 11 : index
    %c0_259 = arith.constant 0 : index
    %c0_260 = arith.constant 0 : index
    %358 = vector.load %arg6[%c11_258, %c0_259, %c0_260] : memref<15x8x128xf32, #tpu.memory_space<vmem>>, vector<1x8x128xf32>
    %359 = vector.shape_cast %358 : vector<1x8x128xf32> to vector<8x128xf32>
    %360 = vector.shape_cast %357 : vector<8x128xf32> to vector<1x8x128xf32>
    tpu.vector_store %arg6[%c11_258, %c0_259, %c0_260], %360 {strides = array<i32>} : memref<15x8x128xf32, #tpu.memory_space<vmem>>, vector<1x8x128xf32>,
    %c11_261 = arith.constant 11 : index
    %c0_262 = arith.constant 0 : index
    %c0_263 = arith.constant 0 : index
    %361 = vector.load %arg7[%c11_261, %c0_262, %c0_263] : memref<15x8x128xf32, #tpu.memory_space<vmem>>, vector<1x8x128xf32>
    %362 = vector.shape_cast %361 : vector<1x8x128xf32> to vector<8x128xf32>
    %363 = arith.mulf %344, %27 : vector<1x8x128xf32>
    %cst_264 = arith.constant dense<0.000000e+00> : vector<8x128xf32>
    %364 = vector.multi_reduction <add>, %363, %cst_264 [0] : vector<1x8x128xf32> to vector<8x128xf32>
    %365 = arith.addf %362, %364 : vector<8x128xf32>
    %c11_265 = arith.constant 11 : index
    %c0_266 = arith.constant 0 : index
    %c0_267 = arith.constant 0 : index
    %366 = vector.load %arg7[%c11_265, %c0_266, %c0_267] : memref<15x8x128xf32, #tpu.memory_space<vmem>>, vector<1x8x128xf32>
    %367 = vector.shape_cast %366 : vector<1x8x128xf32> to vector<8x128xf32>
    %368 = vector.shape_cast %365 : vector<8x128xf32> to vector<1x8x128xf32>
    tpu.vector_store %arg7[%c11_265, %c0_266, %c0_267], %368 {strides = array<i32>} : memref<15x8x128xf32, #tpu.memory_space<vmem>>, vector<1x8x128xf32>,
    %c12_i32 = arith.constant 12 : i32
    %369 = vector.broadcast %c12_i32 : i32 to vector<1x8x128xi32>
    %370 = arith.cmpi eq, %28, %369 : vector<1x8x128xi32>
    %371 = arith.extui %370 : vector<1x8x128xi1> to vector<1x8x128xi32>
    %372 = arith.sitofp %371 : vector<1x8x128xi32> to vector<1x8x128xf32>
    %c12 = arith.constant 12 : index
    %c0_268 = arith.constant 0 : index
    %c0_269 = arith.constant 0 : index
    %373 = vector.load %arg5[%c12, %c0_268, %c0_269] : memref<15x8x128xf32, #tpu.memory_space<vmem>>, vector<1x8x128xf32>
    %374 = vector.shape_cast %373 : vector<1x8x128xf32> to vector<8x128xf32>
    %cst_270 = arith.constant dense<0.000000e+00> : vector<8x128xf32>
    %375 = vector.multi_reduction <add>, %372, %cst_270 [0] : vector<1x8x128xf32> to vector<8x128xf32>
    %376 = arith.addf %374, %375 : vector<8x128xf32>
    %c12_271 = arith.constant 12 : index
    %c0_272 = arith.constant 0 : index
    %c0_273 = arith.constant 0 : index
    %377 = vector.load %arg5[%c12_271, %c0_272, %c0_273] : memref<15x8x128xf32, #tpu.memory_space<vmem>>, vector<1x8x128xf32>
    %378 = vector.shape_cast %377 : vector<1x8x128xf32> to vector<8x128xf32>
    %379 = vector.shape_cast %376 : vector<8x128xf32> to vector<1x8x128xf32>
    tpu.vector_store %arg5[%c12_271, %c0_272, %c0_273], %379 {strides = array<i32>} : memref<15x8x128xf32, #tpu.memory_space<vmem>>, vector<1x8x128xf32>,
    %c12_274 = arith.constant 12 : index
    %c0_275 = arith.constant 0 : index
    %c0_276 = arith.constant 0 : index
    %380 = vector.load %arg6[%c12_274, %c0_275, %c0_276] : memref<15x8x128xf32, #tpu.memory_space<vmem>>, vector<1x8x128xf32>
    %381 = vector.shape_cast %380 : vector<1x8x128xf32> to vector<8x128xf32>
    %cst_277 = arith.constant 0.000000e+00 : f32
    %382 = vector.broadcast %cst_277 : f32 to vector<1x8x128xf32>
    %383 = arith.select %370, %26, %382 : vector<1x8x128xi1>, vector<1x8x128xf32>
    %cst_278 = arith.constant dense<0.000000e+00> : vector<8x128xf32>
    %384 = vector.multi_reduction <add>, %383, %cst_278 [0] : vector<1x8x128xf32> to vector<8x128xf32>
    %385 = arith.addf %381, %384 : vector<8x128xf32>
    %c12_279 = arith.constant 12 : index
    %c0_280 = arith.constant 0 : index
    %c0_281 = arith.constant 0 : index
    %386 = vector.load %arg6[%c12_279, %c0_280, %c0_281] : memref<15x8x128xf32, #tpu.memory_space<vmem>>, vector<1x8x128xf32>
    %387 = vector.shape_cast %386 : vector<1x8x128xf32> to vector<8x128xf32>
    %388 = vector.shape_cast %385 : vector<8x128xf32> to vector<1x8x128xf32>
    tpu.vector_store %arg6[%c12_279, %c0_280, %c0_281], %388 {strides = array<i32>} : memref<15x8x128xf32, #tpu.memory_space<vmem>>, vector<1x8x128xf32>,
    %c12_282 = arith.constant 12 : index
    %c0_283 = arith.constant 0 : index
    %c0_284 = arith.constant 0 : index
    %389 = vector.load %arg7[%c12_282, %c0_283, %c0_284] : memref<15x8x128xf32, #tpu.memory_space<vmem>>, vector<1x8x128xf32>
    %390 = vector.shape_cast %389 : vector<1x8x128xf32> to vector<8x128xf32>
    %391 = arith.mulf %372, %27 : vector<1x8x128xf32>
    %cst_285 = arith.constant dense<0.000000e+00> : vector<8x128xf32>
    %392 = vector.multi_reduction <add>, %391, %cst_285 [0] : vector<1x8x128xf32> to vector<8x128xf32>
    %393 = arith.addf %390, %392 : vector<8x128xf32>
    %c12_286 = arith.constant 12 : index
    %c0_287 = arith.constant 0 : index
    %c0_288 = arith.constant 0 : index
    %394 = vector.load %arg7[%c12_286, %c0_287, %c0_288] : memref<15x8x128xf32, #tpu.memory_space<vmem>>, vector<1x8x128xf32>
    %395 = vector.shape_cast %394 : vector<1x8x128xf32> to vector<8x128xf32>
    %396 = vector.shape_cast %393 : vector<8x128xf32> to vector<1x8x128xf32>
    tpu.vector_store %arg7[%c12_286, %c0_287, %c0_288], %396 {strides = array<i32>} : memref<15x8x128xf32, #tpu.memory_space<vmem>>, vector<1x8x128xf32>,
    %c13_i32 = arith.constant 13 : i32
    %397 = vector.broadcast %c13_i32 : i32 to vector<1x8x128xi32>
    %398 = arith.cmpi eq, %28, %397 : vector<1x8x128xi32>
    %399 = arith.extui %398 : vector<1x8x128xi1> to vector<1x8x128xi32>
    %400 = arith.sitofp %399 : vector<1x8x128xi32> to vector<1x8x128xf32>
    %c13 = arith.constant 13 : index
    %c0_289 = arith.constant 0 : index
    %c0_290 = arith.constant 0 : index
    %401 = vector.load %arg5[%c13, %c0_289, %c0_290] : memref<15x8x128xf32, #tpu.memory_space<vmem>>, vector<1x8x128xf32>
    %402 = vector.shape_cast %401 : vector<1x8x128xf32> to vector<8x128xf32>
    %cst_291 = arith.constant dense<0.000000e+00> : vector<8x128xf32>
    %403 = vector.multi_reduction <add>, %400, %cst_291 [0] : vector<1x8x128xf32> to vector<8x128xf32>
    %404 = arith.addf %402, %403 : vector<8x128xf32>
    %c13_292 = arith.constant 13 : index
    %c0_293 = arith.constant 0 : index
    %c0_294 = arith.constant 0 : index
    %405 = vector.load %arg5[%c13_292, %c0_293, %c0_294] : memref<15x8x128xf32, #tpu.memory_space<vmem>>, vector<1x8x128xf32>
    %406 = vector.shape_cast %405 : vector<1x8x128xf32> to vector<8x128xf32>
    %407 = vector.shape_cast %404 : vector<8x128xf32> to vector<1x8x128xf32>
    tpu.vector_store %arg5[%c13_292, %c0_293, %c0_294], %407 {strides = array<i32>} : memref<15x8x128xf32, #tpu.memory_space<vmem>>, vector<1x8x128xf32>,
    %c13_295 = arith.constant 13 : index
    %c0_296 = arith.constant 0 : index
    %c0_297 = arith.constant 0 : index
    %408 = vector.load %arg6[%c13_295, %c0_296, %c0_297] : memref<15x8x128xf32, #tpu.memory_space<vmem>>, vector<1x8x128xf32>
    %409 = vector.shape_cast %408 : vector<1x8x128xf32> to vector<8x128xf32>
    %cst_298 = arith.constant 0.000000e+00 : f32
    %410 = vector.broadcast %cst_298 : f32 to vector<1x8x128xf32>
    %411 = arith.select %398, %26, %410 : vector<1x8x128xi1>, vector<1x8x128xf32>
    %cst_299 = arith.constant dense<0.000000e+00> : vector<8x128xf32>
    %412 = vector.multi_reduction <add>, %411, %cst_299 [0] : vector<1x8x128xf32> to vector<8x128xf32>
    %413 = arith.addf %409, %412 : vector<8x128xf32>
    %c13_300 = arith.constant 13 : index
    %c0_301 = arith.constant 0 : index
    %c0_302 = arith.constant 0 : index
    %414 = vector.load %arg6[%c13_300, %c0_301, %c0_302] : memref<15x8x128xf32, #tpu.memory_space<vmem>>, vector<1x8x128xf32>
    %415 = vector.shape_cast %414 : vector<1x8x128xf32> to vector<8x128xf32>
    %416 = vector.shape_cast %413 : vector<8x128xf32> to vector<1x8x128xf32>
    tpu.vector_store %arg6[%c13_300, %c0_301, %c0_302], %416 {strides = array<i32>} : memref<15x8x128xf32, #tpu.memory_space<vmem>>, vector<1x8x128xf32>,
    %c13_303 = arith.constant 13 : index
    %c0_304 = arith.constant 0 : index
    %c0_305 = arith.constant 0 : index
    %417 = vector.load %arg7[%c13_303, %c0_304, %c0_305] : memref<15x8x128xf32, #tpu.memory_space<vmem>>, vector<1x8x128xf32>
    %418 = vector.shape_cast %417 : vector<1x8x128xf32> to vector<8x128xf32>
    %419 = arith.mulf %400, %27 : vector<1x8x128xf32>
    %cst_306 = arith.constant dense<0.000000e+00> : vector<8x128xf32>
    %420 = vector.multi_reduction <add>, %419, %cst_306 [0] : vector<1x8x128xf32> to vector<8x128xf32>
    %421 = arith.addf %418, %420 : vector<8x128xf32>
    %c13_307 = arith.constant 13 : index
    %c0_308 = arith.constant 0 : index
    %c0_309 = arith.constant 0 : index
    %422 = vector.load %arg7[%c13_307, %c0_308, %c0_309] : memref<15x8x128xf32, #tpu.memory_space<vmem>>, vector<1x8x128xf32>
    %423 = vector.shape_cast %422 : vector<1x8x128xf32> to vector<8x128xf32>
    %424 = vector.shape_cast %421 : vector<8x128xf32> to vector<1x8x128xf32>
    tpu.vector_store %arg7[%c13_307, %c0_308, %c0_309], %424 {strides = array<i32>} : memref<15x8x128xf32, #tpu.memory_space<vmem>>, vector<1x8x128xf32>,
    %c14_i32 = arith.constant 14 : i32
    %425 = vector.broadcast %c14_i32 : i32 to vector<1x8x128xi32>
    %426 = arith.cmpi eq, %28, %425 : vector<1x8x128xi32>
    %427 = arith.extui %426 : vector<1x8x128xi1> to vector<1x8x128xi32>
    %428 = arith.sitofp %427 : vector<1x8x128xi32> to vector<1x8x128xf32>
    %c14 = arith.constant 14 : index
    %c0_310 = arith.constant 0 : index
    %c0_311 = arith.constant 0 : index
    %429 = vector.load %arg5[%c14, %c0_310, %c0_311] : memref<15x8x128xf32, #tpu.memory_space<vmem>>, vector<1x8x128xf32>
    %430 = vector.shape_cast %429 : vector<1x8x128xf32> to vector<8x128xf32>
    %cst_312 = arith.constant dense<0.000000e+00> : vector<8x128xf32>
    %431 = vector.multi_reduction <add>, %428, %cst_312 [0] : vector<1x8x128xf32> to vector<8x128xf32>
    %432 = arith.addf %430, %431 : vector<8x128xf32>
    %c14_313 = arith.constant 14 : index
    %c0_314 = arith.constant 0 : index
    %c0_315 = arith.constant 0 : index
    %433 = vector.load %arg5[%c14_313, %c0_314, %c0_315] : memref<15x8x128xf32, #tpu.memory_space<vmem>>, vector<1x8x128xf32>
    %434 = vector.shape_cast %433 : vector<1x8x128xf32> to vector<8x128xf32>
    %435 = vector.shape_cast %432 : vector<8x128xf32> to vector<1x8x128xf32>
    tpu.vector_store %arg5[%c14_313, %c0_314, %c0_315], %435 {strides = array<i32>} : memref<15x8x128xf32, #tpu.memory_space<vmem>>, vector<1x8x128xf32>,
    %c14_316 = arith.constant 14 : index
    %c0_317 = arith.constant 0 : index
    %c0_318 = arith.constant 0 : index
    %436 = vector.load %arg6[%c14_316, %c0_317, %c0_318] : memref<15x8x128xf32, #tpu.memory_space<vmem>>, vector<1x8x128xf32>
    %437 = vector.shape_cast %436 : vector<1x8x128xf32> to vector<8x128xf32>
    %cst_319 = arith.constant 0.000000e+00 : f32
    %438 = vector.broadcast %cst_319 : f32 to vector<1x8x128xf32>
    %439 = arith.select %426, %26, %438 : vector<1x8x128xi1>, vector<1x8x128xf32>
    %cst_320 = arith.constant dense<0.000000e+00> : vector<8x128xf32>
    %440 = vector.multi_reduction <add>, %439, %cst_320 [0] : vector<1x8x128xf32> to vector<8x128xf32>
    %441 = arith.addf %437, %440 : vector<8x128xf32>
    %c14_321 = arith.constant 14 : index
    %c0_322 = arith.constant 0 : index
    %c0_323 = arith.constant 0 : index
    %442 = vector.load %arg6[%c14_321, %c0_322, %c0_323] : memref<15x8x128xf32, #tpu.memory_space<vmem>>, vector<1x8x128xf32>
    %443 = vector.shape_cast %442 : vector<1x8x128xf32> to vector<8x128xf32>
    %444 = vector.shape_cast %441 : vector<8x128xf32> to vector<1x8x128xf32>
    tpu.vector_store %arg6[%c14_321, %c0_322, %c0_323], %444 {strides = array<i32>} : memref<15x8x128xf32, #tpu.memory_space<vmem>>, vector<1x8x128xf32>,
    %c14_324 = arith.constant 14 : index
    %c0_325 = arith.constant 0 : index
    %c0_326 = arith.constant 0 : index
    %445 = vector.load %arg7[%c14_324, %c0_325, %c0_326] : memref<15x8x128xf32, #tpu.memory_space<vmem>>, vector<1x8x128xf32>
    %446 = vector.shape_cast %445 : vector<1x8x128xf32> to vector<8x128xf32>
    %447 = arith.mulf %428, %27 : vector<1x8x128xf32>
    %cst_327 = arith.constant dense<0.000000e+00> : vector<8x128xf32>
    %448 = vector.multi_reduction <add>, %447, %cst_327 [0] : vector<1x8x128xf32> to vector<8x128xf32>
    %449 = arith.addf %446, %448 : vector<8x128xf32>
    %c14_328 = arith.constant 14 : index
    %c0_329 = arith.constant 0 : index
    %c0_330 = arith.constant 0 : index
    %450 = vector.load %arg7[%c14_328, %c0_329, %c0_330] : memref<15x8x128xf32, #tpu.memory_space<vmem>>, vector<1x8x128xf32>
    %451 = vector.shape_cast %450 : vector<1x8x128xf32> to vector<8x128xf32>
    %452 = vector.shape_cast %449 : vector<8x128xf32> to vector<1x8x128xf32>
    tpu.vector_store %arg7[%c14_328, %c0_329, %c0_330], %452 {strides = array<i32>} : memref<15x8x128xf32, #tpu.memory_space<vmem>>, vector<1x8x128xf32>,
    %c0_i32_331 = arith.constant 0 : i32
    %453 = arith.cmpi eq, %arg0, %c0_i32_331 : i32
    %454 = arith.extui %453 : i1 to i32
    %c0_i32_332 = arith.constant 0 : i32
    %455 = arith.cmpi ne, %454, %c0_i32_332 : i32
    scf.if %455 {
      %456 = arith.sitofp %5 : i32 to f32
      %c0_333 = arith.constant 0 : index
      %c0_334 = arith.constant 0 : index
      %457 = vector.load %arg8[%c0_333, %c0_334] : memref<8x128xf32, #tpu.memory_space<vmem>>, vector<8x128xf32>
      %458 = vector.shape_cast %457 : vector<8x128xf32> to vector<1x8x128xf32>
      %cst_335 = arith.constant dense<0.000000e+00> : vector<1xf32>
      %459 = vector.multi_reduction <add>, %458, %cst_335 [1, 2] : vector<1x8x128xf32> to vector<1xf32>
      %460 = vector.shape_cast %459 : vector<1xf32> to vector<1x1x1xf32>
      %461 = vector.extract %460[0, 0, 0] : f32 from vector<1x1x1xf32>
      %462 = vector.broadcast %461 : f32 to vector<1x1xf32>
      %463 = vector.broadcast %456 : f32 to vector<1x1xf32>
      %464 = arith.divf %462, %463 : vector<1x1xf32>
      %cst_336 = arith.constant 2.000000e+00 : f32
      %465 = vector.broadcast %cst_336 : f32 to vector<1x1xf32>
      %466 = arith.mulf %465, %464 : vector<1x1xf32>
      %cst_337 = arith.constant 5.000000e-01 : f32
      %467 = vector.broadcast %cst_337 : f32 to vector<1x1xf32>
      %468 = arith.addf %467, %464 : vector<1x1xf32>
      %cst_338 = arith.constant 0.000000e+00 : f32
      %469 = vector.broadcast %cst_338 : f32 to vector<1x1xf32>
      %cst_339 = arith.constant 0.000000e+00 : f32
      %470 = vector.broadcast %cst_339 : f32 to vector<1x1xf32>
      %c0_340 = arith.constant 0 : index
      %c0_341 = arith.constant 0 : index
      %c0_342 = arith.constant 0 : index
      %471 = vector.load %arg5[%c0_340, %c0_341, %c0_342] : memref<15x8x128xf32, #tpu.memory_space<vmem>>, vector<1x8x128xf32>
      %472 = vector.shape_cast %471 : vector<1x8x128xf32> to vector<8x128xf32>
      %473 = vector.shape_cast %472 : vector<8x128xf32> to vector<1x8x128xf32>
      %cst_343 = arith.constant dense<0.000000e+00> : vector<1xf32>
      %474 = vector.multi_reduction <add>, %473, %cst_343 [1, 2] : vector<1x8x128xf32> to vector<1xf32>
      %475 = vector.shape_cast %474 : vector<1xf32> to vector<1x1x1xf32>
      %476 = vector.extract %475[0, 0, 0] : f32 from vector<1x1x1xf32>
      %477 = vector.broadcast %476 : f32 to vector<1x1xf32>
      %c0_344 = arith.constant 0 : index
      %c0_345 = arith.constant 0 : index
      %c0_346 = arith.constant 0 : index
      %478 = vector.load %arg6[%c0_344, %c0_345, %c0_346] : memref<15x8x128xf32, #tpu.memory_space<vmem>>, vector<1x8x128xf32>
      %479 = vector.shape_cast %478 : vector<1x8x128xf32> to vector<8x128xf32>
      %480 = vector.shape_cast %479 : vector<8x128xf32> to vector<1x8x128xf32>
      %cst_347 = arith.constant dense<0.000000e+00> : vector<1xf32>
      %481 = vector.multi_reduction <add>, %480, %cst_347 [1, 2] : vector<1x8x128xf32> to vector<1xf32>
      %482 = vector.shape_cast %481 : vector<1xf32> to vector<1x1x1xf32>
      %483 = vector.extract %482[0, 0, 0] : f32 from vector<1x1x1xf32>
      %484 = vector.broadcast %483 : f32 to vector<1x1xf32>
      %c0_348 = arith.constant 0 : index
      %c0_349 = arith.constant 0 : index
      %c0_350 = arith.constant 0 : index
      %485 = vector.load %arg7[%c0_348, %c0_349, %c0_350] : memref<15x8x128xf32, #tpu.memory_space<vmem>>, vector<1x8x128xf32>
      %486 = vector.shape_cast %485 : vector<1x8x128xf32> to vector<8x128xf32>
      %487 = vector.shape_cast %486 : vector<8x128xf32> to vector<1x8x128xf32>
      %cst_351 = arith.constant dense<0.000000e+00> : vector<1xf32>
      %488 = vector.multi_reduction <add>, %487, %cst_351 [1, 2] : vector<1x8x128xf32> to vector<1xf32>
      %489 = vector.shape_cast %488 : vector<1xf32> to vector<1x1x1xf32>
      %490 = vector.extract %489[0, 0, 0] : f32 from vector<1x1x1xf32>
      %491 = vector.broadcast %490 : f32 to vector<1x1xf32>
      %cst_352 = arith.constant 0.000000e+00 : f32
      %492 = vector.broadcast %cst_352 : f32 to vector<1x1xf32>
      %493 = arith.cmpf ogt, %477, %492 : vector<1x1xf32>
      %cst_353 = arith.constant 1.000000e+00 : f32
      %494 = vector.broadcast %cst_353 : f32 to vector<1x1xf32>
      %495 = arith.maximumf %477, %494 : vector<1x1xf32>
      %496 = math.log %495 : vector<1x1xf32>
      %497 = arith.mulf %466, %496 : vector<1x1xf32>
      %498 = math.exp %497 : vector<1x1xf32>
      %cst_354 = arith.constant 0.000000e+00 : f32
      %499 = vector.broadcast %cst_354 : f32 to vector<1x1xf32>
      %500 = arith.cmpf oeq, %466, %499 : vector<1x1xf32>
      %cst_355 = arith.constant 1.000000e+00 : f32
      %cst_356 = arith.constant 0.000000e+00 : f32
      %501 = vector.broadcast %cst_355 : f32 to vector<1x1xf32>
      %502 = vector.broadcast %cst_356 : f32 to vector<1x1xf32>
      %503 = arith.select %500, %501, %502 : vector<1x1xi1>, vector<1x1xf32>
      %504 = arith.select %493, %498, %503 : vector<1x1xi1>, vector<1x1xf32>
      %505 = arith.mulf %468, %496 : vector<1x1xf32>
      %506 = math.exp %505 : vector<1x1xf32>
      %cst_357 = arith.constant 0.000000e+00 : f32
      %507 = vector.broadcast %cst_357 : f32 to vector<1x1xf32>
      %508 = arith.select %493, %506, %507 : vector<1x1xi1>, vector<1x1xf32>
      %509 = arith.addf %504, %508 : vector<1x1xf32>
      %cst_358 = arith.constant 5.000000e-01 : f32
      %510 = vector.broadcast %cst_358 : f32 to vector<1x1xf32>
      %511 = arith.mulf %510, %509 : vector<1x1xf32>
      %cst_359 = arith.constant 1.000000e+00 : f32
      %512 = vector.broadcast %cst_359 : f32 to vector<1x1xf32>
      %513 = arith.maximumf %477, %512 : vector<1x1xf32>
      %514 = arith.divf %484, %513 : vector<1x1xf32>
      %515 = arith.divf %491, %513 : vector<1x1xf32>
      %516 = arith.subf %514, %515 : vector<1x1xf32>
      %517 = math.absf %516 : vector<1x1xf32>
      %518 = arith.mulf %517, %511 : vector<1x1xf32>
      %cst_360 = arith.constant 0.000000e+00 : f32
      %519 = vector.broadcast %cst_360 : f32 to vector<1x1xf32>
      %520 = arith.select %493, %518, %519 : vector<1x1xi1>, vector<1x1xf32>
      %521 = arith.addf %469, %520 : vector<1x1xf32>
      %522 = arith.addf %470, %511 : vector<1x1xf32>
      %c1_361 = arith.constant 1 : index
      %c0_362 = arith.constant 0 : index
      %c0_363 = arith.constant 0 : index
      %523 = vector.load %arg5[%c1_361, %c0_362, %c0_363] : memref<15x8x128xf32, #tpu.memory_space<vmem>>, vector<1x8x128xf32>
      %524 = vector.shape_cast %523 : vector<1x8x128xf32> to vector<8x128xf32>
      %525 = vector.shape_cast %524 : vector<8x128xf32> to vector<1x8x128xf32>
      %cst_364 = arith.constant dense<0.000000e+00> : vector<1xf32>
      %526 = vector.multi_reduction <add>, %525, %cst_364 [1, 2] : vector<1x8x128xf32> to vector<1xf32>
      %527 = vector.shape_cast %526 : vector<1xf32> to vector<1x1x1xf32>
      %528 = vector.extract %527[0, 0, 0] : f32 from vector<1x1x1xf32>
      %529 = vector.broadcast %528 : f32 to vector<1x1xf32>
      %c1_365 = arith.constant 1 : index
      %c0_366 = arith.constant 0 : index
      %c0_367 = arith.constant 0 : index
      %530 = vector.load %arg6[%c1_365, %c0_366, %c0_367] : memref<15x8x128xf32, #tpu.memory_space<vmem>>, vector<1x8x128xf32>
      %531 = vector.shape_cast %530 : vector<1x8x128xf32> to vector<8x128xf32>
      %532 = vector.shape_cast %531 : vector<8x128xf32> to vector<1x8x128xf32>
      %cst_368 = arith.constant dense<0.000000e+00> : vector<1xf32>
      %533 = vector.multi_reduction <add>, %532, %cst_368 [1, 2] : vector<1x8x128xf32> to vector<1xf32>
      %534 = vector.shape_cast %533 : vector<1xf32> to vector<1x1x1xf32>
      %535 = vector.extract %534[0, 0, 0] : f32 from vector<1x1x1xf32>
      %536 = vector.broadcast %535 : f32 to vector<1x1xf32>
      %c1_369 = arith.constant 1 : index
      %c0_370 = arith.constant 0 : index
      %c0_371 = arith.constant 0 : index
      %537 = vector.load %arg7[%c1_369, %c0_370, %c0_371] : memref<15x8x128xf32, #tpu.memory_space<vmem>>, vector<1x8x128xf32>
      %538 = vector.shape_cast %537 : vector<1x8x128xf32> to vector<8x128xf32>
      %539 = vector.shape_cast %538 : vector<8x128xf32> to vector<1x8x128xf32>
      %cst_372 = arith.constant dense<0.000000e+00> : vector<1xf32>
      %540 = vector.multi_reduction <add>, %539, %cst_372 [1, 2] : vector<1x8x128xf32> to vector<1xf32>
      %541 = vector.shape_cast %540 : vector<1xf32> to vector<1x1x1xf32>
      %542 = vector.extract %541[0, 0, 0] : f32 from vector<1x1x1xf32>
      %543 = vector.broadcast %542 : f32 to vector<1x1xf32>
      %cst_373 = arith.constant 0.000000e+00 : f32
      %544 = vector.broadcast %cst_373 : f32 to vector<1x1xf32>
      %545 = arith.cmpf ogt, %529, %544 : vector<1x1xf32>
      %cst_374 = arith.constant 1.000000e+00 : f32
      %546 = vector.broadcast %cst_374 : f32 to vector<1x1xf32>
      %547 = arith.maximumf %529, %546 : vector<1x1xf32>
      %548 = math.log %547 : vector<1x1xf32>
      %549 = arith.mulf %466, %548 : vector<1x1xf32>
      %550 = math.exp %549 : vector<1x1xf32>
      %cst_375 = arith.constant 0.000000e+00 : f32
      %551 = vector.broadcast %cst_375 : f32 to vector<1x1xf32>
      %552 = arith.cmpf oeq, %466, %551 : vector<1x1xf32>
      %cst_376 = arith.constant 1.000000e+00 : f32
      %cst_377 = arith.constant 0.000000e+00 : f32
      %553 = vector.broadcast %cst_376 : f32 to vector<1x1xf32>
      %554 = vector.broadcast %cst_377 : f32 to vector<1x1xf32>
      %555 = arith.select %552, %553, %554 : vector<1x1xi1>, vector<1x1xf32>
      %556 = arith.select %545, %550, %555 : vector<1x1xi1>, vector<1x1xf32>
      %557 = arith.mulf %468, %548 : vector<1x1xf32>
      %558 = math.exp %557 : vector<1x1xf32>
      %cst_378 = arith.constant 0.000000e+00 : f32
      %559 = vector.broadcast %cst_378 : f32 to vector<1x1xf32>
      %560 = arith.select %545, %558, %559 : vector<1x1xi1>, vector<1x1xf32>
      %561 = arith.addf %556, %560 : vector<1x1xf32>
      %cst_379 = arith.constant 5.000000e-01 : f32
      %562 = vector.broadcast %cst_379 : f32 to vector<1x1xf32>
      %563 = arith.mulf %562, %561 : vector<1x1xf32>
      %cst_380 = arith.constant 1.000000e+00 : f32
      %564 = vector.broadcast %cst_380 : f32 to vector<1x1xf32>
      %565 = arith.maximumf %529, %564 : vector<1x1xf32>
      %566 = arith.divf %536, %565 : vector<1x1xf32>
      %567 = arith.divf %543, %565 : vector<1x1xf32>
      %568 = arith.subf %566, %567 : vector<1x1xf32>
      %569 = math.absf %568 : vector<1x1xf32>
      %570 = arith.mulf %569, %563 : vector<1x1xf32>
      %cst_381 = arith.constant 0.000000e+00 : f32
      %571 = vector.broadcast %cst_381 : f32 to vector<1x1xf32>
      %572 = arith.select %545, %570, %571 : vector<1x1xi1>, vector<1x1xf32>
      %573 = arith.addf %521, %572 : vector<1x1xf32>
      %574 = arith.addf %522, %563 : vector<1x1xf32>
      %c2_382 = arith.constant 2 : index
      %c0_383 = arith.constant 0 : index
      %c0_384 = arith.constant 0 : index
      %575 = vector.load %arg5[%c2_382, %c0_383, %c0_384] : memref<15x8x128xf32, #tpu.memory_space<vmem>>, vector<1x8x128xf32>
      %576 = vector.shape_cast %575 : vector<1x8x128xf32> to vector<8x128xf32>
      %577 = vector.shape_cast %576 : vector<8x128xf32> to vector<1x8x128xf32>
      %cst_385 = arith.constant dense<0.000000e+00> : vector<1xf32>
      %578 = vector.multi_reduction <add>, %577, %cst_385 [1, 2] : vector<1x8x128xf32> to vector<1xf32>
      %579 = vector.shape_cast %578 : vector<1xf32> to vector<1x1x1xf32>
      %580 = vector.extract %579[0, 0, 0] : f32 from vector<1x1x1xf32>
      %581 = vector.broadcast %580 : f32 to vector<1x1xf32>
      %c2_386 = arith.constant 2 : index
      %c0_387 = arith.constant 0 : index
      %c0_388 = arith.constant 0 : index
      %582 = vector.load %arg6[%c2_386, %c0_387, %c0_388] : memref<15x8x128xf32, #tpu.memory_space<vmem>>, vector<1x8x128xf32>
      %583 = vector.shape_cast %582 : vector<1x8x128xf32> to vector<8x128xf32>
      %584 = vector.shape_cast %583 : vector<8x128xf32> to vector<1x8x128xf32>
      %cst_389 = arith.constant dense<0.000000e+00> : vector<1xf32>
      %585 = vector.multi_reduction <add>, %584, %cst_389 [1, 2] : vector<1x8x128xf32> to vector<1xf32>
      %586 = vector.shape_cast %585 : vector<1xf32> to vector<1x1x1xf32>
      %587 = vector.extract %586[0, 0, 0] : f32 from vector<1x1x1xf32>
      %588 = vector.broadcast %587 : f32 to vector<1x1xf32>
      %c2_390 = arith.constant 2 : index
      %c0_391 = arith.constant 0 : index
      %c0_392 = arith.constant 0 : index
      %589 = vector.load %arg7[%c2_390, %c0_391, %c0_392] : memref<15x8x128xf32, #tpu.memory_space<vmem>>, vector<1x8x128xf32>
      %590 = vector.shape_cast %589 : vector<1x8x128xf32> to vector<8x128xf32>
      %591 = vector.shape_cast %590 : vector<8x128xf32> to vector<1x8x128xf32>
      %cst_393 = arith.constant dense<0.000000e+00> : vector<1xf32>
      %592 = vector.multi_reduction <add>, %591, %cst_393 [1, 2] : vector<1x8x128xf32> to vector<1xf32>
      %593 = vector.shape_cast %592 : vector<1xf32> to vector<1x1x1xf32>
      %594 = vector.extract %593[0, 0, 0] : f32 from vector<1x1x1xf32>
      %595 = vector.broadcast %594 : f32 to vector<1x1xf32>
      %cst_394 = arith.constant 0.000000e+00 : f32
      %596 = vector.broadcast %cst_394 : f32 to vector<1x1xf32>
      %597 = arith.cmpf ogt, %581, %596 : vector<1x1xf32>
      %cst_395 = arith.constant 1.000000e+00 : f32
      %598 = vector.broadcast %cst_395 : f32 to vector<1x1xf32>
      %599 = arith.maximumf %581, %598 : vector<1x1xf32>
      %600 = math.log %599 : vector<1x1xf32>
      %601 = arith.mulf %466, %600 : vector<1x1xf32>
      %602 = math.exp %601 : vector<1x1xf32>
      %cst_396 = arith.constant 0.000000e+00 : f32
      %603 = vector.broadcast %cst_396 : f32 to vector<1x1xf32>
      %604 = arith.cmpf oeq, %466, %603 : vector<1x1xf32>
      %cst_397 = arith.constant 1.000000e+00 : f32
      %cst_398 = arith.constant 0.000000e+00 : f32
      %605 = vector.broadcast %cst_397 : f32 to vector<1x1xf32>
      %606 = vector.broadcast %cst_398 : f32 to vector<1x1xf32>
      %607 = arith.select %604, %605, %606 : vector<1x1xi1>, vector<1x1xf32>
      %608 = arith.select %597, %602, %607 : vector<1x1xi1>, vector<1x1xf32>
      %609 = arith.mulf %468, %600 : vector<1x1xf32>
      %610 = math.exp %609 : vector<1x1xf32>
      %cst_399 = arith.constant 0.000000e+00 : f32
      %611 = vector.broadcast %cst_399 : f32 to vector<1x1xf32>
      %612 = arith.select %597, %610, %611 : vector<1x1xi1>, vector<1x1xf32>
      %613 = arith.addf %608, %612 : vector<1x1xf32>
      %cst_400 = arith.constant 5.000000e-01 : f32
      %614 = vector.broadcast %cst_400 : f32 to vector<1x1xf32>
      %615 = arith.mulf %614, %613 : vector<1x1xf32>
      %cst_401 = arith.constant 1.000000e+00 : f32
      %616 = vector.broadcast %cst_401 : f32 to vector<1x1xf32>
      %617 = arith.maximumf %581, %616 : vector<1x1xf32>
      %618 = arith.divf %588, %617 : vector<1x1xf32>
      %619 = arith.divf %595, %617 : vector<1x1xf32>
      %620 = arith.subf %618, %619 : vector<1x1xf32>
      %621 = math.absf %620 : vector<1x1xf32>
      %622 = arith.mulf %621, %615 : vector<1x1xf32>
      %cst_402 = arith.constant 0.000000e+00 : f32
      %623 = vector.broadcast %cst_402 : f32 to vector<1x1xf32>
      %624 = arith.select %597, %622, %623 : vector<1x1xi1>, vector<1x1xf32>
      %625 = arith.addf %573, %624 : vector<1x1xf32>
      %626 = arith.addf %574, %615 : vector<1x1xf32>
      %c3_403 = arith.constant 3 : index
      %c0_404 = arith.constant 0 : index
      %c0_405 = arith.constant 0 : index
      %627 = vector.load %arg5[%c3_403, %c0_404, %c0_405] : memref<15x8x128xf32, #tpu.memory_space<vmem>>, vector<1x8x128xf32>
      %628 = vector.shape_cast %627 : vector<1x8x128xf32> to vector<8x128xf32>
      %629 = vector.shape_cast %628 : vector<8x128xf32> to vector<1x8x128xf32>
      %cst_406 = arith.constant dense<0.000000e+00> : vector<1xf32>
      %630 = vector.multi_reduction <add>, %629, %cst_406 [1, 2] : vector<1x8x128xf32> to vector<1xf32>
      %631 = vector.shape_cast %630 : vector<1xf32> to vector<1x1x1xf32>
      %632 = vector.extract %631[0, 0, 0] : f32 from vector<1x1x1xf32>
      %633 = vector.broadcast %632 : f32 to vector<1x1xf32>
      %c3_407 = arith.constant 3 : index
      %c0_408 = arith.constant 0 : index
      %c0_409 = arith.constant 0 : index
      %634 = vector.load %arg6[%c3_407, %c0_408, %c0_409] : memref<15x8x128xf32, #tpu.memory_space<vmem>>, vector<1x8x128xf32>
      %635 = vector.shape_cast %634 : vector<1x8x128xf32> to vector<8x128xf32>
      %636 = vector.shape_cast %635 : vector<8x128xf32> to vector<1x8x128xf32>
      %cst_410 = arith.constant dense<0.000000e+00> : vector<1xf32>
      %637 = vector.multi_reduction <add>, %636, %cst_410 [1, 2] : vector<1x8x128xf32> to vector<1xf32>
      %638 = vector.shape_cast %637 : vector<1xf32> to vector<1x1x1xf32>
      %639 = vector.extract %638[0, 0, 0] : f32 from vector<1x1x1xf32>
      %640 = vector.broadcast %639 : f32 to vector<1x1xf32>
      %c3_411 = arith.constant 3 : index
      %c0_412 = arith.constant 0 : index
      %c0_413 = arith.constant 0 : index
      %641 = vector.load %arg7[%c3_411, %c0_412, %c0_413] : memref<15x8x128xf32, #tpu.memory_space<vmem>>, vector<1x8x128xf32>
      %642 = vector.shape_cast %641 : vector<1x8x128xf32> to vector<8x128xf32>
      %643 = vector.shape_cast %642 : vector<8x128xf32> to vector<1x8x128xf32>
      %cst_414 = arith.constant dense<0.000000e+00> : vector<1xf32>
      %644 = vector.multi_reduction <add>, %643, %cst_414 [1, 2] : vector<1x8x128xf32> to vector<1xf32>
      %645 = vector.shape_cast %644 : vector<1xf32> to vector<1x1x1xf32>
      %646 = vector.extract %645[0, 0, 0] : f32 from vector<1x1x1xf32>
      %647 = vector.broadcast %646 : f32 to vector<1x1xf32>
      %cst_415 = arith.constant 0.000000e+00 : f32
      %648 = vector.broadcast %cst_415 : f32 to vector<1x1xf32>
      %649 = arith.cmpf ogt, %633, %648 : vector<1x1xf32>
      %cst_416 = arith.constant 1.000000e+00 : f32
      %650 = vector.broadcast %cst_416 : f32 to vector<1x1xf32>
      %651 = arith.maximumf %633, %650 : vector<1x1xf32>
      %652 = math.log %651 : vector<1x1xf32>
      %653 = arith.mulf %466, %652 : vector<1x1xf32>
      %654 = math.exp %653 : vector<1x1xf32>
      %cst_417 = arith.constant 0.000000e+00 : f32
      %655 = vector.broadcast %cst_417 : f32 to vector<1x1xf32>
      %656 = arith.cmpf oeq, %466, %655 : vector<1x1xf32>
      %cst_418 = arith.constant 1.000000e+00 : f32
      %cst_419 = arith.constant 0.000000e+00 : f32
      %657 = vector.broadcast %cst_418 : f32 to vector<1x1xf32>
      %658 = vector.broadcast %cst_419 : f32 to vector<1x1xf32>
      %659 = arith.select %656, %657, %658 : vector<1x1xi1>, vector<1x1xf32>
      %660 = arith.select %649, %654, %659 : vector<1x1xi1>, vector<1x1xf32>
      %661 = arith.mulf %468, %652 : vector<1x1xf32>
      %662 = math.exp %661 : vector<1x1xf32>
      %cst_420 = arith.constant 0.000000e+00 : f32
      %663 = vector.broadcast %cst_420 : f32 to vector<1x1xf32>
      %664 = arith.select %649, %662, %663 : vector<1x1xi1>, vector<1x1xf32>
      %665 = arith.addf %660, %664 : vector<1x1xf32>
      %cst_421 = arith.constant 5.000000e-01 : f32
      %666 = vector.broadcast %cst_421 : f32 to vector<1x1xf32>
      %667 = arith.mulf %666, %665 : vector<1x1xf32>
      %cst_422 = arith.constant 1.000000e+00 : f32
      %668 = vector.broadcast %cst_422 : f32 to vector<1x1xf32>
      %669 = arith.maximumf %633, %668 : vector<1x1xf32>
      %670 = arith.divf %640, %669 : vector<1x1xf32>
      %671 = arith.divf %647, %669 : vector<1x1xf32>
      %672 = arith.subf %670, %671 : vector<1x1xf32>
      %673 = math.absf %672 : vector<1x1xf32>
      %674 = arith.mulf %673, %667 : vector<1x1xf32>
      %cst_423 = arith.constant 0.000000e+00 : f32
      %675 = vector.broadcast %cst_423 : f32 to vector<1x1xf32>
      %676 = arith.select %649, %674, %675 : vector<1x1xi1>, vector<1x1xf32>
      %677 = arith.addf %625, %676 : vector<1x1xf32>
      %678 = arith.addf %626, %667 : vector<1x1xf32>
      %c4_424 = arith.constant 4 : index
      %c0_425 = arith.constant 0 : index
      %c0_426 = arith.constant 0 : index
      %679 = vector.load %arg5[%c4_424, %c0_425, %c0_426] : memref<15x8x128xf32, #tpu.memory_space<vmem>>, vector<1x8x128xf32>
      %680 = vector.shape_cast %679 : vector<1x8x128xf32> to vector<8x128xf32>
      %681 = vector.shape_cast %680 : vector<8x128xf32> to vector<1x8x128xf32>
      %cst_427 = arith.constant dense<0.000000e+00> : vector<1xf32>
      %682 = vector.multi_reduction <add>, %681, %cst_427 [1, 2] : vector<1x8x128xf32> to vector<1xf32>
      %683 = vector.shape_cast %682 : vector<1xf32> to vector<1x1x1xf32>
      %684 = vector.extract %683[0, 0, 0] : f32 from vector<1x1x1xf32>
      %685 = vector.broadcast %684 : f32 to vector<1x1xf32>
      %c4_428 = arith.constant 4 : index
      %c0_429 = arith.constant 0 : index
      %c0_430 = arith.constant 0 : index
      %686 = vector.load %arg6[%c4_428, %c0_429, %c0_430] : memref<15x8x128xf32, #tpu.memory_space<vmem>>, vector<1x8x128xf32>
      %687 = vector.shape_cast %686 : vector<1x8x128xf32> to vector<8x128xf32>
      %688 = vector.shape_cast %687 : vector<8x128xf32> to vector<1x8x128xf32>
      %cst_431 = arith.constant dense<0.000000e+00> : vector<1xf32>
      %689 = vector.multi_reduction <add>, %688, %cst_431 [1, 2] : vector<1x8x128xf32> to vector<1xf32>
      %690 = vector.shape_cast %689 : vector<1xf32> to vector<1x1x1xf32>
      %691 = vector.extract %690[0, 0, 0] : f32 from vector<1x1x1xf32>
      %692 = vector.broadcast %691 : f32 to vector<1x1xf32>
      %c4_432 = arith.constant 4 : index
      %c0_433 = arith.constant 0 : index
      %c0_434 = arith.constant 0 : index
      %693 = vector.load %arg7[%c4_432, %c0_433, %c0_434] : memref<15x8x128xf32, #tpu.memory_space<vmem>>, vector<1x8x128xf32>
      %694 = vector.shape_cast %693 : vector<1x8x128xf32> to vector<8x128xf32>
      %695 = vector.shape_cast %694 : vector<8x128xf32> to vector<1x8x128xf32>
      %cst_435 = arith.constant dense<0.000000e+00> : vector<1xf32>
      %696 = vector.multi_reduction <add>, %695, %cst_435 [1, 2] : vector<1x8x128xf32> to vector<1xf32>
      %697 = vector.shape_cast %696 : vector<1xf32> to vector<1x1x1xf32>
      %698 = vector.extract %697[0, 0, 0] : f32 from vector<1x1x1xf32>
      %699 = vector.broadcast %698 : f32 to vector<1x1xf32>
      %cst_436 = arith.constant 0.000000e+00 : f32
      %700 = vector.broadcast %cst_436 : f32 to vector<1x1xf32>
      %701 = arith.cmpf ogt, %685, %700 : vector<1x1xf32>
      %cst_437 = arith.constant 1.000000e+00 : f32
      %702 = vector.broadcast %cst_437 : f32 to vector<1x1xf32>
      %703 = arith.maximumf %685, %702 : vector<1x1xf32>
      %704 = math.log %703 : vector<1x1xf32>
      %705 = arith.mulf %466, %704 : vector<1x1xf32>
      %706 = math.exp %705 : vector<1x1xf32>
      %cst_438 = arith.constant 0.000000e+00 : f32
      %707 = vector.broadcast %cst_438 : f32 to vector<1x1xf32>
      %708 = arith.cmpf oeq, %466, %707 : vector<1x1xf32>
      %cst_439 = arith.constant 1.000000e+00 : f32
      %cst_440 = arith.constant 0.000000e+00 : f32
      %709 = vector.broadcast %cst_439 : f32 to vector<1x1xf32>
      %710 = vector.broadcast %cst_440 : f32 to vector<1x1xf32>
      %711 = arith.select %708, %709, %710 : vector<1x1xi1>, vector<1x1xf32>
      %712 = arith.select %701, %706, %711 : vector<1x1xi1>, vector<1x1xf32>
      %713 = arith.mulf %468, %704 : vector<1x1xf32>
      %714 = math.exp %713 : vector<1x1xf32>
      %cst_441 = arith.constant 0.000000e+00 : f32
      %715 = vector.broadcast %cst_441 : f32 to vector<1x1xf32>
      %716 = arith.select %701, %714, %715 : vector<1x1xi1>, vector<1x1xf32>
      %717 = arith.addf %712, %716 : vector<1x1xf32>
      %cst_442 = arith.constant 5.000000e-01 : f32
      %718 = vector.broadcast %cst_442 : f32 to vector<1x1xf32>
      %719 = arith.mulf %718, %717 : vector<1x1xf32>
      %cst_443 = arith.constant 1.000000e+00 : f32
      %720 = vector.broadcast %cst_443 : f32 to vector<1x1xf32>
      %721 = arith.maximumf %685, %720 : vector<1x1xf32>
      %722 = arith.divf %692, %721 : vector<1x1xf32>
      %723 = arith.divf %699, %721 : vector<1x1xf32>
      %724 = arith.subf %722, %723 : vector<1x1xf32>
      %725 = math.absf %724 : vector<1x1xf32>
      %726 = arith.mulf %725, %719 : vector<1x1xf32>
      %cst_444 = arith.constant 0.000000e+00 : f32
      %727 = vector.broadcast %cst_444 : f32 to vector<1x1xf32>
      %728 = arith.select %701, %726, %727 : vector<1x1xi1>, vector<1x1xf32>
      %729 = arith.addf %677, %728 : vector<1x1xf32>
      %730 = arith.addf %678, %719 : vector<1x1xf32>
      %c5_445 = arith.constant 5 : index
      %c0_446 = arith.constant 0 : index
      %c0_447 = arith.constant 0 : index
      %731 = vector.load %arg5[%c5_445, %c0_446, %c0_447] : memref<15x8x128xf32, #tpu.memory_space<vmem>>, vector<1x8x128xf32>
      %732 = vector.shape_cast %731 : vector<1x8x128xf32> to vector<8x128xf32>
      %733 = vector.shape_cast %732 : vector<8x128xf32> to vector<1x8x128xf32>
      %cst_448 = arith.constant dense<0.000000e+00> : vector<1xf32>
      %734 = vector.multi_reduction <add>, %733, %cst_448 [1, 2] : vector<1x8x128xf32> to vector<1xf32>
      %735 = vector.shape_cast %734 : vector<1xf32> to vector<1x1x1xf32>
      %736 = vector.extract %735[0, 0, 0] : f32 from vector<1x1x1xf32>
      %737 = vector.broadcast %736 : f32 to vector<1x1xf32>
      %c5_449 = arith.constant 5 : index
      %c0_450 = arith.constant 0 : index
      %c0_451 = arith.constant 0 : index
      %738 = vector.load %arg6[%c5_449, %c0_450, %c0_451] : memref<15x8x128xf32, #tpu.memory_space<vmem>>, vector<1x8x128xf32>
      %739 = vector.shape_cast %738 : vector<1x8x128xf32> to vector<8x128xf32>
      %740 = vector.shape_cast %739 : vector<8x128xf32> to vector<1x8x128xf32>
      %cst_452 = arith.constant dense<0.000000e+00> : vector<1xf32>
      %741 = vector.multi_reduction <add>, %740, %cst_452 [1, 2] : vector<1x8x128xf32> to vector<1xf32>
      %742 = vector.shape_cast %741 : vector<1xf32> to vector<1x1x1xf32>
      %743 = vector.extract %742[0, 0, 0] : f32 from vector<1x1x1xf32>
      %744 = vector.broadcast %743 : f32 to vector<1x1xf32>
      %c5_453 = arith.constant 5 : index
      %c0_454 = arith.constant 0 : index
      %c0_455 = arith.constant 0 : index
      %745 = vector.load %arg7[%c5_453, %c0_454, %c0_455] : memref<15x8x128xf32, #tpu.memory_space<vmem>>, vector<1x8x128xf32>
      %746 = vector.shape_cast %745 : vector<1x8x128xf32> to vector<8x128xf32>
      %747 = vector.shape_cast %746 : vector<8x128xf32> to vector<1x8x128xf32>
      %cst_456 = arith.constant dense<0.000000e+00> : vector<1xf32>
      %748 = vector.multi_reduction <add>, %747, %cst_456 [1, 2] : vector<1x8x128xf32> to vector<1xf32>
      %749 = vector.shape_cast %748 : vector<1xf32> to vector<1x1x1xf32>
      %750 = vector.extract %749[0, 0, 0] : f32 from vector<1x1x1xf32>
      %751 = vector.broadcast %750 : f32 to vector<1x1xf32>
      %cst_457 = arith.constant 0.000000e+00 : f32
      %752 = vector.broadcast %cst_457 : f32 to vector<1x1xf32>
      %753 = arith.cmpf ogt, %737, %752 : vector<1x1xf32>
      %cst_458 = arith.constant 1.000000e+00 : f32
      %754 = vector.broadcast %cst_458 : f32 to vector<1x1xf32>
      %755 = arith.maximumf %737, %754 : vector<1x1xf32>
      %756 = math.log %755 : vector<1x1xf32>
      %757 = arith.mulf %466, %756 : vector<1x1xf32>
      %758 = math.exp %757 : vector<1x1xf32>
      %cst_459 = arith.constant 0.000000e+00 : f32
      %759 = vector.broadcast %cst_459 : f32 to vector<1x1xf32>
      %760 = arith.cmpf oeq, %466, %759 : vector<1x1xf32>
      %cst_460 = arith.constant 1.000000e+00 : f32
      %cst_461 = arith.constant 0.000000e+00 : f32
      %761 = vector.broadcast %cst_460 : f32 to vector<1x1xf32>
      %762 = vector.broadcast %cst_461 : f32 to vector<1x1xf32>
      %763 = arith.select %760, %761, %762 : vector<1x1xi1>, vector<1x1xf32>
      %764 = arith.select %753, %758, %763 : vector<1x1xi1>, vector<1x1xf32>
      %765 = arith.mulf %468, %756 : vector<1x1xf32>
      %766 = math.exp %765 : vector<1x1xf32>
      %cst_462 = arith.constant 0.000000e+00 : f32
      %767 = vector.broadcast %cst_462 : f32 to vector<1x1xf32>
      %768 = arith.select %753, %766, %767 : vector<1x1xi1>, vector<1x1xf32>
      %769 = arith.addf %764, %768 : vector<1x1xf32>
      %cst_463 = arith.constant 5.000000e-01 : f32
      %770 = vector.broadcast %cst_463 : f32 to vector<1x1xf32>
      %771 = arith.mulf %770, %769 : vector<1x1xf32>
      %cst_464 = arith.constant 1.000000e+00 : f32
      %772 = vector.broadcast %cst_464 : f32 to vector<1x1xf32>
      %773 = arith.maximumf %737, %772 : vector<1x1xf32>
      %774 = arith.divf %744, %773 : vector<1x1xf32>
      %775 = arith.divf %751, %773 : vector<1x1xf32>
      %776 = arith.subf %774, %775 : vector<1x1xf32>
      %777 = math.absf %776 : vector<1x1xf32>
      %778 = arith.mulf %777, %771 : vector<1x1xf32>
      %cst_465 = arith.constant 0.000000e+00 : f32
      %779 = vector.broadcast %cst_465 : f32 to vector<1x1xf32>
      %780 = arith.select %753, %778, %779 : vector<1x1xi1>, vector<1x1xf32>
      %781 = arith.addf %729, %780 : vector<1x1xf32>
      %782 = arith.addf %730, %771 : vector<1x1xf32>
      %c6_466 = arith.constant 6 : index
      %c0_467 = arith.constant 0 : index
      %c0_468 = arith.constant 0 : index
      %783 = vector.load %arg5[%c6_466, %c0_467, %c0_468] : memref<15x8x128xf32, #tpu.memory_space<vmem>>, vector<1x8x128xf32>
      %784 = vector.shape_cast %783 : vector<1x8x128xf32> to vector<8x128xf32>
      %785 = vector.shape_cast %784 : vector<8x128xf32> to vector<1x8x128xf32>
      %cst_469 = arith.constant dense<0.000000e+00> : vector<1xf32>
      %786 = vector.multi_reduction <add>, %785, %cst_469 [1, 2] : vector<1x8x128xf32> to vector<1xf32>
      %787 = vector.shape_cast %786 : vector<1xf32> to vector<1x1x1xf32>
      %788 = vector.extract %787[0, 0, 0] : f32 from vector<1x1x1xf32>
      %789 = vector.broadcast %788 : f32 to vector<1x1xf32>
      %c6_470 = arith.constant 6 : index
      %c0_471 = arith.constant 0 : index
      %c0_472 = arith.constant 0 : index
      %790 = vector.load %arg6[%c6_470, %c0_471, %c0_472] : memref<15x8x128xf32, #tpu.memory_space<vmem>>, vector<1x8x128xf32>
      %791 = vector.shape_cast %790 : vector<1x8x128xf32> to vector<8x128xf32>
      %792 = vector.shape_cast %791 : vector<8x128xf32> to vector<1x8x128xf32>
      %cst_473 = arith.constant dense<0.000000e+00> : vector<1xf32>
      %793 = vector.multi_reduction <add>, %792, %cst_473 [1, 2] : vector<1x8x128xf32> to vector<1xf32>
      %794 = vector.shape_cast %793 : vector<1xf32> to vector<1x1x1xf32>
      %795 = vector.extract %794[0, 0, 0] : f32 from vector<1x1x1xf32>
      %796 = vector.broadcast %795 : f32 to vector<1x1xf32>
      %c6_474 = arith.constant 6 : index
      %c0_475 = arith.constant 0 : index
      %c0_476 = arith.constant 0 : index
      %797 = vector.load %arg7[%c6_474, %c0_475, %c0_476] : memref<15x8x128xf32, #tpu.memory_space<vmem>>, vector<1x8x128xf32>
      %798 = vector.shape_cast %797 : vector<1x8x128xf32> to vector<8x128xf32>
      %799 = vector.shape_cast %798 : vector<8x128xf32> to vector<1x8x128xf32>
      %cst_477 = arith.constant dense<0.000000e+00> : vector<1xf32>
      %800 = vector.multi_reduction <add>, %799, %cst_477 [1, 2] : vector<1x8x128xf32> to vector<1xf32>
      %801 = vector.shape_cast %800 : vector<1xf32> to vector<1x1x1xf32>
      %802 = vector.extract %801[0, 0, 0] : f32 from vector<1x1x1xf32>
      %803 = vector.broadcast %802 : f32 to vector<1x1xf32>
      %cst_478 = arith.constant 0.000000e+00 : f32
      %804 = vector.broadcast %cst_478 : f32 to vector<1x1xf32>
      %805 = arith.cmpf ogt, %789, %804 : vector<1x1xf32>
      %cst_479 = arith.constant 1.000000e+00 : f32
      %806 = vector.broadcast %cst_479 : f32 to vector<1x1xf32>
      %807 = arith.maximumf %789, %806 : vector<1x1xf32>
      %808 = math.log %807 : vector<1x1xf32>
      %809 = arith.mulf %466, %808 : vector<1x1xf32>
      %810 = math.exp %809 : vector<1x1xf32>
      %cst_480 = arith.constant 0.000000e+00 : f32
      %811 = vector.broadcast %cst_480 : f32 to vector<1x1xf32>
      %812 = arith.cmpf oeq, %466, %811 : vector<1x1xf32>
      %cst_481 = arith.constant 1.000000e+00 : f32
      %cst_482 = arith.constant 0.000000e+00 : f32
      %813 = vector.broadcast %cst_481 : f32 to vector<1x1xf32>
      %814 = vector.broadcast %cst_482 : f32 to vector<1x1xf32>
      %815 = arith.select %812, %813, %814 : vector<1x1xi1>, vector<1x1xf32>
      %816 = arith.select %805, %810, %815 : vector<1x1xi1>, vector<1x1xf32>
      %817 = arith.mulf %468, %808 : vector<1x1xf32>
      %818 = math.exp %817 : vector<1x1xf32>
      %cst_483 = arith.constant 0.000000e+00 : f32
      %819 = vector.broadcast %cst_483 : f32 to vector<1x1xf32>
      %820 = arith.select %805, %818, %819 : vector<1x1xi1>, vector<1x1xf32>
      %821 = arith.addf %816, %820 : vector<1x1xf32>
      %cst_484 = arith.constant 5.000000e-01 : f32
      %822 = vector.broadcast %cst_484 : f32 to vector<1x1xf32>
      %823 = arith.mulf %822, %821 : vector<1x1xf32>
      %cst_485 = arith.constant 1.000000e+00 : f32
      %824 = vector.broadcast %cst_485 : f32 to vector<1x1xf32>
      %825 = arith.maximumf %789, %824 : vector<1x1xf32>
      %826 = arith.divf %796, %825 : vector<1x1xf32>
      %827 = arith.divf %803, %825 : vector<1x1xf32>
      %828 = arith.subf %826, %827 : vector<1x1xf32>
      %829 = math.absf %828 : vector<1x1xf32>
      %830 = arith.mulf %829, %823 : vector<1x1xf32>
      %cst_486 = arith.constant 0.000000e+00 : f32
      %831 = vector.broadcast %cst_486 : f32 to vector<1x1xf32>
      %832 = arith.select %805, %830, %831 : vector<1x1xi1>, vector<1x1xf32>
      %833 = arith.addf %781, %832 : vector<1x1xf32>
      %834 = arith.addf %782, %823 : vector<1x1xf32>
      %c7_487 = arith.constant 7 : index
      %c0_488 = arith.constant 0 : index
      %c0_489 = arith.constant 0 : index
      %835 = vector.load %arg5[%c7_487, %c0_488, %c0_489] : memref<15x8x128xf32, #tpu.memory_space<vmem>>, vector<1x8x128xf32>
      %836 = vector.shape_cast %835 : vector<1x8x128xf32> to vector<8x128xf32>
      %837 = vector.shape_cast %836 : vector<8x128xf32> to vector<1x8x128xf32>
      %cst_490 = arith.constant dense<0.000000e+00> : vector<1xf32>
      %838 = vector.multi_reduction <add>, %837, %cst_490 [1, 2] : vector<1x8x128xf32> to vector<1xf32>
      %839 = vector.shape_cast %838 : vector<1xf32> to vector<1x1x1xf32>
      %840 = vector.extract %839[0, 0, 0] : f32 from vector<1x1x1xf32>
      %841 = vector.broadcast %840 : f32 to vector<1x1xf32>
      %c7_491 = arith.constant 7 : index
      %c0_492 = arith.constant 0 : index
      %c0_493 = arith.constant 0 : index
      %842 = vector.load %arg6[%c7_491, %c0_492, %c0_493] : memref<15x8x128xf32, #tpu.memory_space<vmem>>, vector<1x8x128xf32>
      %843 = vector.shape_cast %842 : vector<1x8x128xf32> to vector<8x128xf32>
      %844 = vector.shape_cast %843 : vector<8x128xf32> to vector<1x8x128xf32>
      %cst_494 = arith.constant dense<0.000000e+00> : vector<1xf32>
      %845 = vector.multi_reduction <add>, %844, %cst_494 [1, 2] : vector<1x8x128xf32> to vector<1xf32>
      %846 = vector.shape_cast %845 : vector<1xf32> to vector<1x1x1xf32>
      %847 = vector.extract %846[0, 0, 0] : f32 from vector<1x1x1xf32>
      %848 = vector.broadcast %847 : f32 to vector<1x1xf32>
      %c7_495 = arith.constant 7 : index
      %c0_496 = arith.constant 0 : index
      %c0_497 = arith.constant 0 : index
      %849 = vector.load %arg7[%c7_495, %c0_496, %c0_497] : memref<15x8x128xf32, #tpu.memory_space<vmem>>, vector<1x8x128xf32>
      %850 = vector.shape_cast %849 : vector<1x8x128xf32> to vector<8x128xf32>
      %851 = vector.shape_cast %850 : vector<8x128xf32> to vector<1x8x128xf32>
      %cst_498 = arith.constant dense<0.000000e+00> : vector<1xf32>
      %852 = vector.multi_reduction <add>, %851, %cst_498 [1, 2] : vector<1x8x128xf32> to vector<1xf32>
      %853 = vector.shape_cast %852 : vector<1xf32> to vector<1x1x1xf32>
      %854 = vector.extract %853[0, 0, 0] : f32 from vector<1x1x1xf32>
      %855 = vector.broadcast %854 : f32 to vector<1x1xf32>
      %cst_499 = arith.constant 0.000000e+00 : f32
      %856 = vector.broadcast %cst_499 : f32 to vector<1x1xf32>
      %857 = arith.cmpf ogt, %841, %856 : vector<1x1xf32>
      %cst_500 = arith.constant 1.000000e+00 : f32
      %858 = vector.broadcast %cst_500 : f32 to vector<1x1xf32>
      %859 = arith.maximumf %841, %858 : vector<1x1xf32>
      %860 = math.log %859 : vector<1x1xf32>
      %861 = arith.mulf %466, %860 : vector<1x1xf32>
      %862 = math.exp %861 : vector<1x1xf32>
      %cst_501 = arith.constant 0.000000e+00 : f32
      %863 = vector.broadcast %cst_501 : f32 to vector<1x1xf32>
      %864 = arith.cmpf oeq, %466, %863 : vector<1x1xf32>
      %cst_502 = arith.constant 1.000000e+00 : f32
      %cst_503 = arith.constant 0.000000e+00 : f32
      %865 = vector.broadcast %cst_502 : f32 to vector<1x1xf32>
      %866 = vector.broadcast %cst_503 : f32 to vector<1x1xf32>
      %867 = arith.select %864, %865, %866 : vector<1x1xi1>, vector<1x1xf32>
      %868 = arith.select %857, %862, %867 : vector<1x1xi1>, vector<1x1xf32>
      %869 = arith.mulf %468, %860 : vector<1x1xf32>
      %870 = math.exp %869 : vector<1x1xf32>
      %cst_504 = arith.constant 0.000000e+00 : f32
      %871 = vector.broadcast %cst_504 : f32 to vector<1x1xf32>
      %872 = arith.select %857, %870, %871 : vector<1x1xi1>, vector<1x1xf32>
      %873 = arith.addf %868, %872 : vector<1x1xf32>
      %cst_505 = arith.constant 5.000000e-01 : f32
      %874 = vector.broadcast %cst_505 : f32 to vector<1x1xf32>
      %875 = arith.mulf %874, %873 : vector<1x1xf32>
      %cst_506 = arith.constant 1.000000e+00 : f32
      %876 = vector.broadcast %cst_506 : f32 to vector<1x1xf32>
      %877 = arith.maximumf %841, %876 : vector<1x1xf32>
      %878 = arith.divf %848, %877 : vector<1x1xf32>
      %879 = arith.divf %855, %877 : vector<1x1xf32>
      %880 = arith.subf %878, %879 : vector<1x1xf32>
      %881 = math.absf %880 : vector<1x1xf32>
      %882 = arith.mulf %881, %875 : vector<1x1xf32>
      %cst_507 = arith.constant 0.000000e+00 : f32
      %883 = vector.broadcast %cst_507 : f32 to vector<1x1xf32>
      %884 = arith.select %857, %882, %883 : vector<1x1xi1>, vector<1x1xf32>
      %885 = arith.addf %833, %884 : vector<1x1xf32>
      %886 = arith.addf %834, %875 : vector<1x1xf32>
      %c8_508 = arith.constant 8 : index
      %c0_509 = arith.constant 0 : index
      %c0_510 = arith.constant 0 : index
      %887 = vector.load %arg5[%c8_508, %c0_509, %c0_510] : memref<15x8x128xf32, #tpu.memory_space<vmem>>, vector<1x8x128xf32>
      %888 = vector.shape_cast %887 : vector<1x8x128xf32> to vector<8x128xf32>
      %889 = vector.shape_cast %888 : vector<8x128xf32> to vector<1x8x128xf32>
      %cst_511 = arith.constant dense<0.000000e+00> : vector<1xf32>
      %890 = vector.multi_reduction <add>, %889, %cst_511 [1, 2] : vector<1x8x128xf32> to vector<1xf32>
      %891 = vector.shape_cast %890 : vector<1xf32> to vector<1x1x1xf32>
      %892 = vector.extract %891[0, 0, 0] : f32 from vector<1x1x1xf32>
      %893 = vector.broadcast %892 : f32 to vector<1x1xf32>
      %c8_512 = arith.constant 8 : index
      %c0_513 = arith.constant 0 : index
      %c0_514 = arith.constant 0 : index
      %894 = vector.load %arg6[%c8_512, %c0_513, %c0_514] : memref<15x8x128xf32, #tpu.memory_space<vmem>>, vector<1x8x128xf32>
      %895 = vector.shape_cast %894 : vector<1x8x128xf32> to vector<8x128xf32>
      %896 = vector.shape_cast %895 : vector<8x128xf32> to vector<1x8x128xf32>
      %cst_515 = arith.constant dense<0.000000e+00> : vector<1xf32>
      %897 = vector.multi_reduction <add>, %896, %cst_515 [1, 2] : vector<1x8x128xf32> to vector<1xf32>
      %898 = vector.shape_cast %897 : vector<1xf32> to vector<1x1x1xf32>
      %899 = vector.extract %898[0, 0, 0] : f32 from vector<1x1x1xf32>
      %900 = vector.broadcast %899 : f32 to vector<1x1xf32>
      %c8_516 = arith.constant 8 : index
      %c0_517 = arith.constant 0 : index
      %c0_518 = arith.constant 0 : index
      %901 = vector.load %arg7[%c8_516, %c0_517, %c0_518] : memref<15x8x128xf32, #tpu.memory_space<vmem>>, vector<1x8x128xf32>
      %902 = vector.shape_cast %901 : vector<1x8x128xf32> to vector<8x128xf32>
      %903 = vector.shape_cast %902 : vector<8x128xf32> to vector<1x8x128xf32>
      %cst_519 = arith.constant dense<0.000000e+00> : vector<1xf32>
      %904 = vector.multi_reduction <add>, %903, %cst_519 [1, 2] : vector<1x8x128xf32> to vector<1xf32>
      %905 = vector.shape_cast %904 : vector<1xf32> to vector<1x1x1xf32>
      %906 = vector.extract %905[0, 0, 0] : f32 from vector<1x1x1xf32>
      %907 = vector.broadcast %906 : f32 to vector<1x1xf32>
      %cst_520 = arith.constant 0.000000e+00 : f32
      %908 = vector.broadcast %cst_520 : f32 to vector<1x1xf32>
      %909 = arith.cmpf ogt, %893, %908 : vector<1x1xf32>
      %cst_521 = arith.constant 1.000000e+00 : f32
      %910 = vector.broadcast %cst_521 : f32 to vector<1x1xf32>
      %911 = arith.maximumf %893, %910 : vector<1x1xf32>
      %912 = math.log %911 : vector<1x1xf32>
      %913 = arith.mulf %466, %912 : vector<1x1xf32>
      %914 = math.exp %913 : vector<1x1xf32>
      %cst_522 = arith.constant 0.000000e+00 : f32
      %915 = vector.broadcast %cst_522 : f32 to vector<1x1xf32>
      %916 = arith.cmpf oeq, %466, %915 : vector<1x1xf32>
      %cst_523 = arith.constant 1.000000e+00 : f32
      %cst_524 = arith.constant 0.000000e+00 : f32
      %917 = vector.broadcast %cst_523 : f32 to vector<1x1xf32>
      %918 = vector.broadcast %cst_524 : f32 to vector<1x1xf32>
      %919 = arith.select %916, %917, %918 : vector<1x1xi1>, vector<1x1xf32>
      %920 = arith.select %909, %914, %919 : vector<1x1xi1>, vector<1x1xf32>
      %921 = arith.mulf %468, %912 : vector<1x1xf32>
      %922 = math.exp %921 : vector<1x1xf32>
      %cst_525 = arith.constant 0.000000e+00 : f32
      %923 = vector.broadcast %cst_525 : f32 to vector<1x1xf32>
      %924 = arith.select %909, %922, %923 : vector<1x1xi1>, vector<1x1xf32>
      %925 = arith.addf %920, %924 : vector<1x1xf32>
      %cst_526 = arith.constant 5.000000e-01 : f32
      %926 = vector.broadcast %cst_526 : f32 to vector<1x1xf32>
      %927 = arith.mulf %926, %925 : vector<1x1xf32>
      %cst_527 = arith.constant 1.000000e+00 : f32
      %928 = vector.broadcast %cst_527 : f32 to vector<1x1xf32>
      %929 = arith.maximumf %893, %928 : vector<1x1xf32>
      %930 = arith.divf %900, %929 : vector<1x1xf32>
      %931 = arith.divf %907, %929 : vector<1x1xf32>
      %932 = arith.subf %930, %931 : vector<1x1xf32>
      %933 = math.absf %932 : vector<1x1xf32>
      %934 = arith.mulf %933, %927 : vector<1x1xf32>
      %cst_528 = arith.constant 0.000000e+00 : f32
      %935 = vector.broadcast %cst_528 : f32 to vector<1x1xf32>
      %936 = arith.select %909, %934, %935 : vector<1x1xi1>, vector<1x1xf32>
      %937 = arith.addf %885, %936 : vector<1x1xf32>
      %938 = arith.addf %886, %927 : vector<1x1xf32>
      %c9_529 = arith.constant 9 : index
      %c0_530 = arith.constant 0 : index
      %c0_531 = arith.constant 0 : index
      %939 = vector.load %arg5[%c9_529, %c0_530, %c0_531] : memref<15x8x128xf32, #tpu.memory_space<vmem>>, vector<1x8x128xf32>
      %940 = vector.shape_cast %939 : vector<1x8x128xf32> to vector<8x128xf32>
      %941 = vector.shape_cast %940 : vector<8x128xf32> to vector<1x8x128xf32>
      %cst_532 = arith.constant dense<0.000000e+00> : vector<1xf32>
      %942 = vector.multi_reduction <add>, %941, %cst_532 [1, 2] : vector<1x8x128xf32> to vector<1xf32>
      %943 = vector.shape_cast %942 : vector<1xf32> to vector<1x1x1xf32>
      %944 = vector.extract %943[0, 0, 0] : f32 from vector<1x1x1xf32>
      %945 = vector.broadcast %944 : f32 to vector<1x1xf32>
      %c9_533 = arith.constant 9 : index
      %c0_534 = arith.constant 0 : index
      %c0_535 = arith.constant 0 : index
      %946 = vector.load %arg6[%c9_533, %c0_534, %c0_535] : memref<15x8x128xf32, #tpu.memory_space<vmem>>, vector<1x8x128xf32>
      %947 = vector.shape_cast %946 : vector<1x8x128xf32> to vector<8x128xf32>
      %948 = vector.shape_cast %947 : vector<8x128xf32> to vector<1x8x128xf32>
      %cst_536 = arith.constant dense<0.000000e+00> : vector<1xf32>
      %949 = vector.multi_reduction <add>, %948, %cst_536 [1, 2] : vector<1x8x128xf32> to vector<1xf32>
      %950 = vector.shape_cast %949 : vector<1xf32> to vector<1x1x1xf32>
      %951 = vector.extract %950[0, 0, 0] : f32 from vector<1x1x1xf32>
      %952 = vector.broadcast %951 : f32 to vector<1x1xf32>
      %c9_537 = arith.constant 9 : index
      %c0_538 = arith.constant 0 : index
      %c0_539 = arith.constant 0 : index
      %953 = vector.load %arg7[%c9_537, %c0_538, %c0_539] : memref<15x8x128xf32, #tpu.memory_space<vmem>>, vector<1x8x128xf32>
      %954 = vector.shape_cast %953 : vector<1x8x128xf32> to vector<8x128xf32>
      %955 = vector.shape_cast %954 : vector<8x128xf32> to vector<1x8x128xf32>
      %cst_540 = arith.constant dense<0.000000e+00> : vector<1xf32>
      %956 = vector.multi_reduction <add>, %955, %cst_540 [1, 2] : vector<1x8x128xf32> to vector<1xf32>
      %957 = vector.shape_cast %956 : vector<1xf32> to vector<1x1x1xf32>
      %958 = vector.extract %957[0, 0, 0] : f32 from vector<1x1x1xf32>
      %959 = vector.broadcast %958 : f32 to vector<1x1xf32>
      %cst_541 = arith.constant 0.000000e+00 : f32
      %960 = vector.broadcast %cst_541 : f32 to vector<1x1xf32>
      %961 = arith.cmpf ogt, %945, %960 : vector<1x1xf32>
      %cst_542 = arith.constant 1.000000e+00 : f32
      %962 = vector.broadcast %cst_542 : f32 to vector<1x1xf32>
      %963 = arith.maximumf %945, %962 : vector<1x1xf32>
      %964 = math.log %963 : vector<1x1xf32>
      %965 = arith.mulf %466, %964 : vector<1x1xf32>
      %966 = math.exp %965 : vector<1x1xf32>
      %cst_543 = arith.constant 0.000000e+00 : f32
      %967 = vector.broadcast %cst_543 : f32 to vector<1x1xf32>
      %968 = arith.cmpf oeq, %466, %967 : vector<1x1xf32>
      %cst_544 = arith.constant 1.000000e+00 : f32
      %cst_545 = arith.constant 0.000000e+00 : f32
      %969 = vector.broadcast %cst_544 : f32 to vector<1x1xf32>
      %970 = vector.broadcast %cst_545 : f32 to vector<1x1xf32>
      %971 = arith.select %968, %969, %970 : vector<1x1xi1>, vector<1x1xf32>
      %972 = arith.select %961, %966, %971 : vector<1x1xi1>, vector<1x1xf32>
      %973 = arith.mulf %468, %964 : vector<1x1xf32>
      %974 = math.exp %973 : vector<1x1xf32>
      %cst_546 = arith.constant 0.000000e+00 : f32
      %975 = vector.broadcast %cst_546 : f32 to vector<1x1xf32>
      %976 = arith.select %961, %974, %975 : vector<1x1xi1>, vector<1x1xf32>
      %977 = arith.addf %972, %976 : vector<1x1xf32>
      %cst_547 = arith.constant 5.000000e-01 : f32
      %978 = vector.broadcast %cst_547 : f32 to vector<1x1xf32>
      %979 = arith.mulf %978, %977 : vector<1x1xf32>
      %cst_548 = arith.constant 1.000000e+00 : f32
      %980 = vector.broadcast %cst_548 : f32 to vector<1x1xf32>
      %981 = arith.maximumf %945, %980 : vector<1x1xf32>
      %982 = arith.divf %952, %981 : vector<1x1xf32>
      %983 = arith.divf %959, %981 : vector<1x1xf32>
      %984 = arith.subf %982, %983 : vector<1x1xf32>
      %985 = math.absf %984 : vector<1x1xf32>
      %986 = arith.mulf %985, %979 : vector<1x1xf32>
      %cst_549 = arith.constant 0.000000e+00 : f32
      %987 = vector.broadcast %cst_549 : f32 to vector<1x1xf32>
      %988 = arith.select %961, %986, %987 : vector<1x1xi1>, vector<1x1xf32>
      %989 = arith.addf %937, %988 : vector<1x1xf32>
      %990 = arith.addf %938, %979 : vector<1x1xf32>
      %c10_550 = arith.constant 10 : index
      %c0_551 = arith.constant 0 : index
      %c0_552 = arith.constant 0 : index
      %991 = vector.load %arg5[%c10_550, %c0_551, %c0_552] : memref<15x8x128xf32, #tpu.memory_space<vmem>>, vector<1x8x128xf32>
      %992 = vector.shape_cast %991 : vector<1x8x128xf32> to vector<8x128xf32>
      %993 = vector.shape_cast %992 : vector<8x128xf32> to vector<1x8x128xf32>
      %cst_553 = arith.constant dense<0.000000e+00> : vector<1xf32>
      %994 = vector.multi_reduction <add>, %993, %cst_553 [1, 2] : vector<1x8x128xf32> to vector<1xf32>
      %995 = vector.shape_cast %994 : vector<1xf32> to vector<1x1x1xf32>
      %996 = vector.extract %995[0, 0, 0] : f32 from vector<1x1x1xf32>
      %997 = vector.broadcast %996 : f32 to vector<1x1xf32>
      %c10_554 = arith.constant 10 : index
      %c0_555 = arith.constant 0 : index
      %c0_556 = arith.constant 0 : index
      %998 = vector.load %arg6[%c10_554, %c0_555, %c0_556] : memref<15x8x128xf32, #tpu.memory_space<vmem>>, vector<1x8x128xf32>
      %999 = vector.shape_cast %998 : vector<1x8x128xf32> to vector<8x128xf32>
      %1000 = vector.shape_cast %999 : vector<8x128xf32> to vector<1x8x128xf32>
      %cst_557 = arith.constant dense<0.000000e+00> : vector<1xf32>
      %1001 = vector.multi_reduction <add>, %1000, %cst_557 [1, 2] : vector<1x8x128xf32> to vector<1xf32>
      %1002 = vector.shape_cast %1001 : vector<1xf32> to vector<1x1x1xf32>
      %1003 = vector.extract %1002[0, 0, 0] : f32 from vector<1x1x1xf32>
      %1004 = vector.broadcast %1003 : f32 to vector<1x1xf32>
      %c10_558 = arith.constant 10 : index
      %c0_559 = arith.constant 0 : index
      %c0_560 = arith.constant 0 : index
      %1005 = vector.load %arg7[%c10_558, %c0_559, %c0_560] : memref<15x8x128xf32, #tpu.memory_space<vmem>>, vector<1x8x128xf32>
      %1006 = vector.shape_cast %1005 : vector<1x8x128xf32> to vector<8x128xf32>
      %1007 = vector.shape_cast %1006 : vector<8x128xf32> to vector<1x8x128xf32>
      %cst_561 = arith.constant dense<0.000000e+00> : vector<1xf32>
      %1008 = vector.multi_reduction <add>, %1007, %cst_561 [1, 2] : vector<1x8x128xf32> to vector<1xf32>
      %1009 = vector.shape_cast %1008 : vector<1xf32> to vector<1x1x1xf32>
      %1010 = vector.extract %1009[0, 0, 0] : f32 from vector<1x1x1xf32>
      %1011 = vector.broadcast %1010 : f32 to vector<1x1xf32>
      %cst_562 = arith.constant 0.000000e+00 : f32
      %1012 = vector.broadcast %cst_562 : f32 to vector<1x1xf32>
      %1013 = arith.cmpf ogt, %997, %1012 : vector<1x1xf32>
      %cst_563 = arith.constant 1.000000e+00 : f32
      %1014 = vector.broadcast %cst_563 : f32 to vector<1x1xf32>
      %1015 = arith.maximumf %997, %1014 : vector<1x1xf32>
      %1016 = math.log %1015 : vector<1x1xf32>
      %1017 = arith.mulf %466, %1016 : vector<1x1xf32>
      %1018 = math.exp %1017 : vector<1x1xf32>
      %cst_564 = arith.constant 0.000000e+00 : f32
      %1019 = vector.broadcast %cst_564 : f32 to vector<1x1xf32>
      %1020 = arith.cmpf oeq, %466, %1019 : vector<1x1xf32>
      %cst_565 = arith.constant 1.000000e+00 : f32
      %cst_566 = arith.constant 0.000000e+00 : f32
      %1021 = vector.broadcast %cst_565 : f32 to vector<1x1xf32>
      %1022 = vector.broadcast %cst_566 : f32 to vector<1x1xf32>
      %1023 = arith.select %1020, %1021, %1022 : vector<1x1xi1>, vector<1x1xf32>
      %1024 = arith.select %1013, %1018, %1023 : vector<1x1xi1>, vector<1x1xf32>
      %1025 = arith.mulf %468, %1016 : vector<1x1xf32>
      %1026 = math.exp %1025 : vector<1x1xf32>
      %cst_567 = arith.constant 0.000000e+00 : f32
      %1027 = vector.broadcast %cst_567 : f32 to vector<1x1xf32>
      %1028 = arith.select %1013, %1026, %1027 : vector<1x1xi1>, vector<1x1xf32>
      %1029 = arith.addf %1024, %1028 : vector<1x1xf32>
      %cst_568 = arith.constant 5.000000e-01 : f32
      %1030 = vector.broadcast %cst_568 : f32 to vector<1x1xf32>
      %1031 = arith.mulf %1030, %1029 : vector<1x1xf32>
      %cst_569 = arith.constant 1.000000e+00 : f32
      %1032 = vector.broadcast %cst_569 : f32 to vector<1x1xf32>
      %1033 = arith.maximumf %997, %1032 : vector<1x1xf32>
      %1034 = arith.divf %1004, %1033 : vector<1x1xf32>
      %1035 = arith.divf %1011, %1033 : vector<1x1xf32>
      %1036 = arith.subf %1034, %1035 : vector<1x1xf32>
      %1037 = math.absf %1036 : vector<1x1xf32>
      %1038 = arith.mulf %1037, %1031 : vector<1x1xf32>
      %cst_570 = arith.constant 0.000000e+00 : f32
      %1039 = vector.broadcast %cst_570 : f32 to vector<1x1xf32>
      %1040 = arith.select %1013, %1038, %1039 : vector<1x1xi1>, vector<1x1xf32>
      %1041 = arith.addf %989, %1040 : vector<1x1xf32>
      %1042 = arith.addf %990, %1031 : vector<1x1xf32>
      %c11_571 = arith.constant 11 : index
      %c0_572 = arith.constant 0 : index
      %c0_573 = arith.constant 0 : index
      %1043 = vector.load %arg5[%c11_571, %c0_572, %c0_573] : memref<15x8x128xf32, #tpu.memory_space<vmem>>, vector<1x8x128xf32>
      %1044 = vector.shape_cast %1043 : vector<1x8x128xf32> to vector<8x128xf32>
      %1045 = vector.shape_cast %1044 : vector<8x128xf32> to vector<1x8x128xf32>
      %cst_574 = arith.constant dense<0.000000e+00> : vector<1xf32>
      %1046 = vector.multi_reduction <add>, %1045, %cst_574 [1, 2] : vector<1x8x128xf32> to vector<1xf32>
      %1047 = vector.shape_cast %1046 : vector<1xf32> to vector<1x1x1xf32>
      %1048 = vector.extract %1047[0, 0, 0] : f32 from vector<1x1x1xf32>
      %1049 = vector.broadcast %1048 : f32 to vector<1x1xf32>
      %c11_575 = arith.constant 11 : index
      %c0_576 = arith.constant 0 : index
      %c0_577 = arith.constant 0 : index
      %1050 = vector.load %arg6[%c11_575, %c0_576, %c0_577] : memref<15x8x128xf32, #tpu.memory_space<vmem>>, vector<1x8x128xf32>
      %1051 = vector.shape_cast %1050 : vector<1x8x128xf32> to vector<8x128xf32>
      %1052 = vector.shape_cast %1051 : vector<8x128xf32> to vector<1x8x128xf32>
      %cst_578 = arith.constant dense<0.000000e+00> : vector<1xf32>
      %1053 = vector.multi_reduction <add>, %1052, %cst_578 [1, 2] : vector<1x8x128xf32> to vector<1xf32>
      %1054 = vector.shape_cast %1053 : vector<1xf32> to vector<1x1x1xf32>
      %1055 = vector.extract %1054[0, 0, 0] : f32 from vector<1x1x1xf32>
      %1056 = vector.broadcast %1055 : f32 to vector<1x1xf32>
      %c11_579 = arith.constant 11 : index
      %c0_580 = arith.constant 0 : index
      %c0_581 = arith.constant 0 : index
      %1057 = vector.load %arg7[%c11_579, %c0_580, %c0_581] : memref<15x8x128xf32, #tpu.memory_space<vmem>>, vector<1x8x128xf32>
      %1058 = vector.shape_cast %1057 : vector<1x8x128xf32> to vector<8x128xf32>
      %1059 = vector.shape_cast %1058 : vector<8x128xf32> to vector<1x8x128xf32>
      %cst_582 = arith.constant dense<0.000000e+00> : vector<1xf32>
      %1060 = vector.multi_reduction <add>, %1059, %cst_582 [1, 2] : vector<1x8x128xf32> to vector<1xf32>
      %1061 = vector.shape_cast %1060 : vector<1xf32> to vector<1x1x1xf32>
      %1062 = vector.extract %1061[0, 0, 0] : f32 from vector<1x1x1xf32>
      %1063 = vector.broadcast %1062 : f32 to vector<1x1xf32>
      %cst_583 = arith.constant 0.000000e+00 : f32
      %1064 = vector.broadcast %cst_583 : f32 to vector<1x1xf32>
      %1065 = arith.cmpf ogt, %1049, %1064 : vector<1x1xf32>
      %cst_584 = arith.constant 1.000000e+00 : f32
      %1066 = vector.broadcast %cst_584 : f32 to vector<1x1xf32>
      %1067 = arith.maximumf %1049, %1066 : vector<1x1xf32>
      %1068 = math.log %1067 : vector<1x1xf32>
      %1069 = arith.mulf %466, %1068 : vector<1x1xf32>
      %1070 = math.exp %1069 : vector<1x1xf32>
      %cst_585 = arith.constant 0.000000e+00 : f32
      %1071 = vector.broadcast %cst_585 : f32 to vector<1x1xf32>
      %1072 = arith.cmpf oeq, %466, %1071 : vector<1x1xf32>
      %cst_586 = arith.constant 1.000000e+00 : f32
      %cst_587 = arith.constant 0.000000e+00 : f32
      %1073 = vector.broadcast %cst_586 : f32 to vector<1x1xf32>
      %1074 = vector.broadcast %cst_587 : f32 to vector<1x1xf32>
      %1075 = arith.select %1072, %1073, %1074 : vector<1x1xi1>, vector<1x1xf32>
      %1076 = arith.select %1065, %1070, %1075 : vector<1x1xi1>, vector<1x1xf32>
      %1077 = arith.mulf %468, %1068 : vector<1x1xf32>
      %1078 = math.exp %1077 : vector<1x1xf32>
      %cst_588 = arith.constant 0.000000e+00 : f32
      %1079 = vector.broadcast %cst_588 : f32 to vector<1x1xf32>
      %1080 = arith.select %1065, %1078, %1079 : vector<1x1xi1>, vector<1x1xf32>
      %1081 = arith.addf %1076, %1080 : vector<1x1xf32>
      %cst_589 = arith.constant 5.000000e-01 : f32
      %1082 = vector.broadcast %cst_589 : f32 to vector<1x1xf32>
      %1083 = arith.mulf %1082, %1081 : vector<1x1xf32>
      %cst_590 = arith.constant 1.000000e+00 : f32
      %1084 = vector.broadcast %cst_590 : f32 to vector<1x1xf32>
      %1085 = arith.maximumf %1049, %1084 : vector<1x1xf32>
      %1086 = arith.divf %1056, %1085 : vector<1x1xf32>
      %1087 = arith.divf %1063, %1085 : vector<1x1xf32>
      %1088 = arith.subf %1086, %1087 : vector<1x1xf32>
      %1089 = math.absf %1088 : vector<1x1xf32>
      %1090 = arith.mulf %1089, %1083 : vector<1x1xf32>
      %cst_591 = arith.constant 0.000000e+00 : f32
      %1091 = vector.broadcast %cst_591 : f32 to vector<1x1xf32>
      %1092 = arith.select %1065, %1090, %1091 : vector<1x1xi1>, vector<1x1xf32>
      %1093 = arith.addf %1041, %1092 : vector<1x1xf32>
      %1094 = arith.addf %1042, %1083 : vector<1x1xf32>
      %c12_592 = arith.constant 12 : index
      %c0_593 = arith.constant 0 : index
      %c0_594 = arith.constant 0 : index
      %1095 = vector.load %arg5[%c12_592, %c0_593, %c0_594] : memref<15x8x128xf32, #tpu.memory_space<vmem>>, vector<1x8x128xf32>
      %1096 = vector.shape_cast %1095 : vector<1x8x128xf32> to vector<8x128xf32>
      %1097 = vector.shape_cast %1096 : vector<8x128xf32> to vector<1x8x128xf32>
      %cst_595 = arith.constant dense<0.000000e+00> : vector<1xf32>
      %1098 = vector.multi_reduction <add>, %1097, %cst_595 [1, 2] : vector<1x8x128xf32> to vector<1xf32>
      %1099 = vector.shape_cast %1098 : vector<1xf32> to vector<1x1x1xf32>
      %1100 = vector.extract %1099[0, 0, 0] : f32 from vector<1x1x1xf32>
      %1101 = vector.broadcast %1100 : f32 to vector<1x1xf32>
      %c12_596 = arith.constant 12 : index
      %c0_597 = arith.constant 0 : index
      %c0_598 = arith.constant 0 : index
      %1102 = vector.load %arg6[%c12_596, %c0_597, %c0_598] : memref<15x8x128xf32, #tpu.memory_space<vmem>>, vector<1x8x128xf32>
      %1103 = vector.shape_cast %1102 : vector<1x8x128xf32> to vector<8x128xf32>
      %1104 = vector.shape_cast %1103 : vector<8x128xf32> to vector<1x8x128xf32>
      %cst_599 = arith.constant dense<0.000000e+00> : vector<1xf32>
      %1105 = vector.multi_reduction <add>, %1104, %cst_599 [1, 2] : vector<1x8x128xf32> to vector<1xf32>
      %1106 = vector.shape_cast %1105 : vector<1xf32> to vector<1x1x1xf32>
      %1107 = vector.extract %1106[0, 0, 0] : f32 from vector<1x1x1xf32>
      %1108 = vector.broadcast %1107 : f32 to vector<1x1xf32>
      %c12_600 = arith.constant 12 : index
      %c0_601 = arith.constant 0 : index
      %c0_602 = arith.constant 0 : index
      %1109 = vector.load %arg7[%c12_600, %c0_601, %c0_602] : memref<15x8x128xf32, #tpu.memory_space<vmem>>, vector<1x8x128xf32>
      %1110 = vector.shape_cast %1109 : vector<1x8x128xf32> to vector<8x128xf32>
      %1111 = vector.shape_cast %1110 : vector<8x128xf32> to vector<1x8x128xf32>
      %cst_603 = arith.constant dense<0.000000e+00> : vector<1xf32>
      %1112 = vector.multi_reduction <add>, %1111, %cst_603 [1, 2] : vector<1x8x128xf32> to vector<1xf32>
      %1113 = vector.shape_cast %1112 : vector<1xf32> to vector<1x1x1xf32>
      %1114 = vector.extract %1113[0, 0, 0] : f32 from vector<1x1x1xf32>
      %1115 = vector.broadcast %1114 : f32 to vector<1x1xf32>
      %cst_604 = arith.constant 0.000000e+00 : f32
      %1116 = vector.broadcast %cst_604 : f32 to vector<1x1xf32>
      %1117 = arith.cmpf ogt, %1101, %1116 : vector<1x1xf32>
      %cst_605 = arith.constant 1.000000e+00 : f32
      %1118 = vector.broadcast %cst_605 : f32 to vector<1x1xf32>
      %1119 = arith.maximumf %1101, %1118 : vector<1x1xf32>
      %1120 = math.log %1119 : vector<1x1xf32>
      %1121 = arith.mulf %466, %1120 : vector<1x1xf32>
      %1122 = math.exp %1121 : vector<1x1xf32>
      %cst_606 = arith.constant 0.000000e+00 : f32
      %1123 = vector.broadcast %cst_606 : f32 to vector<1x1xf32>
      %1124 = arith.cmpf oeq, %466, %1123 : vector<1x1xf32>
      %cst_607 = arith.constant 1.000000e+00 : f32
      %cst_608 = arith.constant 0.000000e+00 : f32
      %1125 = vector.broadcast %cst_607 : f32 to vector<1x1xf32>
      %1126 = vector.broadcast %cst_608 : f32 to vector<1x1xf32>
      %1127 = arith.select %1124, %1125, %1126 : vector<1x1xi1>, vector<1x1xf32>
      %1128 = arith.select %1117, %1122, %1127 : vector<1x1xi1>, vector<1x1xf32>
      %1129 = arith.mulf %468, %1120 : vector<1x1xf32>
      %1130 = math.exp %1129 : vector<1x1xf32>
      %cst_609 = arith.constant 0.000000e+00 : f32
      %1131 = vector.broadcast %cst_609 : f32 to vector<1x1xf32>
      %1132 = arith.select %1117, %1130, %1131 : vector<1x1xi1>, vector<1x1xf32>
      %1133 = arith.addf %1128, %1132 : vector<1x1xf32>
      %cst_610 = arith.constant 5.000000e-01 : f32
      %1134 = vector.broadcast %cst_610 : f32 to vector<1x1xf32>
      %1135 = arith.mulf %1134, %1133 : vector<1x1xf32>
      %cst_611 = arith.constant 1.000000e+00 : f32
      %1136 = vector.broadcast %cst_611 : f32 to vector<1x1xf32>
      %1137 = arith.maximumf %1101, %1136 : vector<1x1xf32>
      %1138 = arith.divf %1108, %1137 : vector<1x1xf32>
      %1139 = arith.divf %1115, %1137 : vector<1x1xf32>
      %1140 = arith.subf %1138, %1139 : vector<1x1xf32>
      %1141 = math.absf %1140 : vector<1x1xf32>
      %1142 = arith.mulf %1141, %1135 : vector<1x1xf32>
      %cst_612 = arith.constant 0.000000e+00 : f32
      %1143 = vector.broadcast %cst_612 : f32 to vector<1x1xf32>
      %1144 = arith.select %1117, %1142, %1143 : vector<1x1xi1>, vector<1x1xf32>
      %1145 = arith.addf %1093, %1144 : vector<1x1xf32>
      %1146 = arith.addf %1094, %1135 : vector<1x1xf32>
      %c13_613 = arith.constant 13 : index
      %c0_614 = arith.constant 0 : index
      %c0_615 = arith.constant 0 : index
      %1147 = vector.load %arg5[%c13_613, %c0_614, %c0_615] : memref<15x8x128xf32, #tpu.memory_space<vmem>>, vector<1x8x128xf32>
      %1148 = vector.shape_cast %1147 : vector<1x8x128xf32> to vector<8x128xf32>
      %1149 = vector.shape_cast %1148 : vector<8x128xf32> to vector<1x8x128xf32>
      %cst_616 = arith.constant dense<0.000000e+00> : vector<1xf32>
      %1150 = vector.multi_reduction <add>, %1149, %cst_616 [1, 2] : vector<1x8x128xf32> to vector<1xf32>
      %1151 = vector.shape_cast %1150 : vector<1xf32> to vector<1x1x1xf32>
      %1152 = vector.extract %1151[0, 0, 0] : f32 from vector<1x1x1xf32>
      %1153 = vector.broadcast %1152 : f32 to vector<1x1xf32>
      %c13_617 = arith.constant 13 : index
      %c0_618 = arith.constant 0 : index
      %c0_619 = arith.constant 0 : index
      %1154 = vector.load %arg6[%c13_617, %c0_618, %c0_619] : memref<15x8x128xf32, #tpu.memory_space<vmem>>, vector<1x8x128xf32>
      %1155 = vector.shape_cast %1154 : vector<1x8x128xf32> to vector<8x128xf32>
      %1156 = vector.shape_cast %1155 : vector<8x128xf32> to vector<1x8x128xf32>
      %cst_620 = arith.constant dense<0.000000e+00> : vector<1xf32>
      %1157 = vector.multi_reduction <add>, %1156, %cst_620 [1, 2] : vector<1x8x128xf32> to vector<1xf32>
      %1158 = vector.shape_cast %1157 : vector<1xf32> to vector<1x1x1xf32>
      %1159 = vector.extract %1158[0, 0, 0] : f32 from vector<1x1x1xf32>
      %1160 = vector.broadcast %1159 : f32 to vector<1x1xf32>
      %c13_621 = arith.constant 13 : index
      %c0_622 = arith.constant 0 : index
      %c0_623 = arith.constant 0 : index
      %1161 = vector.load %arg7[%c13_621, %c0_622, %c0_623] : memref<15x8x128xf32, #tpu.memory_space<vmem>>, vector<1x8x128xf32>
      %1162 = vector.shape_cast %1161 : vector<1x8x128xf32> to vector<8x128xf32>
      %1163 = vector.shape_cast %1162 : vector<8x128xf32> to vector<1x8x128xf32>
      %cst_624 = arith.constant dense<0.000000e+00> : vector<1xf32>
      %1164 = vector.multi_reduction <add>, %1163, %cst_624 [1, 2] : vector<1x8x128xf32> to vector<1xf32>
      %1165 = vector.shape_cast %1164 : vector<1xf32> to vector<1x1x1xf32>
      %1166 = vector.extract %1165[0, 0, 0] : f32 from vector<1x1x1xf32>
      %1167 = vector.broadcast %1166 : f32 to vector<1x1xf32>
      %cst_625 = arith.constant 0.000000e+00 : f32
      %1168 = vector.broadcast %cst_625 : f32 to vector<1x1xf32>
      %1169 = arith.cmpf ogt, %1153, %1168 : vector<1x1xf32>
      %cst_626 = arith.constant 1.000000e+00 : f32
      %1170 = vector.broadcast %cst_626 : f32 to vector<1x1xf32>
      %1171 = arith.maximumf %1153, %1170 : vector<1x1xf32>
      %1172 = math.log %1171 : vector<1x1xf32>
      %1173 = arith.mulf %466, %1172 : vector<1x1xf32>
      %1174 = math.exp %1173 : vector<1x1xf32>
      %cst_627 = arith.constant 0.000000e+00 : f32
      %1175 = vector.broadcast %cst_627 : f32 to vector<1x1xf32>
      %1176 = arith.cmpf oeq, %466, %1175 : vector<1x1xf32>
      %cst_628 = arith.constant 1.000000e+00 : f32
      %cst_629 = arith.constant 0.000000e+00 : f32
      %1177 = vector.broadcast %cst_628 : f32 to vector<1x1xf32>
      %1178 = vector.broadcast %cst_629 : f32 to vector<1x1xf32>
      %1179 = arith.select %1176, %1177, %1178 : vector<1x1xi1>, vector<1x1xf32>
      %1180 = arith.select %1169, %1174, %1179 : vector<1x1xi1>, vector<1x1xf32>
      %1181 = arith.mulf %468, %1172 : vector<1x1xf32>
      %1182 = math.exp %1181 : vector<1x1xf32>
      %cst_630 = arith.constant 0.000000e+00 : f32
      %1183 = vector.broadcast %cst_630 : f32 to vector<1x1xf32>
      %1184 = arith.select %1169, %1182, %1183 : vector<1x1xi1>, vector<1x1xf32>
      %1185 = arith.addf %1180, %1184 : vector<1x1xf32>
      %cst_631 = arith.constant 5.000000e-01 : f32
      %1186 = vector.broadcast %cst_631 : f32 to vector<1x1xf32>
      %1187 = arith.mulf %1186, %1185 : vector<1x1xf32>
      %cst_632 = arith.constant 1.000000e+00 : f32
      %1188 = vector.broadcast %cst_632 : f32 to vector<1x1xf32>
      %1189 = arith.maximumf %1153, %1188 : vector<1x1xf32>
      %1190 = arith.divf %1160, %1189 : vector<1x1xf32>
      %1191 = arith.divf %1167, %1189 : vector<1x1xf32>
      %1192 = arith.subf %1190, %1191 : vector<1x1xf32>
      %1193 = math.absf %1192 : vector<1x1xf32>
      %1194 = arith.mulf %1193, %1187 : vector<1x1xf32>
      %cst_633 = arith.constant 0.000000e+00 : f32
      %1195 = vector.broadcast %cst_633 : f32 to vector<1x1xf32>
      %1196 = arith.select %1169, %1194, %1195 : vector<1x1xi1>, vector<1x1xf32>
      %1197 = arith.addf %1145, %1196 : vector<1x1xf32>
      %1198 = arith.addf %1146, %1187 : vector<1x1xf32>
      %c14_634 = arith.constant 14 : index
      %c0_635 = arith.constant 0 : index
      %c0_636 = arith.constant 0 : index
      %1199 = vector.load %arg5[%c14_634, %c0_635, %c0_636] : memref<15x8x128xf32, #tpu.memory_space<vmem>>, vector<1x8x128xf32>
      %1200 = vector.shape_cast %1199 : vector<1x8x128xf32> to vector<8x128xf32>
      %1201 = vector.shape_cast %1200 : vector<8x128xf32> to vector<1x8x128xf32>
      %cst_637 = arith.constant dense<0.000000e+00> : vector<1xf32>
      %1202 = vector.multi_reduction <add>, %1201, %cst_637 [1, 2] : vector<1x8x128xf32> to vector<1xf32>
      %1203 = vector.shape_cast %1202 : vector<1xf32> to vector<1x1x1xf32>
      %1204 = vector.extract %1203[0, 0, 0] : f32 from vector<1x1x1xf32>
      %1205 = vector.broadcast %1204 : f32 to vector<1x1xf32>
      %c14_638 = arith.constant 14 : index
      %c0_639 = arith.constant 0 : index
      %c0_640 = arith.constant 0 : index
      %1206 = vector.load %arg6[%c14_638, %c0_639, %c0_640] : memref<15x8x128xf32, #tpu.memory_space<vmem>>, vector<1x8x128xf32>
      %1207 = vector.shape_cast %1206 : vector<1x8x128xf32> to vector<8x128xf32>
      %1208 = vector.shape_cast %1207 : vector<8x128xf32> to vector<1x8x128xf32>
      %cst_641 = arith.constant dense<0.000000e+00> : vector<1xf32>
      %1209 = vector.multi_reduction <add>, %1208, %cst_641 [1, 2] : vector<1x8x128xf32> to vector<1xf32>
      %1210 = vector.shape_cast %1209 : vector<1xf32> to vector<1x1x1xf32>
      %1211 = vector.extract %1210[0, 0, 0] : f32 from vector<1x1x1xf32>
      %1212 = vector.broadcast %1211 : f32 to vector<1x1xf32>
      %c14_642 = arith.constant 14 : index
      %c0_643 = arith.constant 0 : index
      %c0_644 = arith.constant 0 : index
      %1213 = vector.load %arg7[%c14_642, %c0_643, %c0_644] : memref<15x8x128xf32, #tpu.memory_space<vmem>>, vector<1x8x128xf32>
      %1214 = vector.shape_cast %1213 : vector<1x8x128xf32> to vector<8x128xf32>
      %1215 = vector.shape_cast %1214 : vector<8x128xf32> to vector<1x8x128xf32>
      %cst_645 = arith.constant dense<0.000000e+00> : vector<1xf32>
      %1216 = vector.multi_reduction <add>, %1215, %cst_645 [1, 2] : vector<1x8x128xf32> to vector<1xf32>
      %1217 = vector.shape_cast %1216 : vector<1xf32> to vector<1x1x1xf32>
      %1218 = vector.extract %1217[0, 0, 0] : f32 from vector<1x1x1xf32>
      %1219 = vector.broadcast %1218 : f32 to vector<1x1xf32>
      %cst_646 = arith.constant 0.000000e+00 : f32
      %1220 = vector.broadcast %cst_646 : f32 to vector<1x1xf32>
      %1221 = arith.cmpf ogt, %1205, %1220 : vector<1x1xf32>
      %cst_647 = arith.constant 1.000000e+00 : f32
      %1222 = vector.broadcast %cst_647 : f32 to vector<1x1xf32>
      %1223 = arith.maximumf %1205, %1222 : vector<1x1xf32>
      %1224 = math.log %1223 : vector<1x1xf32>
      %1225 = arith.mulf %466, %1224 : vector<1x1xf32>
      %1226 = math.exp %1225 : vector<1x1xf32>
      %cst_648 = arith.constant 0.000000e+00 : f32
      %1227 = vector.broadcast %cst_648 : f32 to vector<1x1xf32>
      %1228 = arith.cmpf oeq, %466, %1227 : vector<1x1xf32>
      %cst_649 = arith.constant 1.000000e+00 : f32
      %cst_650 = arith.constant 0.000000e+00 : f32
      %1229 = vector.broadcast %cst_649 : f32 to vector<1x1xf32>
      %1230 = vector.broadcast %cst_650 : f32 to vector<1x1xf32>
      %1231 = arith.select %1228, %1229, %1230 : vector<1x1xi1>, vector<1x1xf32>
      %1232 = arith.select %1221, %1226, %1231 : vector<1x1xi1>, vector<1x1xf32>
      %1233 = arith.mulf %468, %1224 : vector<1x1xf32>
      %1234 = math.exp %1233 : vector<1x1xf32>
      %cst_651 = arith.constant 0.000000e+00 : f32
      %1235 = vector.broadcast %cst_651 : f32 to vector<1x1xf32>
      %1236 = arith.select %1221, %1234, %1235 : vector<1x1xi1>, vector<1x1xf32>
      %1237 = arith.addf %1232, %1236 : vector<1x1xf32>
      %cst_652 = arith.constant 5.000000e-01 : f32
      %1238 = vector.broadcast %cst_652 : f32 to vector<1x1xf32>
      %1239 = arith.mulf %1238, %1237 : vector<1x1xf32>
      %cst_653 = arith.constant 1.000000e+00 : f32
      %1240 = vector.broadcast %cst_653 : f32 to vector<1x1xf32>
      %1241 = arith.maximumf %1205, %1240 : vector<1x1xf32>
      %1242 = arith.divf %1212, %1241 : vector<1x1xf32>
      %1243 = arith.divf %1219, %1241 : vector<1x1xf32>
      %1244 = arith.subf %1242, %1243 : vector<1x1xf32>
      %1245 = math.absf %1244 : vector<1x1xf32>
      %1246 = arith.mulf %1245, %1239 : vector<1x1xf32>
      %cst_654 = arith.constant 0.000000e+00 : f32
      %1247 = vector.broadcast %cst_654 : f32 to vector<1x1xf32>
      %1248 = arith.select %1221, %1246, %1247 : vector<1x1xi1>, vector<1x1xf32>
      %1249 = arith.addf %1197, %1248 : vector<1x1xf32>
      %1250 = arith.addf %1198, %1239 : vector<1x1xf32>
      %1251 = arith.divf %1249, %1250 : vector<1x1xf32>
      %c0_655 = arith.constant 0 : index
      %c0_656 = arith.constant 0 : index
      %1252 = vector.load %arg4[%c0_655, %c0_656] : memref<1x1xf32, #tpu.memory_space<vmem>>, vector<1x1xf32>
      tpu.vector_store %arg4[%c0_655, %c0_656], %1251 {strides = array<i32>} : memref<1x1xf32, #tpu.memory_space<vmem>>, vector<1x1xf32>,
    } else {
    }
    return
  }
  func.func @transform_0(%arg0: i32, %arg1: memref<1xi32, #tpu.memory_space<smem>>) -> (i32, i32) {
    %c0_i32 = arith.constant 0 : i32
    %c0_i32_0 = arith.constant 0 : i32
    return %arg0, %c0_i32 : i32, i32
  }
  func.func @transform_1(%arg0: i32, %arg1: memref<1xi32, #tpu.memory_space<smem>>) -> (i32, i32) {
    %c0_i32 = arith.constant 0 : i32
    %c0_i32_0 = arith.constant 0 : i32
    return %arg0, %c0_i32 : i32, i32
  }
  func.func @transform_2(%arg0: i32, %arg1: memref<1xi32, #tpu.memory_space<smem>>) -> (i32, i32) {
    %c0_i32 = arith.constant 0 : i32
    %c0_i32_0 = arith.constant 0 : i32
    %c0_i32_1 = arith.constant 0 : i32
    return %c0_i32, %c0_i32_0 : i32, i32
  }
}

</mosaic_0001>

<bundles_post_ra>
// kernel: tpu_custom_call.1
= control target key start
LH: loop header
LB: loop body
LE: loop exit
PB: predicated region body
PF: predicated region fallthrough
CT: control target
= control target key end

     0   :  { %9 = vsyncpa [#allocation9], 0  ;;  %s2873_s0 = inlined_call_operand.<no memory space> [shape: s32[1], index: 0, kind: input, shape index: {}]   ;;  %s2874_s1 = inlined_call_operand.hbm [shape: f32[8,128], index: 1, kind: input, shape index: {}]   ;;  %s2875_s2 = inlined_call_operand.hbm [shape: f32[8,128], index: 2, kind: input, shape index: {}]   ;;  %s2876_s3 = inlined_call_operand.hbm [shape: f32[1,1], index: 3, kind: output, shape index: {}]  }
   0x1   :  { %10 = vsyncpa [#allocation12], 0 }
   0x2   :  { %11 = vsyncpa [#allocation10], 0  ;;  %s17_s14 = sshll.u32 %s2874_s1, 4  ;;  %s1833_s15 = smov [#allocation8]   ;;  %s18_s14 = int_to_ptr.hbm [resolvable:$true] %s17_s14 }
   0x3   :  { %s19_s16 = sshll.u32 %s1833_s15, 4  ;;  %s28_s19 = sshll.u32 %s2875_s2, 4  ;;  %s20_s16 = int_to_ptr.vmem [resolvable:$true] %s19_s16  ;;  %s29_s19 = int_to_ptr.hbm [resolvable:$true] %s28_s19 }
   0x4   :  { %22 = dma.hbm_to_vmem [thread:$0]  %s18_s14, 128, %s20_s16, [#allocation9]  }
   0x5   :  { %s1834_s20 = smov [#allocation11]  }
   0x6   :  { %s30_s21 = sshll.u32 %s1834_s20, 4  ;;  %s31_s21 = int_to_ptr.vmem [resolvable:$true] %s30_s21 }
   0x7   :  { %33 = dma.hbm_to_vmem [thread:$0]  %s29_s19, 128, %s31_s21, [#allocation12]  }
   0x8   :  { %1827 = dma.done.wait [#allocation9], 128  }
   0x9   :  { %1828 = vsyncadd [#allocation9], 4294967168 }
   0xa   :  { %1829 = dma.done.wait [#allocation12], 128  }
   0xb   :  { %1830 = vsyncadd [#allocation12], 4294967168  ;;  %v95_v0 = vlaneseq  ;;  %v104_v4 = vstv %s2873_s0  ;;  %v92_v6 = vld [vmem:[#allocation8] sm:$0xff]  ;;  %v93_v7 = vld [vmem:[#allocation11] sm:$0xff]  ;;  %v1835_v15 = vmov 0.0   ;;  %s416_s24 = scvt.s32.f32 %s2873_s0 }
   0xd   :  { %v96_v1 = vshrl.u32 %v95_v0, 7  ;;  %v98_v2 = vand.u32 127, %v95_v0 }
   0xf   :  { %v102_v3 = vmul.u32 128, %v96_v1 }
  0x11   :  { %v103_v5 = vadd.s32 %v102_v3, %v98_v2 }
  0x13   :  { %vm105_vm0 = vcmp.lt.s32.totalorder %v103_v5, %v104_v4 }
  0x14   :  { %v1866_v8 = vsel %vm105_vm0, %v92_v6, -1.0  ;;  %v1868_v9 = vsel %vm105_vm0, %v93_v7, 0.0 }
  0x15   :  { %v108_v10 = vmul.f32 15.0, %v1866_v8  ;;  %418 = vadd.xlane.f32.xlu0 %v1868_v9 }
  0x17   :  { %v109_v11 = vfloor.f32 %v108_v10 }
  0x19   :  { %v110_v12 = vmin.f32 %v109_v11, 14.0 }
  0x1b   :  { %v1872_v13 = vcvt.f32.s32 %v110_v12 }
  0x1d   :  { %vm116_vm1 = vcmp.eq.s32.totalorder %v1872_v13, 0  ;;  %vm133_vm2 = vcmp.eq.s32.totalorder %v1872_v13, 1  ;;  %vm153_vm3 = vcmp.eq.s32.totalorder %v1872_v13, 2  ;;  %vm173_vm4 = vcmp.eq.s32.totalorder %v1872_v13, 3 }
  0x1e   :  { %v124_v14 = vsel %vm116_vm1, %v1866_v8, 0.0  ;;  %v1518_v16 = vsel %vm116_vm1, 1.0, %v1835_v15  ;;  %v1519_v17 = vsel %vm133_vm2, 1.0, %v1835_v15  ;;  %v1520_v19 = vsel %vm153_vm3, 1.0, %v1835_v15 }
  0x1f   :  { %458 = vadd.xlane.f32.xlu1 %v124_v14  ;;  %447 = vadd.xlane.f32.xlu0 %v1518_v16  ;;  %v149_v18 = vmul.f32 %v1519_v17, %v1868_v9  ;;  %v143_v20 = vsel %vm133_vm2, %v1866_v8, 0.0  ;;  %v129_v21 = vmul.f32 %v1518_v16, %v1868_v9  ;;  %v169_v22 = vmul.f32 %v1520_v19, %v1868_v9 }
  0x20   :  { %518 = vadd.xlane.f32.xlu2 %v1519_v17  ;;  %v163_v23 = vsel %vm153_vm3, %v1866_v8, 0.0  ;;  %v1521_v24 = vsel %vm173_vm4, 1.0, %v1835_v15  ;;  %v183_v26 = vsel %vm173_vm4, %v1866_v8, 0.0  ;;  %vm193_vm5 = vcmp.eq.s32.totalorder %v1872_v13, 4 }
  0x21   :  { %v189_v25 = vmul.f32 %v1521_v24, %v1868_v9  ;;  %v1522_v27 = vsel %vm193_vm5, 1.0, %v1835_v15  ;;  %v203_v29 = vsel %vm193_vm5, %v1866_v8, 0.0  ;;  %vm213_vm6 = vcmp.eq.s32.totalorder %v1872_v13, 5 }
  0x22   :  { %v209_v28 = vmul.f32 %v1522_v27, %v1868_v9  ;;  %v1523_v30 = vsel %vm213_vm6, 1.0, %v1835_v15  ;;  %v223_v32 = vsel %vm213_vm6, %v1866_v8, 0.0  ;;  %vm233_vm7 = vcmp.eq.s32.totalorder %v1872_v13, 6 }
  0x23   :  { %v229_v31 = vmul.f32 %v1523_v30, %v1868_v9  ;;  %v1524_v33 = vsel %vm233_vm7, 1.0, %v1835_v15  ;;  %v243_v35 = vsel %vm233_vm7, %v1866_v8, 0.0  ;;  %vm253_vm8 = vcmp.eq.s32.totalorder %v1872_v13, 7 }
  0x24   :  { %v249_v34 = vmul.f32 %v1524_v33, %v1868_v9  ;;  %v1525_v36 = vsel %vm253_vm8, 1.0, %v1835_v15  ;;  %v263_v38 = vsel %vm253_vm8, %v1866_v8, 0.0  ;;  %vm273_vm9 = vcmp.eq.s32.totalorder %v1872_v13, 8 }
  0x25   :  { %v269_v37 = vmul.f32 %v1525_v36, %v1868_v9  ;;  %v1526_v39 = vsel %vm273_vm9, 1.0, %v1835_v15  ;;  %v283_v41 = vsel %vm273_vm9, %v1866_v8, 0.0  ;;  %vm293_vm10 = vcmp.eq.s32.totalorder %v1872_v13, 9 }
  0x26   :  { %v289_v40 = vmul.f32 %v1526_v39, %v1868_v9  ;;  %v1527_v42 = vsel %vm293_vm10, 1.0, %v1835_v15  ;;  %v303_v44 = vsel %vm293_vm10, %v1866_v8, 0.0  ;;  %vm313_vm11 = vcmp.eq.s32.totalorder %v1872_v13, 10 }
  0x27   :  { %587 = vadd.xlane.f32.xlu1 %v1520_v19  ;;  %540 = vadd.xlane.f32.xlu0 %v149_v18  ;;  %v309_v43 = vmul.f32 %v1527_v42, %v1868_v9  ;;  %v1528_v45 = vsel %vm313_vm11, 1.0, %v1835_v15  ;;  %v323_v47 = vsel %vm313_vm11, %v1866_v8, 0.0  ;;  %vm333_vm12 = vcmp.eq.s32.totalorder %v1872_v13, 11 }
  0x28   :  { %529 = vadd.xlane.f32.xlu2 %v143_v20  ;;  %v329_v46 = vmul.f32 %v1528_v45, %v1868_v9  ;;  %v1529_v48 = vsel %vm333_vm12, 1.0, %v1835_v15  ;;  %v343_v50 = vsel %vm333_vm12, %v1866_v8, 0.0  ;;  %vm353_vm13 = vcmp.eq.s32.totalorder %v1872_v13, 12 }
  0x29   :  { %v349_v49 = vmul.f32 %v1529_v48, %v1868_v9  ;;  %v1530_v51 = vsel %vm353_vm13, 1.0, %v1835_v15  ;;  %v363_v53 = vsel %vm353_vm13, %v1866_v8, 0.0  ;;  %vm373_vm14 = vcmp.eq.s32.totalorder %v1872_v13, 13 }
  0x2a   :  { %v369_v52 = vmul.f32 %v1530_v51, %v1868_v9  ;;  %v1531_v54 = vsel %vm373_vm14, 1.0, %v1835_v15  ;;  %v383_v56 = vsel %vm373_vm14, %v1866_v8, 0.0  ;;  %vm393_vm15 = vcmp.eq.s32.totalorder %v1872_v13, 14 }
  0x2b   :  { %v389_v55 = vmul.f32 %v1531_v54, %v1868_v9  ;;  %v1532_v59 = vsel %vm393_vm15, 1.0, %v1835_v15  ;;  %v403_v63 = vsel %vm393_vm15, %v1866_v8, 0.0 }
  0x2c   :  { %v409_v61 = vmul.f32 %v1532_v59, %v1868_v9 }
  0x2f   :  { %469 = vadd.xlane.f32.xlu1 %v129_v21  ;;  %609 = vadd.xlane.f32.xlu0 %v169_v22 }
  0x30   :  { %598 = vadd.xlane.f32.xlu2 %v163_v23 }
  0x37   :  { %656 = vadd.xlane.f32.xlu1 %v1521_v24  ;;  %678 = vadd.xlane.f32.xlu0 %v189_v25 }
  0x38   :  { %667 = vadd.xlane.f32.xlu2 %v183_v26 }
  0x3f   :  { %725 = vadd.xlane.f32.xlu1 %v1522_v27  ;;  %747 = vadd.xlane.f32.xlu0 %v209_v28 }
  0x40   :  { %736 = vadd.xlane.f32.xlu2 %v203_v29 }
  0x47   :  { %794 = vadd.xlane.f32.xlu1 %v1523_v30  ;;  %816 = vadd.xlane.f32.xlu0 %v229_v31 }
  0x48   :  { %805 = vadd.xlane.f32.xlu2 %v223_v32 }
  0x4f   :  { %863 = vadd.xlane.f32.xlu1 %v1524_v33  ;;  %885 = vadd.xlane.f32.xlu0 %v249_v34 }
  0x50   :  { %874 = vadd.xlane.f32.xlu2 %v243_v35 }
  0x57   :  { %932 = vadd.xlane.f32.xlu1 %v1525_v36  ;;  %954 = vadd.xlane.f32.xlu0 %v269_v37 }
  0x58   :  { %943 = vadd.xlane.f32.xlu2 %v263_v38 }
  0x5f   :  { %1001 = vadd.xlane.f32.xlu1 %v1526_v39  ;;  %1023 = vadd.xlane.f32.xlu0 %v289_v40 }
  0x60   :  { %1012 = vadd.xlane.f32.xlu2 %v283_v41 }
  0x67   :  { %1070 = vadd.xlane.f32.xlu1 %v1527_v42  ;;  %1092 = vadd.xlane.f32.xlu0 %v309_v43 }
  0x68   :  { %1081 = vadd.xlane.f32.xlu2 %v303_v44 }
  0x6f   :  { %1139 = vadd.xlane.f32.xlu1 %v1528_v45  ;;  %1161 = vadd.xlane.f32.xlu0 %v329_v46 }
  0x70   :  { %1150 = vadd.xlane.f32.xlu2 %v323_v47 }
  0x77   :  { %1208 = vadd.xlane.f32.xlu1 %v1529_v48  ;;  %1230 = vadd.xlane.f32.xlu0 %v349_v49 }
  0x78   :  { %1219 = vadd.xlane.f32.xlu2 %v343_v50 }
  0x7f   :  { %1277 = vadd.xlane.f32.xlu1 %v1530_v51  ;;  %1299 = vadd.xlane.f32.xlu0 %v369_v52 }
  0x80   :  { %1288 = vadd.xlane.f32.xlu2 %v363_v53 }
  0x87   :  { %1346 = vadd.xlane.f32.xlu1 %v1531_v54  ;;  %1368 = vadd.xlane.f32.xlu0 %v389_v55 }
  0x88   :  { %1357 = vadd.xlane.f32.xlu2 %v383_v56  ;;  %v419_v57 = vpop.xlane.xlu0 %418 }
  0x89   :  { %v420_v58 = vrot.slane %v419_v57, 4 }
  0x8b   :  { %v421_v60 = vadd.f32 %v420_v58, %v419_v57 }
  0x8d   :  { %v422_v62 = vrot.slane %v421_v60, 2 }
  0x8f   :  { %1415 = vadd.xlane.f32.xlu1 %v1532_v59  ;;  %v423_v0 = vadd.f32 %v422_v62, %v421_v60  ;;  %1437 = vadd.xlane.f32.xlu0 %v409_v61 }
  0x90   :  { %1426 = vadd.xlane.f32.xlu2 %v403_v63 }
  0x91   :  { %v424_v1 = vrot.slane %v423_v0, 1 }
  0x92   :  { %v459_v2 = vpop.xlane.xlu1 %458  ;;  %v448_v3 = vpop.xlane.xlu0 %447 }
  0x93   :  { %v460_v4 = vrot.slane %v459_v2, 4  ;;  %v449_v5 = vrot.slane %v448_v3, 4  ;;  %v519_v6 = vpop.xlane.xlu2 %518  ;;  %v425_v7 = vadd.f32 %v424_v1, %v423_v0 }
  0x94   :  { %v520_v16 = vrot.slane %v519_v6, 4 }
  0x95   :  { %v461_v10 = vadd.f32 %v460_v4, %v459_v2  ;;  %v450_v11 = vadd.f32 %v449_v5, %v448_v3  ;;  %1535 = vpush %v425_v7 }
  0x96   :  { %v521_v26 = vadd.f32 %v520_v16, %v519_v6 }
  0x97   :  { %v462_v12 = vrot.slane %v461_v10, 2  ;;  %v451_v13 = vrot.slane %v450_v11, 2 }
  0x98   :  { %v522_v30 = vrot.slane %v521_v26, 2 }
  0x99   :  { %v452_v9 = vadd.f32 %v451_v13, %v450_v11  ;;  %v463_v14 = vadd.f32 %v462_v12, %v461_v10 }
  0x9a   :  { %v588_v8 = vpop.xlane.xlu1 %587  ;;  %v541_v17 = vpop.xlane.xlu0 %540  ;;  %v523_v43 = vadd.f32 %v522_v30, %v521_v26 }
  0x9b   :  { %v530_v18 = vpop.xlane.xlu2 %529  ;;  %v453_v19 = vrot.slane %v452_v9, 1  ;;  %v464_v20 = vrot.slane %v463_v14, 1  ;;  %v589_v21 = vrot.slane %v588_v8, 4  ;;  %v542_v23 = vrot.slane %v541_v17, 4 }
  0x9c   :  { %v531_v22 = vrot.slane %v530_v18, 4  ;;  %v524_v54 = vrot.slane %v523_v43, 1 }
  0x9d   :  { %v454_v24 = vadd.f32 %v453_v19, %v452_v9  ;;  %v465_v25 = vadd.f32 %v464_v20, %v463_v14  ;;  %v590_v28 = vadd.f32 %v589_v21, %v588_v8  ;;  %v543_v29 = vadd.f32 %v542_v23, %v541_v17 }
  0x9e   :  { %v532_v27 = vadd.f32 %v531_v22, %v530_v18  ;;  %v525_v6 = vadd.f32 %v524_v54, %v523_v43 }
  0x9f   :  { %1537 = vpush %v454_v24  ;;  %v591_v37 = vrot.slane %v590_v28, 2  ;;  %v544_v38 = vrot.slane %v543_v29, 2 }
  0xa0   :  { %1539 = vpush %v465_v25  ;;  %v533_v33 = vrot.slane %v532_v27, 2 }
  0xa1   :  { %v545_v48 = vadd.f32 %v544_v38, %v543_v29  ;;  %v592_v49 = vadd.f32 %v591_v37, %v590_v28 }
  0xa2   :  { %v470_v31 = vpop.xlane.xlu1 %469  ;;  %v610_v32 = vpop.xlane.xlu0 %609  ;;  %v534_v46 = vadd.f32 %v533_v33, %v532_v27 }
  0xa3   :  { %v471_v34 = vrot.slane %v470_v31, 4  ;;  %v599_v35 = vpop.xlane.xlu2 %598  ;;  %v611_v36 = vrot.slane %v610_v32, 4  ;;  %v546_v62 = vrot.slane %v545_v48, 1  ;;  %v593_v63 = vrot.slane %v592_v49, 1 }
  0xa4   :  { %v600_v39 = vrot.slane %v599_v35, 4  ;;  %v535_v60 = vrot.slane %v534_v46, 1 }
  0xa5   :  { %v472_v40 = vadd.f32 %v471_v34, %v470_v31  ;;  %v612_v41 = vadd.f32 %v611_v36, %v610_v32  ;;  %v547_v13 = vadd.f32 %v546_v62, %v545_v48  ;;  %v594_v14 = vadd.f32 %v593_v63, %v592_v49 }
  0xa6   :  { %v601_v42 = vadd.f32 %v600_v39, %v599_v35  ;;  %v536_v11 = vadd.f32 %v535_v60, %v534_v46  ;;  %v1937_v60 = vstv %s416_s24 }
  0xa7   :  { %v473_v44 = vrot.slane %v472_v40, 2  ;;  %v613_v45 = vrot.slane %v612_v41, 2  ;;  %1631 = vrcp.f32 %v1937_v60  ;;  %vm434_vm0 = vweird.f32 %v1937_v60 }
  0xa8   :  { %v602_v47 = vrot.slane %v601_v42, 2 }
  0xa9   :  { %v474_v50 = vadd.f32 %v473_v44, %v472_v40  ;;  %v614_v51 = vadd.f32 %v613_v45, %v612_v41 }
  0xaa   :  { %v657_v52 = vpop.xlane.xlu1 %656  ;;  %v679_v53 = vpop.xlane.xlu0 %678  ;;  %v603_v55 = vadd.f32 %v602_v47, %v601_v42 }
  0xab   :  { %v658_v56 = vrot.slane %v657_v52, 4  ;;  %v668_v57 = vpop.xlane.xlu2 %667  ;;  %v680_v58 = vrot.slane %v679_v53, 4  ;;  %v475_v59 = vrot.slane %v474_v50, 1  ;;  %v615_v4 = vrot.slane %v614_v51, 1 }
  0xac   :  { %v669_v61 = vrot.slane %v668_v57, 4  ;;  %v604_v0 = vrot.slane %v603_v55, 1 }
  0xad   :  { %v659_v1 = vadd.f32 %v658_v56, %v657_v52  ;;  %v681_v2 = vadd.f32 %v680_v58, %v679_v53  ;;  %v476_v3 = vadd.f32 %v475_v59, %v474_v50  ;;  %v616_v16 = vadd.f32 %v615_v4, %v614_v51 }
  0xae   :  { %v670_v5 = vadd.f32 %v669_v61, %v668_v57  ;;  %v605_v9 = vadd.f32 %v604_v0, %v603_v55 }
  0xaf   :  { %v660_v7 = vrot.slane %v659_v1, 2  ;;  %v682_v10 = vrot.slane %v681_v2, 2  ;;  %1541 = vpush %v476_v3 }
  0xb0   :  { %v671_v12 = vrot.slane %v670_v5, 2  ;;  %1543 = vpush %v525_v6 }
  0xb1   :  { %1545 = vpush %v536_v11  ;;  %v661_v8 = vadd.f32 %v660_v7, %v659_v1  ;;  %v683_v17 = vadd.f32 %v682_v10, %v681_v2 }
  0xb2   :  { %1547 = vpush %v547_v13  ;;  %v726_v18 = vpop.xlane.xlu1 %725  ;;  %v748_v19 = vpop.xlane.xlu0 %747  ;;  %v672_v20 = vadd.f32 %v671_v12, %v670_v5 }
  0xb3   :  { %1549 = vpush %v594_v14  ;;  %v727_v21 = vrot.slane %v726_v18, 4  ;;  %v737_v22 = vpop.xlane.xlu2 %736  ;;  %v749_v23 = vrot.slane %v748_v19, 4  ;;  %v662_v24 = vrot.slane %v661_v8, 1  ;;  %v684_v25 = vrot.slane %v683_v17, 1 }
  0xb4   :  { %1551 = vpush %v605_v9  ;;  %v738_v26 = vrot.slane %v737_v22, 4  ;;  %v673_v27 = vrot.slane %v672_v20, 1 }
  0xb5   :  { %1553 = vpush %v616_v16  ;;  %v728_v28 = vadd.f32 %v727_v21, %v726_v18  ;;  %v750_v29 = vadd.f32 %v749_v23, %v748_v19  ;;  %v663_v30 = vadd.f32 %v662_v24, %v661_v8  ;;  %v685_v31 = vadd.f32 %v684_v25, %v683_v17  ;;  %v1940_v19 = vpop.eup %1631 }
  0xb6   :  { %v739_v32 = vadd.f32 %v738_v26, %v737_v22  ;;  %v674_v33 = vadd.f32 %v673_v27, %v672_v20  ;;  %vm435_vm1 = vweird.f32 %v1940_v19 }
  0xb7   :  { %v729_v34 = vrot.slane %v728_v28, 2  ;;  %v751_v35 = vrot.slane %v750_v29, 2  ;;  %1555 = vpush %v663_v30  ;;  %vm1960_vm2 = vmor %vm434_vm0, %vm435_vm1 }
  0xb8   :  { %v740_v36 = vrot.slane %v739_v32, 2  ;;  %1557 = vpush %v674_v33  ;;  %v430_v33 = vmul.f32 %v1940_v19, %v1937_v60 }
  0xb9   :  { %1559 = vpush %v685_v31  ;;  %v730_v37 = vadd.f32 %v729_v34, %v728_v28  ;;  %v752_v38 = vadd.f32 %v751_v35, %v750_v29 }
  0xba   :  { %v795_v39 = vpop.xlane.xlu1 %794  ;;  %v817_v40 = vpop.xlane.xlu0 %816  ;;  %v741_v41 = vadd.f32 %v740_v36, %v739_v32 }
  0xbb   :  { %v796_v42 = vrot.slane %v795_v39, 4  ;;  %v806_v43 = vpop.xlane.xlu2 %805  ;;  %v818_v44 = vrot.slane %v817_v40, 4  ;;  %v731_v45 = vrot.slane %v730_v37, 1  ;;  %v753_v46 = vrot.slane %v752_v38, 1 }
  0xbc   :  { %v807_v47 = vrot.slane %v806_v43, 4  ;;  %v742_v48 = vrot.slane %v741_v41, 1 }
  0xbd   :  { %v797_v49 = vadd.f32 %v796_v42, %v795_v39  ;;  %v819_v50 = vadd.f32 %v818_v44, %v817_v40  ;;  %v732_v51 = vadd.f32 %v731_v45, %v730_v37  ;;  %v754_v52 = vadd.f32 %v753_v46, %v752_v38 }
  0xbe   :  { %v808_v53 = vadd.f32 %v807_v47, %v806_v43  ;;  %v743_v54 = vadd.f32 %v742_v48, %v741_v41  ;;  %v431_v42 = vsub.f32 1.0, %v430_v33 }
  0xbf   :  { %v798_v55 = vrot.slane %v797_v49, 2  ;;  %v820_v56 = vrot.slane %v819_v50, 2  ;;  %1561 = vpush %v732_v51 }
  0xc0   :  { %v809_v57 = vrot.slane %v808_v53, 2  ;;  %1563 = vpush %v743_v54 }
  0xc1   :  { %1565 = vpush %v754_v52  ;;  %v799_v58 = vadd.f32 %v798_v55, %v797_v49  ;;  %v821_v59 = vadd.f32 %v820_v56, %v819_v50  ;;  %v432_v55 = vmul.f32 %v1940_v19, %v431_v42 }
  0xc2   :  { %v864_v61 = vpop.xlane.xlu1 %863  ;;  %v886_v62 = vpop.xlane.xlu0 %885  ;;  %v810_v63 = vadd.f32 %v809_v57, %v808_v53 }
  0xc3   :  { %v865_v0 = vrot.slane %v864_v61, 4  ;;  %v875_v1 = vpop.xlane.xlu2 %874  ;;  %v887_v2 = vrot.slane %v886_v62, 4  ;;  %v800_v3 = vrot.slane %v799_v58, 1  ;;  %v822_v4 = vrot.slane %v821_v59, 1 }
  0xc4   :  { %v876_v5 = vrot.slane %v875_v1, 4  ;;  %v811_v6 = vrot.slane %v810_v63, 1 }
  0xc5   :  { %v866_v7 = vadd.f32 %v865_v0, %v864_v61  ;;  %v888_v10 = vadd.f32 %v887_v2, %v886_v62  ;;  %v801_v11 = vadd.f32 %v800_v3, %v799_v58  ;;  %v823_v12 = vadd.f32 %v822_v4, %v821_v59 }
  0xc6   :  { %v877_v13 = vadd.f32 %v876_v5, %v875_v1  ;;  %v812_v9 = vadd.f32 %v811_v6, %v810_v63  ;;  %s1944_s0 = spop %1535  ;;  %v438_v3 = vand.u32 2147483647, %v1937_v60  ;;  %v440_v4 = vand.u32 2147483648, %v1937_v60 }
  0xc7   :  { %v867_v14 = vrot.slane %v866_v7, 2  ;;  %v889_v16 = vrot.slane %v888_v10, 2  ;;  %1567 = vpush %v801_v11  ;;  %v433_v6 = vadd.f32 %v1940_v19, %v432_v55 }
  0xc8   :  { %v878_v8 = vrot.slane %v877_v13, 2  ;;  %1569 = vpush %v812_v9  ;;  %v441_v9 = vor.u32 1.1754944e-38, %v440_v4  ;;  %vm439_vm3 = vcmp.eq.f32.partialorder %v438_v3, 8.507059e+37 }
  0xc9   :  { %1571 = vpush %v823_v12  ;;  %v868_v17 = vadd.f32 %v867_v14, %v866_v7  ;;  %v890_v18 = vadd.f32 %v889_v16, %v888_v10 }
  0xca   :  { %v933_v20 = vpop.xlane.xlu1 %932  ;;  %v955_v21 = vpop.xlane.xlu0 %954  ;;  %v879_v22 = vadd.f32 %v878_v8, %v877_v13  ;;  %v437_v8 = vsel %vm1960_vm2, %v1940_v19, %v433_v6 }
  0xcb   :  { %v934_v23 = vrot.slane %v933_v20, 4  ;;  %v944_v24 = vpop.xlane.xlu2 %943  ;;  %v956_v25 = vrot.slane %v955_v21, 4  ;;  %v869_v26 = vrot.slane %v868_v17, 1  ;;  %v891_v27 = vrot.slane %v890_v18, 1 }
  0xcc   :  { %v945_v28 = vrot.slane %v944_v24, 4  ;;  %v880_v29 = vrot.slane %v879_v22, 1 }
  0xcd   :  { %v935_v30 = vadd.f32 %v934_v23, %v933_v20  ;;  %v957_v31 = vadd.f32 %v956_v25, %v955_v21  ;;  %v870_v32 = vadd.f32 %v869_v26, %v868_v17  ;;  %v892_v36 = vadd.f32 %v891_v27, %v890_v18 }
  0xce   :  { %v946_v34 = vadd.f32 %v945_v28, %v944_v24  ;;  %v881_v35 = vadd.f32 %v880_v29, %v879_v22  ;;  %v427_v23 = vstv %s1944_s0  ;;  %v442_v24 = vsel %vm439_vm3, %v441_v9, %v437_v8 }
  0xcf   :  { %v936_v37 = vrot.slane %v935_v30, 2  ;;  %v958_v38 = vrot.slane %v957_v31, 2  ;;  %1573 = vpush %v870_v32  ;;  %v443_v29 = vmul.f32 %v442_v24, %v427_v23 }
  0xd0   :  { %v947_v39 = vrot.slane %v946_v34, 2  ;;  %1575 = vpush %v881_v35  ;;  %s1946_s25 = spop %1537 }
  0xd1   :  { %1577 = vpush %v892_v36  ;;  %v937_v40 = vadd.f32 %v936_v37, %v935_v30  ;;  %v959_v41 = vadd.f32 %v958_v38, %v957_v31  ;;  %v456_v51 = vstv %s1946_s25  ;;  %s1971_s26 = spop %1539  ;;  %v1979_v35 = vmul.f32 2.0, %v443_v29 }
  0xd2   :  { %v1002_v43 = vpop.xlane.xlu1 %1001  ;;  %v1024_v44 = vpop.xlane.xlu0 %1023  ;;  %v948_v45 = vadd.f32 %v947_v39, %v946_v34  ;;  %v1952_v58 = vmax.f32 %v456_v51, 1.0  ;;  %v1982_v39 = vadd.f32 0.5, %v443_v29  ;;  %v467_v11 = vstv %s1971_s26 }
  0xd3   :  { %v1003_v46 = vrot.slane %v1002_v43, 4  ;;  %v1013_v47 = vpop.xlane.xlu2 %1012  ;;  %v1025_v48 = vrot.slane %v1024_v44, 4  ;;  %v938_v49 = vrot.slane %v937_v40, 1  ;;  %v960_v50 = vrot.slane %v959_v41, 1 }
  0xd4   :  { %v1014_v53 = vrot.slane %v1013_v47, 4  ;;  %v949_v57 = vrot.slane %v948_v45, 1  ;;  %1633 = vrcp.f32 %v1952_v58  ;;  %vm500_vm5 = vweird.f32 %v1952_v58 }
  0xd5   :  { %v1004_v52 = vadd.f32 %v1003_v46, %v1002_v43  ;;  %v1026_v54 = vadd.f32 %v1025_v48, %v1024_v44  ;;  %v939_v56 = vadd.f32 %v938_v49, %v937_v40  ;;  %v961_v62 = vadd.f32 %v960_v50, %v959_v41 }
  0xd6   :  { %v1015_v61 = vadd.f32 %v1014_v53, %v1013_v47  ;;  %v950_v0 = vadd.f32 %v949_v57, %v948_v45  ;;  %1635 = vlog2.f32 %v1952_v58  ;;  %v504_v55 = vand.u32 2147483647, %v1952_v58 }
  0xd7   :  { %v1005_v59 = vrot.slane %v1004_v52, 2  ;;  %v1027_v63 = vrot.slane %v1026_v54, 2  ;;  %1579 = vpush %v939_v56  ;;  %vm486_vm8 = vcmp.eq.f32.partialorder %v1979_v35, 0.0  ;;  %vm2028_vm9 = vcmp.gt.f32.partialorder %v456_v51, 0.0 }
  0xd8   :  { %v1016_v1 = vrot.slane %v1015_v61, 2  ;;  %1581 = vpush %v950_v0  ;;  %vm505_vm7 = vcmp.eq.f32.partialorder %v504_v55, 8.507059e+37 }
  0xd9   :  { %v1006_v2 = vadd.f32 %v1005_v59, %v1004_v52  ;;  %1583 = vpush %v961_v62  ;;  %v1028_v13 = vadd.f32 %v1027_v63, %v1026_v54  ;;  %v506_v52 = vand.u32 2147483648, %v1952_v58 }
  0xda   :  { %v1071_v5 = vpop.xlane.xlu1 %1070  ;;  %v1017_v12 = vadd.f32 %v1016_v1, %v1015_v61  ;;  %v1093_v60 = vpop.xlane.xlu0 %1092 }
  0xdb   :  { %v1072_v7 = vrot.slane %v1071_v5, 4  ;;  %v1007_v10 = vrot.slane %v1006_v2, 1  ;;  %v1029_v20 = vrot.slane %v1028_v13, 1  ;;  %v1968_v21 = vpop.eup %1633  ;;  %v1094_v22 = vrot.slane %v1093_v60, 4  ;;  %v1082_v25 = vpop.xlane.xlu2 %1081 }
  0xdc   :  { %v1018_v16 = vrot.slane %v1017_v12, 1  ;;  %v1636_v28 = vpop.eup %1635  ;;  %v496_v19 = vmul.f32 %v1968_v21, %v1952_v58  ;;  %v1083_v30 = vrot.slane %v1082_v25, 4  ;;  %vm501_vm4 = vweird.f32 %v1968_v21 }
  0xdd   :  { %v1008_v14 = vadd.f32 %v1007_v10, %v1006_v2  ;;  %v1073_v17 = vadd.f32 %v1072_v7, %v1071_v5  ;;  %v1030_v26 = vadd.f32 %v1029_v20, %v1028_v13  ;;  %v1095_v31 = vadd.f32 %v1094_v22, %v1093_v60  ;;  %vm502_vm6 = vmor %vm500_vm5, %vm501_vm4 }
  0xde   :  { %v1019_v18 = vadd.f32 %v1018_v16, %v1017_v12  ;;  %v482_v32 = vmul.f32 0.6931472, %v1636_v28  ;;  %v497_v34 = vsub.f32 1.0, %v496_v19  ;;  %v1084_v36 = vadd.f32 %v1083_v30, %v1082_v25 }
  0xdf   :  { %1585 = vpush %v1008_v14  ;;  %v1074_v27 = vrot.slane %v1073_v17, 2  ;;  %v1096_v37 = vrot.slane %v1095_v31, 2  ;;  %v507_v62 = vor.u32 1.1754944e-38, %v506_v52 }
  0xe0   :  { %1587 = vpush %v1019_v18  ;;  %s1975_s27 = spop %1541  ;;  %v483_v40 = vmul.f32 %v482_v32, %v1979_v35  ;;  %v489_v42 = vmul.f32 %v482_v32, %v1982_v39  ;;  %v498_v43 = vmul.f32 %v1968_v21, %v497_v34  ;;  %v1085_v45 = vrot.slane %v1084_v36, 2 }
  0xe1   :  { %1589 = vpush %v1030_v26  ;;  %s1977_s28 = spop %1543  ;;  %v1075_v33 = vadd.f32 %v1074_v27, %v1073_v17  ;;  %v1097_v46 = vadd.f32 %v1096_v37, %v1095_v31  ;;  %v478_v12 = vstv %s1975_s27 }
  0xe2   :  { %v527_v38 = vstv %s1977_s28  ;;  %s1985_s29 = spop %1545  ;;  %v484_v47 = vmul.f32 1.442695, %v483_v40  ;;  %v490_v49 = vmul.f32 1.442695, %v489_v42  ;;  %v499_v50 = vadd.f32 %v1968_v21, %v498_v43  ;;  %v1140_v59 = vpop.xlane.xlu1 %1139  ;;  %v1162_v6 = vpop.xlane.xlu0 %1161 }
  0xe3   :  { %v1076_v41 = vrot.slane %v1075_v33, 1  ;;  %v1991_v44 = vmax.f32 %v527_v38, 1.0  ;;  %s1993_s30 = spop %1547  ;;  %v1086_v53 = vadd.f32 %v1085_v45, %v1084_v36  ;;  %v1098_v54 = vrot.slane %v1097_v46, 1  ;;  %v1151_v0 = vpop.xlane.xlu2 %1150 }
  0xe4   :  { %s1995_s4 = spop %1549  ;;  %v503_v57 = vsel %vm502_vm6, %v1968_v21, %v499_v50  ;;  %v1141_v5 = vrot.slane %v1140_v59, 4  ;;  %v1152_v7 = vrot.slane %v1151_v0, 4  ;;  %v1163_v16 = vrot.slane %v1162_v6, 4 }
  0xe5   :  { %v1077_v48 = vadd.f32 %v1076_v41, %v1075_v33  ;;  %1637 = vlog2.f32 %v1991_v44  ;;  %v596_v56 = vstv %s1995_s4  ;;  %v1087_v61 = vrot.slane %v1086_v53, 1  ;;  %s2010_s5 = spop %1551 }
  0xe6   :  { %1639 = vrcp.f32 %v1991_v44  ;;  %v2008_v63 = vmax.f32 %v596_v56, 1.0  ;;  %v1099_v1 = vadd.f32 %v1098_v54, %v1097_v46  ;;  %v508_v4 = vsel %vm505_vm7, %v507_v62, %v503_v57  ;;  %s2014_s6 = spop %1553 }
  0xe7   :  { %1591 = vpush %v1077_v48  ;;  %1641 = vpow2.f32 %v484_v47  ;;  %v1088_v58 = vadd.f32 %v1087_v61, %v1086_v53  ;;  %v509_v9 = vmul.f32 %v508_v4, %v467_v11  ;;  %v510_v8 = vmul.f32 %v508_v4, %v478_v12 }
  0xe8   :  { %1643 = vpow2.f32 %v490_v49  ;;  %s2016_s7 = spop %1555  ;;  %v1142_v17 = vadd.f32 %v1141_v5, %v1140_v59  ;;  %v2033_v21 = vsel %vm486_vm8, 1.0, %v1835_v15  ;;  %v1153_v22 = vadd.f32 %v1152_v7, %v1151_v0 }
  0xe9   :  { %1593 = vpush %v1088_v58  ;;  %1645 = vrcp.f32 %v2008_v63  ;;  %v665_v18 = vstv %s2016_s7  ;;  %v575_v25 = vand.u32 2147483648, %v1991_v44  ;;  %v538_v27 = vstv %s1985_s29  ;;  %s2068_s8 = spop %1557 }
  0xea   :  { %1595 = vpush %v1099_v1  ;;  %1647 = vlog2.f32 %v2008_v63  ;;  %v2045_v28 = vmax.f32 %v665_v18, 1.0  ;;  %v1209_v15 = vpop.xlane.xlu1 %1208  ;;  %v511_v29 = vsub.f32 %v509_v9, %v510_v8  ;;  %v549_v30 = vstv %s1993_s30  ;;  %v1231_v62 = vpop.xlane.xlu0 %1230  ;;  %s2073_s9 = spop %1559 }
  0xeb   :  { %v1638_v2 = vpop.eup %1637  ;;  %v1143_v31 = vrot.slane %v1142_v17, 2  ;;  %v1164_v32 = vadd.f32 %v1163_v16, %v1162_v6  ;;  %vm569_vm10 = vweird.f32 %v1991_v44  ;;  %v573_v36 = vand.u32 2147483647, %v1991_v44  ;;  %v1220_v53 = vpop.xlane.xlu2 %1219 }
  0xec   :  { %v2012_v3 = vpop.eup %1639  ;;  %v553_v60 = vmul.f32 0.6931472, %v1638_v2  ;;  %v1154_v37 = vrot.slane %v1153_v22, 2  ;;  %v2053_v41 = vor.u32 1.1754944e-38, %v575_v25  ;;  %v607_v42 = vstv %s2010_s5 }
  0xed   :  { %v1642_v10 = vpop.eup %1641  ;;  %v565_v14 = vmul.f32 %v2012_v3, %v1991_v44  ;;  %v618_v43 = vstv %s2014_s6  ;;  %v1210_v45 = vrot.slane %v1209_v15, 4  ;;  %1649 = vrcp.f32 %v2045_v28 }
  0xee   :  { %v1644_v13 = vpop.eup %1643  ;;  %v488_v23 = vsel %vm2028_vm9, %v1642_v10, %v2033_v21  ;;  %v554_v26 = vmul.f32 %v553_v60, %v1979_v35  ;;  %v558_v34 = vmul.f32 %v553_v60, %v1982_v39  ;;  %v512_v49 = vand.u32 2147483647, %v511_v29 }
  0xef   :  { %v492_v24 = vsel %vm2028_vm9, %v1644_v13, 0.0  ;;  %v566_v51 = vsub.f32 1.0, %v565_v14  ;;  %v2047_v19 = vpop.eup %1645  ;;  %v644_v50 = vand.u32 2147483648, %v2008_v63  ;;  %v1165_v52 = vrot.slane %v1164_v32, 2 }
  0xf0   :  { %v493_v33 = vadd.f32 %v492_v24, %v488_v23  ;;  %v1648_v40 = vpop.eup %1647  ;;  %v555_v46 = vmul.f32 1.442695, %v554_v26  ;;  %v634_v48 = vmul.f32 %v2047_v19, %v2008_v63  ;;  %v1144_v54 = vadd.f32 %v1143_v31, %v1142_v17  ;;  %s2075_s10 = spop %1561 }
  0xf1   :  { %v567_v47 = vmul.f32 %v2012_v3, %v566_v51  ;;  %v559_v57 = vmul.f32 1.442695, %v558_v34  ;;  %vm2064_vm11 = vcmp.eq.f32.partialorder %v573_v36, 8.507059e+37  ;;  %v622_v61 = vmul.f32 0.6931472, %v1648_v40  ;;  %s2127_s11 = spop %1563 }
  0xf2   :  { %v2062_v55 = vmul.f32 0.5, %v493_v33  ;;  %v1155_v0 = vadd.f32 %v1154_v37, %v1153_v22  ;;  %vm570_vm12 = vweird.f32 %v2012_v3  ;;  %1651 = vlog2.f32 %v2045_v28  ;;  %v1278_v26 = vpop.xlane.xlu1 %1277  ;;  %s2151_s12 = spop %1565 }
  0xf3   :  { %v1211_v1 = vadd.f32 %v1210_v45, %v1209_v15  ;;  %v1145_v2 = vrot.slane %v1144_v54, 1  ;;  %1653 = vpow2.f32 %v555_v46  ;;  %v568_v58 = vadd.f32 %v2012_v3, %v567_v47  ;;  %v2077_v12 = vpop.eup %1649  ;;  %vm2095_vm15 = vmor %vm569_vm10, %vm570_vm12 }
  0xf4   :  { %v635_v4 = vsub.f32 1.0, %v634_v48  ;;  %v1221_v5 = vrot.slane %v1220_v53, 4  ;;  %v1232_v6 = vrot.slane %v1231_v62, 4  ;;  %v1156_v10 = vrot.slane %v1155_v0, 1 }
  0xf5   :  { %v1146_v7 = vadd.f32 %v1145_v2, %v1144_v54  ;;  %v1166_v11 = vadd.f32 %v1165_v52, %v1164_v32  ;;  %v2080_v13 = vmul.f32 %v512_v49, %v2062_v55  ;;  %vm2084_vm13 = vcmp.gt.f32.partialorder %v527_v38, 0.0 }
  0xf6   :  { %1655 = vpow2.f32 %v559_v57  ;;  %v623_v60 = vmul.f32 %v622_v61, %v1979_v35  ;;  %vm638_vm14 = vweird.f32 %v2008_v63  ;;  %v642_v14 = vand.u32 2147483647, %v2008_v63 }
  0xf7   :  { %v2099_v8 = vor.u32 1.1754944e-38, %v644_v50  ;;  %v1212_v38 = vrot.slane %v1211_v1, 2  ;;  %1597 = vpush %v1146_v7  ;;  %v1157_v17 = vadd.f32 %v1156_v10, %v1155_v0  ;;  %v1167_v22 = vrot.slane %v1166_v11, 1 }
  0xf8   :  { %v572_v23 = vsel %vm2095_vm15, %v2012_v3, %v568_v58  ;;  %v627_v24 = vmul.f32 %v622_v61, %v1982_v39  ;;  %v636_v44 = vmul.f32 %v2047_v19, %v635_v4  ;;  %v734_v25 = vstv %s2075_s10  ;;  %v1652_v51 = vpop.eup %1651  ;;  %v1300_v4 = vpop.xlane.xlu0 %1299  ;;  %s2158_s13 = spop %1567 }
  0xf9   :  { %v703_v15 = vmul.f32 %v2077_v12, %v2045_v28  ;;  %v1222_v29 = vadd.f32 %v1221_v5, %v1220_v53  ;;  %v1233_v31 = vadd.f32 %v1232_v6, %v1231_v62  ;;  %1599 = vpush %v1157_v17  ;;  %v1168_v32 = vadd.f32 %v1167_v22, %v1166_v11  ;;  %v1654_v33 = vpop.eup %1653  ;;  %s2218_s14 = spop %1569 }
  0xfa   :  { %v514_v3 = vsel %vm2028_vm9, %v2080_v13, 0.0  ;;  %v624_v34 = vmul.f32 1.442695, %v623_v60  ;;  %v676_v36 = vstv %s2068_s8  ;;  %v687_v37 = vstv %s2073_s9  ;;  %s2227_s15 = spop %1571 }
  0xfb   :  { %v577_v40 = vsel %vm2064_vm11, %v2053_v41, %v572_v23  ;;  %vm2117_vm0 = vcmp.eq.f32.partialorder %v642_v14, 8.507059e+37  ;;  %v2123_v46 = vmax.f32 %v734_v25, 1.0  ;;  %1601 = vpush %v1168_v32  ;;  %v1279_v47 = vrot.slane %v1278_v26, 4 }
  0xfc   :  { %v1213_v48 = vadd.f32 %v1212_v38, %v1211_v1  ;;  %v1656_v49 = vpop.eup %1655  ;;  %v628_v50 = vmul.f32 1.442695, %v627_v24  ;;  %v637_v52 = vadd.f32 %v2047_v19, %v636_v44  ;;  %vm639_vm1 = vweird.f32 %v2047_v19  ;;  %v1289_v1 = vpop.xlane.xlu2 %1288 }
  0xfd   :  { %v691_v53 = vmul.f32 0.6931472, %v1652_v51  ;;  %v704_v41 = vsub.f32 1.0, %v703_v15  ;;  %v1223_v54 = vrot.slane %v1222_v29, 2  ;;  %v1234_v57 = vrot.slane %v1233_v31, 2  ;;  %vm2145_vm2 = vmor %vm638_vm14, %vm639_vm1 }
  0xfe   :  { %v1214_v59 = vrot.slane %v1213_v48, 1  ;;  %v2131_v61 = vmul.f32 %v577_v40, %v538_v27  ;;  %v2135_v62 = vmul.f32 %v577_v40, %v549_v30  ;;  %1657 = vpow2.f32 %v624_v34  ;;  %v1347_v34 = vpop.xlane.xlu1 %1346 }
  0xff   :  { %v711_v0 = vand.u32 2147483647, %v2045_v28  ;;  %v557_v2 = vsel %vm2084_vm13, %v1654_v33, %v2033_v21  ;;  %v561_v58 = vsel %vm2084_vm13, %v1656_v49, 0.0  ;;  %vm707_vm3 = vweird.f32 %v2045_v28 }
 0x100   :  { %1659 = vrcp.f32 %v2123_v46  ;;  %v1280_v30 = vadd.f32 %v1279_v47, %v1278_v26  ;;  %v641_v5 = vsel %vm2145_vm2, %v2047_v19, %v637_v52  ;;  %v692_v6 = vmul.f32 %v691_v53, %v1979_v35  ;;  %s2233_s16 = spop %1573 }
 0x101   :  { %v696_v63 = vmul.f32 %v691_v53, %v1982_v39  ;;  %v1215_v7 = vadd.f32 %v1214_v59, %v1213_v48  ;;  %v705_v10 = vmul.f32 %v2077_v12, %v704_v41  ;;  %1661 = vlog2.f32 %v2123_v46  ;;  %s2249_s17 = spop %1575 }
 0x102   :  { %v1224_v11 = vadd.f32 %v1223_v54, %v1222_v29  ;;  %v1235_v60 = vadd.f32 %v1234_v57, %v1233_v31  ;;  %vm2164_vm4 = vcmp.gt.f32.partialorder %v596_v56, 0.0  ;;  %1663 = vpow2.f32 %v628_v50  ;;  %s2260_s18 = spop %1577 }
 0x103   :  { %v713_v19 = vand.u32 2147483648, %v2045_v28  ;;  %v1290_v16 = vrot.slane %v1289_v1, 4  ;;  %v1301_v38 = vrot.slane %v1300_v4, 4  ;;  %1603 = vpush %v1215_v7  ;;  %v1281_v17 = vrot.slane %v1280_v30, 2 }
 0x104   :  { %v803_v22 = vstv %s2158_s13  ;;  %v1225_v23 = vrot.slane %v1224_v11, 1  ;;  %v1236_v24 = vrot.slane %v1235_v60, 1  ;;  %v1658_v44 = vpop.eup %1657  ;;  %v562_v26 = vadd.f32 %v561_v58, %v557_v2  ;;  %v1369_v58 = vpop.xlane.xlu0 %1368  ;;  %s1836_s13 = smov [#allocation13]  }
 0x105   :  { %v646_v56 = vsel %vm2117_vm0, %v2099_v8, %v641_v5  ;;  %v693_v51 = vmul.f32 1.442695, %v692_v6  ;;  %vm708_vm5 = vweird.f32 %v2077_v12  ;;  %v697_v29 = vmul.f32 1.442695, %v696_v63 }
 0x106   :  { %v2174_v15 = vpop.eup %1659  ;;  %v706_v31 = vadd.f32 %v2077_v12, %v705_v10  ;;  %v1226_v32 = vadd.f32 %v1225_v23, %v1224_v11  ;;  %v1237_v33 = vadd.f32 %v1236_v24, %v1235_v60  ;;  %v580_v40 = vsub.f32 %v2131_v61, %v2135_v62  ;;  %vm2201_vm8 = vmor %vm707_vm3, %vm708_vm5  ;;  %v1358_v61 = vpop.xlane.xlu2 %1357 }
 0x107   :  { %v1291_v47 = vadd.f32 %v1290_v16, %v1289_v1  ;;  %v1302_v48 = vadd.f32 %v1301_v38, %v1300_v4  ;;  %v2181_v45 = vmax.f32 %v803_v22, 1.0  ;;  %v1662_v8 = vpop.eup %1661  ;;  %v647_v49 = vmul.f32 %v646_v56, %v607_v42 }
 0x108   :  { %v648_v50 = vmul.f32 %v646_v56, %v618_v43  ;;  %vm2187_vm6 = vcmp.eq.f32.partialorder %v711_v0, 8.507059e+37  ;;  %1605 = vpush %v1226_v32  ;;  %v1282_v53 = vadd.f32 %v1281_v17, %v1280_v30  ;;  %v1664_v41 = vpop.eup %1663  ;;  %vm2193_vm7 = vcmp.gt.f32.partialorder %v665_v18, 0.0  ;;  %s2269_s19 = spop %1579 }
 0x109   :  { %1665 = vpow2.f32 %v693_v51  ;;  %v714_v43 = vor.u32 1.1754944e-38, %v713_v19  ;;  %v772_v57 = vmul.f32 %v2174_v15, %v2123_v46  ;;  %1607 = vpush %v1237_v33  ;;  %v1348_v59 = vrot.slane %v1347_v34, 4  ;;  %s2317_s20 = spop %1581 }
 0x10a   :  { %v563_v18 = vmul.f32 0.5, %v562_v26  ;;  %1667 = vpow2.f32 %v697_v29  ;;  %v710_v62 = vsel %vm2201_vm8, %v2077_v12, %v706_v31  ;;  %v1283_v0 = vrot.slane %v1282_v53, 1  ;;  %s2328_s21 = spop %1583 }
 0x10b   :  { %v760_v1 = vmul.f32 0.6931472, %v1662_v8  ;;  %v1292_v28 = vrot.slane %v1291_v47, 2  ;;  %v1303_v2 = vrot.slane %v1302_v48, 2  ;;  %1669 = vlog2.f32 %v2181_v45 }
 0x10c   :  { %v581_v27 = vand.u32 2147483647, %v580_v40  ;;  %v626_v30 = vsel %vm2164_vm4, %v1658_v44, %v2033_v21  ;;  %v649_v4 = vsub.f32 %v647_v49, %v648_v50  ;;  %v1359_v5 = vrot.slane %v1358_v61, 4 }
 0x10d   :  { %v630_v6 = vsel %vm2164_vm4, %v1664_v41, 0.0  ;;  %v715_v12 = vsel %vm2187_vm6, %v714_v43, %v710_v62  ;;  %v773_v63 = vsub.f32 1.0, %v772_v57  ;;  %v1349_v7 = vadd.f32 %v1348_v59, %v1347_v34 }
 0x10e   :  { %v2221_v10 = vadd.f32 %v563_v18, %v2062_v55  ;;  %1671 = vrcp.f32 %v2181_v45  ;;  %v1370_v11 = vrot.slane %v1369_v58, 4  ;;  %v1284_v60 = vadd.f32 %v1283_v0, %v1282_v53 }
 0x10f   :  { %v1666_v19 = vpop.eup %1665  ;;  %v2224_v16 = vmul.f32 %v581_v27, %v563_v18  ;;  %v761_v38 = vmul.f32 %v760_v1, %v1979_v35  ;;  %v1293_v17 = vadd.f32 %v1292_v28, %v1291_v47  ;;  %v1304_v23 = vadd.f32 %v1303_v2, %v1302_v48  ;;  %v1416_v48 = vpop.xlane.xlu1 %1415 }
 0x110   :  { %v1668_v24 = vpop.eup %1667  ;;  %v631_v44 = vadd.f32 %v630_v6, %v626_v30  ;;  %v2229_v26 = vand.u32 2147483647, %v649_v4  ;;  %v716_v55 = vmul.f32 %v715_v12, %v676_v36  ;;  %v1360_v56 = vadd.f32 %v1359_v5, %v1358_v61  ;;  %1609 = vpush %v1284_v60  ;;  %s2333_s1 = spop %1585 }
 0x111   :  { %v1670_v51 = vpop.eup %1669  ;;  %v717_v29 = vmul.f32 %v715_v12, %v687_v37  ;;  %v765_v31 = vmul.f32 %v760_v1, %v1982_v39  ;;  %v774_v32 = vmul.f32 %v2174_v15, %v773_v63  ;;  %v1350_v33 = vrot.slane %v1349_v7, 2  ;;  %s2343_s22 = spop %1587 }
 0x112   :  { %v695_v34 = vsel %vm2193_vm7, %v1666_v19, %v2033_v21  ;;  %v1371_v40 = vadd.f32 %v1370_v11, %v1369_v58  ;;  %v1294_v47 = vrot.slane %v1293_v17, 1  ;;  %v1305_v36 = vrot.slane %v1304_v23, 1  ;;  %s2351_s2 = spop %1589 }
 0x113   :  { %v699_v8 = vsel %vm2193_vm7, %v1668_v24, 0.0  ;;  %v762_v49 = vmul.f32 1.442695, %v761_v38  ;;  %vm777_vm10 = vweird.f32 %v2174_v15  ;;  %v872_v37 = vstv %s2233_s16 }
 0x114   :  { %v2246_v50 = vpop.eup %1671  ;;  %v829_v52 = vmul.f32 0.6931472, %v1670_v51  ;;  %v1361_v53 = vrot.slane %v1360_v56, 2  ;;  %v1295_v41 = vadd.f32 %v1294_v47, %v1293_v17  ;;  %v1306_v42 = vadd.f32 %v1305_v36, %v1304_v23 }
 0x115   :  { %v766_v43 = vmul.f32 1.442695, %v765_v31  ;;  %v775_v57 = vadd.f32 %v2174_v15, %v774_v32  ;;  %v1417_v59 = vrot.slane %v1416_v48, 4  ;;  %v1351_v61 = vadd.f32 %v1350_v33, %v1349_v7 }
 0x116   :  { %vm776_vm11 = vweird.f32 %v2123_v46  ;;  %v780_v18 = vand.u32 2147483647, %v2123_v46  ;;  %v1372_v62 = vrot.slane %v1371_v40, 2  ;;  %v2255_v0 = vmax.f32 %v872_v37, 1.0  ;;  %1611 = vpush %v1295_v41 }
 0x117   :  { %v700_v1 = vadd.f32 %v699_v8, %v695_v34  ;;  %v782_v28 = vand.u32 2147483648, %v2123_v46  ;;  %v841_v2 = vmul.f32 %v2246_v50, %v2181_v45  ;;  %1613 = vpush %v1306_v42  ;;  %v1418_v58 = vadd.f32 %v1417_v59, %v1416_v48  ;;  %vm2264_vm12 = vmor %vm776_vm11, %vm777_vm10 }
 0x118   :  { %1673 = vpow2.f32 %v762_v49  ;;  %v830_v30 = vmul.f32 %v829_v52, %v1979_v35  ;;  %v1352_v4 = vrot.slane %v1351_v61, 1  ;;  %v1362_v46 = vadd.f32 %v1361_v53, %v1360_v56  ;;  %s2359_s23 = spop %1591 }
 0x119   :  { %v718_v5 = vsub.f32 %v716_v55, %v717_v29  ;;  %1675 = vpow2.f32 %v766_v43  ;;  %v779_v6 = vsel %vm2264_vm12, %v2174_v15, %v775_v57  ;;  %v834_v12 = vmul.f32 %v829_v52, %v1982_v39 }
 0x11a   :  { %1677 = vrcp.f32 %v2255_v0  ;;  %v1419_v63 = vrot.slane %v1418_v58, 2  ;;  %v1353_v7 = vadd.f32 %v1352_v4, %v1351_v61  ;;  %v1373_v11 = vadd.f32 %v1372_v62, %v1371_v40  ;;  %s2400_s24 = spop %1593 }
 0x11b   :  { %v632_v60 = vmul.f32 0.5, %v631_v44  ;;  %v783_v19 = vor.u32 1.1754944e-38, %v782_v28  ;;  %v842_v38 = vsub.f32 1.0, %v841_v2  ;;  %v941_v17 = vstv %s2269_s19  ;;  %s2408_s0 = spop %1595 }
 0x11c   :  { %v701_v23 = vmul.f32 0.5, %v700_v1  ;;  %vm781_vm14 = vcmp.eq.f32.partialorder %v780_v18, 8.507059e+37  ;;  %v831_v24 = vmul.f32 1.442695, %v830_v30  ;;  %1615 = vpush %v1353_v7  ;;  %v1363_v55 = vrot.slane %v1362_v46, 1 }
 0x11d   :  { %v719_v56 = vand.u32 2147483647, %v718_v5  ;;  %v784_v15 = vsel %vm781_vm14, %v783_v19, %v779_v6  ;;  %v835_v51 = vmul.f32 1.442695, %v834_v12  ;;  %1679 = vlog2.f32 %v2255_v0 }
 0x11e   :  { %v1674_v29 = vpop.eup %1673  ;;  %v1420_v31 = vadd.f32 %v1419_v63, %v1418_v58  ;;  %v2280_v44 = vmax.f32 %v941_v17, 1.0  ;;  %v1364_v32 = vadd.f32 %v1363_v55, %v1362_v46  ;;  %v1374_v33 = vrot.slane %v1373_v11, 1 }
 0x11f   :  { %v1676_v34 = vpop.eup %1675  ;;  %v583_v40 = vsel %vm2084_vm13, %v2224_v16, 0.0  ;;  %v651_v47 = vmul.f32 %v2229_v26, %v632_v60  ;;  %v745_v36 = vstv %s2127_s11  ;;  %v843_v48 = vmul.f32 %v2246_v50, %v842_v38 }
 0x120   :  { %v2288_v8 = vpop.eup %1677  ;;  %v720_v49 = vmul.f32 %v719_v56, %v701_v23  ;;  %v756_v52 = vstv %s2151_s12  ;;  %1681 = vpow2.f32 %v831_v24  ;;  %1617 = vpush %v1364_v32  ;;  %v1375_v53 = vadd.f32 %v1374_v33, %v1373_v11 }
 0x121   :  { %vm2293_vm15 = vcmp.gt.f32.partialorder %v734_v25, 0.0  ;;  %v785_v42 = vmul.f32 %v784_v15, %v745_v36  ;;  %v786_v9 = vmul.f32 %v784_v15, %v756_v52  ;;  %1683 = vpow2.f32 %v835_v51 }
 0x122   :  { %v584_v16 = vadd.f32 %v583_v40, %v514_v3  ;;  %v764_v26 = vsel %vm2293_vm15, %v1674_v29, %v2033_v21  ;;  %1685 = vlog2.f32 %v2280_v44  ;;  %1619 = vpush %v1375_v53  ;;  %v1421_v43 = vrot.slane %v1420_v31, 1 }
 0x123   :  { %v1680_v25 = vpop.eup %1679  ;;  %v768_v57 = vsel %vm2293_vm15, %v1676_v34, 0.0  ;;  %v844_v59 = vadd.f32 %v2246_v50, %v843_v48  ;;  %vm846_vm13 = vweird.f32 %v2246_v50  ;;  %v910_v20 = vmul.f32 %v2288_v8, %v2255_v0 }
 0x124   :  { %v652_v13 = vsel %vm2164_vm4, %v651_v47, 0.0  ;;  %v721_v3 = vsel %vm2193_vm7, %v720_v49, 0.0  ;;  %vm845_vm9 = vweird.f32 %v2181_v45  ;;  %v851_v61 = vand.u32 2147483648, %v2181_v45  ;;  %v1438_v47 = vpop.xlane.xlu0 %1437 }
 0x125   :  { %v787_v18 = vsub.f32 %v785_v42, %v786_v9  ;;  %v849_v62 = vand.u32 2147483647, %v2181_v45  ;;  %1687 = vrcp.f32 %v2280_v44  ;;  %v1422_v1 = vadd.f32 %v1421_v43, %v1420_v31  ;;  %vm2324_vm0 = vmor %vm845_vm9, %vm846_vm13 }
 0x126   :  { %v1682_v28 = vpop.eup %1681  ;;  %v654_v14 = vadd.f32 %v632_v60, %v2221_v10  ;;  %v653_v2 = vadd.f32 %v652_v13, %v584_v16  ;;  %v769_v58 = vadd.f32 %v768_v57, %v764_v26  ;;  %v848_v27 = vsel %vm2324_vm0, %v2246_v50, %v844_v59 }
 0x127   :  { %v1684_v45 = vpop.eup %1683  ;;  %v898_v30 = vmul.f32 0.6931472, %v1680_v25  ;;  %v911_v4 = vsub.f32 1.0, %v910_v20  ;;  %1621 = vpush %v1422_v1  ;;  %vm2339_vm1 = vcmp.gt.f32.partialorder %v803_v22, 0.0  ;;  %v852_v12 = vor.u32 1.1754944e-38, %v851_v61  ;;  %v1427_v22 = vpop.xlane.xlu2 %1426 }
 0x128   :  { %v1686_v10 = vpop.eup %1685  ;;  %v723_v46 = vadd.f32 %v701_v23, %v654_v14  ;;  %v2335_v5 = vadd.f32 %v721_v3, %v653_v2  ;;  %v788_v63 = vand.u32 2147483647, %v787_v18  ;;  %v814_v50 = vstv %s2218_s14  ;;  %s2416_s25 = spop %1597  ;;  %s1505_s14 = sshll.u32 %s1836_s13, 4  ;;  %s1506_s14 = int_to_ptr.vmem [resolvable:$true] %s1505_s14 }
 0x129   :  { %vm850_vm2 = vcmp.eq.f32.partialorder %v849_v62, 8.507059e+37  ;;  %v825_v7 = vstv %s2227_s15  ;;  %v770_v11 = vmul.f32 0.5, %v769_v58  ;;  %v833_v60 = vsel %vm2339_vm1, %v1682_v28, %v2033_v21 }
 0x12a   :  { %v853_v19 = vsel %vm850_vm2, %v852_v12, %v848_v27  ;;  %v1010_v38 = vstv %s2333_s1  ;;  %v837_v24 = vsel %vm2339_vm1, %v1684_v45, 0.0  ;;  %v899_v55 = vmul.f32 %v898_v30, %v1979_v35  ;;  %s2445_s26 = spop %1599 }
 0x12b   :  { %v2353_v23 = vpop.eup %1687  ;;  %v912_v56 = vmul.f32 %v2288_v8, %v911_v4  ;;  %v967_v15 = vmul.f32 0.6931472, %v1686_v10  ;;  %v903_v51 = vmul.f32 %v898_v30, %v1982_v39  ;;  %v883_v29 = vstv %s2249_s17  ;;  %s1507_s17 = sshll.u32 %s2876_s3, 4  ;;  %s1508_s17 = int_to_ptr.hbm [resolvable:$true] %s1507_s17 }
 0x12c   :  { %vm914_vm3 = vweird.f32 %v2255_v0  ;;  %v918_v31 = vand.u32 2147483647, %v2255_v0  ;;  %v854_v32 = vmul.f32 %v853_v19, %v814_v50  ;;  %v855_v33 = vmul.f32 %v853_v19, %v825_v7  ;;  %s2465_s27 = spop %1601 }
 0x12d   :  { %v2367_v34 = vmax.f32 %v1010_v38, 1.0  ;;  %v1428_v40 = vrot.slane %v1427_v22, 4  ;;  %v789_v36 = vmul.f32 %v788_v63, %v770_v11  ;;  %v838_v48 = vadd.f32 %v837_v24, %v833_v60 }
 0x12e   :  { %v979_v49 = vmul.f32 %v2353_v23, %v2280_v44  ;;  %v1079_v52 = vstv %s2359_s23  ;;  %v900_v53 = vmul.f32 1.442695, %v899_v55  ;;  %v913_v42 = vadd.f32 %v2288_v8, %v912_v56 }
 0x12f   :  { %vm915_vm4 = vweird.f32 %v2288_v8  ;;  %v968_v9 = vmul.f32 %v967_v15, %v1979_v35  ;;  %v904_v16 = vmul.f32 1.442695, %v903_v51  ;;  %v920_v26 = vand.u32 2147483648, %v2255_v0 }
 0x130   :  { %v972_v43 = vmul.f32 %v967_v15, %v1982_v39  ;;  %v1439_v25 = vrot.slane %v1438_v47, 4  ;;  %v856_v57 = vsub.f32 %v854_v32, %v855_v33  ;;  %1689 = vrcp.f32 %v2367_v34  ;;  %vm2386_vm5 = vmor %vm914_vm3, %vm915_vm4 }
 0x131   :  { %v1429_v59 = vadd.f32 %v1428_v40, %v1427_v22  ;;  %v2380_v20 = vmax.f32 %v1079_v52, 1.0  ;;  %v792_v13 = vadd.f32 %v770_v11, %v723_v46  ;;  %v790_v3 = vsel %vm2293_vm15, %v789_v36, 0.0 }
 0x132   :  { %v980_v18 = vsub.f32 1.0, %v979_v49  ;;  %1691 = vlog2.f32 %v2367_v34  ;;  %v839_v62 = vmul.f32 0.5, %v838_v48  ;;  %v917_v1 = vsel %vm2386_vm5, %v2288_v8, %v913_v42 }
 0x133   :  { %1693 = vpow2.f32 %v900_v53  ;;  %v969_v28 = vmul.f32 1.442695, %v968_v9  ;;  %vm2396_vm6 = vcmp.gt.f32.partialorder %v872_v37, 0.0  ;;  %v921_v0 = vor.u32 1.1754944e-38, %v920_v26 }
 0x134   :  { %1695 = vpow2.f32 %v904_v16  ;;  %v973_v14 = vmul.f32 1.442695, %v972_v43  ;;  %v1440_v2 = vadd.f32 %v1439_v25, %v1438_v47  ;;  %v857_v58 = vand.u32 2147483647, %v856_v57  ;;  %s2471_s28 = spop %1603 }
 0x135   :  { %vm919_vm7 = vcmp.eq.f32.partialorder %v918_v31, 8.507059e+37  ;;  %v1430_v54 = vrot.slane %v1429_v59, 2  ;;  %1697 = vlog2.f32 %v2380_v20  ;;  %v2404_v8 = vadd.f32 %v790_v3, %v2335_v5 }
 0x136   :  { %v922_v37 = vsel %vm919_vm7, %v921_v0, %v917_v1  ;;  %v981_v45 = vmul.f32 %v2353_v23, %v980_v18  ;;  %1699 = vrcp.f32 %v2380_v20  ;;  %v2410_v27 = vpop.eup %1689  ;;  %v2412_v30 = vmul.f32 %v857_v58, %v839_v62 }
 0x137   :  { %v894_v4 = vstv %s2260_s18  ;;  %1701 = vpow2.f32 %v969_v28  ;;  %v987_v10 = vand.u32 2147483647, %v2280_v44  ;;  %v2418_v5 = vadd.f32 %v839_v62, %v792_v13 }
 0x138   :  { %v1692_v46 = vpop.eup %1691  ;;  %vm2422_vm8 = vcmp.gt.f32.partialorder %v941_v17, 0.0  ;;  %1703 = vpow2.f32 %v973_v14  ;;  %v989_v63 = vand.u32 2147483648, %v2280_v44  ;;  %v1441_v50 = vrot.slane %v1440_v2, 2 }
 0x139   :  { %v1694_v7 = vpop.eup %1693  ;;  %v923_v11 = vmul.f32 %v922_v37, %v883_v29  ;;  %v924_v60 = vmul.f32 %v922_v37, %v894_v4  ;;  %v952_v19 = vstv %s2317_s20  ;;  %v1431_v22 = vadd.f32 %v1430_v54, %v1429_v59  ;;  %s2486_s29 = spop %1605 }
 0x13a   :  { %v1696_v24 = vpop.eup %1695  ;;  %v982_v55 = vadd.f32 %v2353_v23, %v981_v45  ;;  %vm984_vm10 = vweird.f32 %v2353_v23  ;;  %v1048_v17 = vmul.f32 %v2410_v27, %v2367_v34  ;;  %v1148_v56 = vstv %s2416_s25  ;;  %s2490_s30 = spop %1607 }
 0x13b   :  { %v1698_v15 = vpop.eup %1697  ;;  %v859_v51 = vsel %vm2339_vm1, %v2412_v30, 0.0  ;;  %vm983_vm11 = vweird.f32 %v2280_v44  ;;  %vm2437_vm12 = vcmp.eq.f32.partialorder %v987_v10, 8.507059e+37  ;;  %v1036_v31 = vmul.f32 0.6931472, %v1692_v46 }
 0x13c   :  { %v2441_v32 = vpop.eup %1699  ;;  %v990_v33 = vor.u32 1.1754944e-38, %v989_v63  ;;  %v963_v40 = vstv %s2328_s21  ;;  %v1021_v47 = vstv %s2343_s22  ;;  %v1442_v36 = vadd.f32 %v1441_v50, %v1440_v2  ;;  %vm2454_vm14 = vmor %vm983_vm11, %vm984_vm10 }
 0x13d   :  { %v1702_v48 = vpop.eup %1701  ;;  %v902_v49 = vsel %vm2396_vm6, %v1694_v7, %v2033_v21  ;;  %v906_v44 = vsel %vm2396_vm6, %v1696_v24, 0.0  ;;  %v2460_v42 = vmax.f32 %v1148_v56, 1.0  ;;  %v1432_v9 = vrot.slane %v1431_v22, 1 }
 0x13e   :  { %v1704_v16 = vpop.eup %1703  ;;  %v925_v26 = vsub.f32 %v923_v11, %v924_v60  ;;  %v986_v43 = vsel %vm2454_vm14, %v2353_v23, %v982_v55  ;;  %v1049_v25 = vsub.f32 1.0, %v1048_v17  ;;  %v1105_v57 = vmul.f32 0.6931472, %v1698_v15 }
 0x13f   :  { %v1037_v59 = vmul.f32 %v1036_v31, %v1979_v35  ;;  %v1032_v13 = vstv %s2351_s2  ;;  %v1117_v3 = vmul.f32 %v2441_v32, %v2380_v20  ;;  %v1433_v61 = vadd.f32 %v1432_v9, %v1431_v22 }
 0x140   :  { %v907_v18 = vadd.f32 %v906_v44, %v902_v49  ;;  %v1041_v62 = vmul.f32 %v1036_v31, %v1982_v39  ;;  %v1056_v1 = vand.u32 2147483647, %v2367_v34  ;;  %v1443_v23 = vrot.slane %v1442_v36, 1 }
 0x141   :  { %v971_v28 = vsel %vm2422_vm8, %v1702_v48, %v2033_v21  ;;  %v975_v0 = vsel %vm2422_vm8, %v1704_v16, 0.0  ;;  %v991_v14 = vsel %vm2437_vm12, %v990_v33, %v986_v43  ;;  %1705 = vlog2.f32 %v2460_v42  ;;  %1623 = vpush %v1433_v61  ;;  %s2497_s4 = spop %1609 }
 0x142   :  { %v1050_v2 = vmul.f32 %v2410_v27, %v1049_v25  ;;  %v1106_v58 = vmul.f32 %v1105_v57, %v1979_v35  ;;  %v1444_v54 = vadd.f32 %v1443_v23, %v1442_v36  ;;  %v1217_v37 = vstv %s2471_s28 }
 0x143   :  { %v1038_v45 = vmul.f32 1.442695, %v1037_v59  ;;  %v1110_v4 = vmul.f32 %v1105_v57, %v1982_v39  ;;  %v1118_v10 = vsub.f32 1.0, %v1117_v3  ;;  %1707 = vrcp.f32 %v2460_v42 }
 0x144   :  { %v908_v46 = vmul.f32 0.5, %v907_v18  ;;  %v992_v63 = vmul.f32 %v991_v14, %v952_v19  ;;  %v993_v50 = vmul.f32 %v991_v14, %v963_v40  ;;  %v1042_v7 = vmul.f32 1.442695, %v1041_v62  ;;  %1625 = vpush %v1444_v54 }
 0x145   :  { %v926_v11 = vand.u32 2147483647, %v925_v26  ;;  %v976_v60 = vadd.f32 %v975_v0, %v971_v28  ;;  %v1058_v22 = vand.u32 2147483648, %v2367_v34  ;;  %v2495_v24 = vmax.f32 %v1217_v37, 1.0 }
 0x146   :  { %v1051_v55 = vadd.f32 %v2410_v27, %v1050_v2  ;;  %vm1052_vm15 = vweird.f32 %v2367_v34  ;;  %vm1053_vm13 = vweird.f32 %v2410_v27  ;;  %v1107_v19 = vmul.f32 1.442695, %v1106_v58 }
 0x147   :  { %v1706_v17 = vpop.eup %1705  ;;  %1709 = vpow2.f32 %v1038_v45  ;;  %vm2502_vm9 = vcmp.eq.f32.partialorder %v1056_v1, 8.507059e+37  ;;  %v1111_v29 = vmul.f32 1.442695, %v1110_v4  ;;  %v1119_v31 = vmul.f32 %v2441_v32, %v1118_v10  ;;  %vm2523_vm2 = vmor %vm1052_vm15, %vm1053_vm13  ;;  %s2544_s5 = spop %1611 }
 0x148   :  { %v2507_v33 = vmul.f32 %v926_v11, %v908_v46  ;;  %v994_v40 = vsub.f32 %v992_v63, %v993_v50  ;;  %1711 = vpow2.f32 %v1042_v7  ;;  %v1286_v36 = vstv %s2497_s4  ;;  %s2557_s6 = spop %1613 }
 0x149   :  { %v2510_v48 = vpop.eup %1707  ;;  %v930_v49 = vadd.f32 %v908_v46, %v2418_v5  ;;  %v977_v44 = vmul.f32 0.5, %v976_v60  ;;  %vm2515_vm0 = vcmp.gt.f32.partialorder %v1010_v38, 0.0  ;;  %v1059_v16 = vor.u32 1.1754944e-38, %v1058_v22 }
 0x14a   :  { %1713 = vlog2.f32 %v2495_v24  ;;  %v1055_v5 = vsel %vm2523_vm2, %v2410_v27, %v1051_v55  ;;  %vm2533_vm3 = vcmp.gt.f32.partialorder %v1079_v52, 0.0  ;;  %v1125_v34 = vand.u32 2147483647, %v2380_v20 }
 0x14b   :  { %1715 = vpow2.f32 %v1107_v19  ;;  %v1174_v26 = vmul.f32 0.6931472, %v1706_v17  ;;  %v1120_v43 = vadd.f32 %v2441_v32, %v1119_v31  ;;  %vm1122_vm4 = vweird.f32 %v2441_v32 }
 0x14c   :  { %1717 = vpow2.f32 %v1111_v29  ;;  %v2542_v25 = vmax.f32 %v1286_v36, 1.0  ;;  %v928_v52 = vsel %vm2396_vm6, %v2507_v33, 0.0  ;;  %v995_v27 = vand.u32 2147483647, %v994_v40 }
 0x14d   :  { %v1127_v57 = vand.u32 2147483648, %v2380_v20  ;;  %v1186_v59 = vmul.f32 %v2510_v48, %v2460_v42  ;;  %v1710_v3 = vpop.eup %1709  ;;  %v2552_v61 = vadd.f32 %v977_v44, %v930_v49  ;;  %v1090_v18 = vstv %s2400_s24  ;;  %s2574_s7 = spop %1615 }
 0x14e   :  { %vm1121_vm5 = vweird.f32 %v2380_v20  ;;  %1719 = vlog2.f32 %v2542_v25  ;;  %v1712_v62 = vpop.eup %1711  ;;  %v2559_v1 = vmul.f32 %v995_v27, %v977_v44  ;;  %v1060_v23 = vsel %vm2502_vm9, %v1059_v16, %v1055_v5 }
 0x14f   :  { %vm2565_vm7 = vmor %vm1121_vm5, %vm1122_vm4  ;;  %vm2569_vm10 = vcmp.eq.f32.partialorder %v1125_v34, 8.507059e+37  ;;  %v1175_v0 = vmul.f32 %v1174_v26, %v1979_v35  ;;  %v1101_v58 = vstv %s2408_s0  ;;  %v1179_v54 = vmul.f32 %v1174_v26, %v1982_v39 }
 0x150   :  { %v1714_v14 = vpop.eup %1713  ;;  %v1124_v2 = vsel %vm2565_vm7, %v2441_v32, %v1120_v43  ;;  %1721 = vrcp.f32 %v2495_v24  ;;  %v1128_v4 = vor.u32 1.1754944e-38, %v1127_v57  ;;  %v1159_v10 = vstv %s2445_s26 }
 0x151   :  { %v1716_v45 = vpop.eup %1715  ;;  %v1187_v46 = vsub.f32 1.0, %v1186_v59  ;;  %v1170_v63 = vstv %s2465_s27  ;;  %v1061_v7 = vmul.f32 %v1060_v23, %v1021_v47  ;;  %v1062_v11 = vmul.f32 %v1060_v23, %v1032_v13  ;;  %s2614_s8 = spop %1617 }
 0x152   :  { %v1718_v50 = vpop.eup %1717  ;;  %v1243_v60 = vmul.f32 0.6931472, %v1714_v14  ;;  %v1355_v22 = vstv %s2574_s7  ;;  %v1040_v32 = vsel %vm2515_vm0, %v1710_v3, %v2033_v21  ;;  %v1044_v55 = vsel %vm2515_vm0, %v1712_v62, 0.0 }
 0x153   :  { %v1129_v19 = vsel %vm2569_vm10, %v1128_v4, %v1124_v2  ;;  %v1176_v17 = vmul.f32 1.442695, %v1175_v0  ;;  %vm1190_vm11 = vweird.f32 %v2460_v42  ;;  %v1109_v47 = vsel %vm2533_vm3, %v1716_v45, %v2033_v21  ;;  %s2632_s9 = spop %1619 }
 0x154   :  { %v1720_v15 = vpop.eup %1719  ;;  %v1180_v13 = vmul.f32 1.442695, %v1179_v54  ;;  %v1194_v29 = vand.u32 2147483647, %v2460_v42  ;;  %1723 = vrcp.f32 %v2542_v25  ;;  %v1113_v31 = vsel %vm2533_vm3, %v1718_v50, 0.0 }
 0x155   :  { %v1188_v40 = vmul.f32 %v2510_v48, %v1187_v46  ;;  %v1312_v49 = vmul.f32 0.6931472, %v1720_v15  ;;  %v2607_v44 = vmax.f32 %v1355_v22, 1.0  ;;  %v1045_v16 = vadd.f32 %v1044_v55, %v1040_v32 }
 0x156   :  { %v2609_v9 = vpop.eup %1721  ;;  %v1130_v5 = vmul.f32 %v1129_v19, %v1090_v18  ;;  %v1131_v34 = vmul.f32 %v1129_v19, %v1101_v58  ;;  %v1244_v26 = vmul.f32 %v1243_v60, %v1979_v35  ;;  %v1063_v43 = vsub.f32 %v1061_v7, %v1062_v11 }
 0x157   :  { %1725 = vpow2.f32 %v1176_v17  ;;  %v1196_v27 = vand.u32 2147483648, %v2460_v42  ;;  %v1248_v57 = vmul.f32 %v1243_v60, %v1982_v39  ;;  %v1114_v59 = vadd.f32 %v1113_v31, %v1109_v47 }
 0x158   :  { %1727 = vpow2.f32 %v1180_v13  ;;  %vm2616_vm12 = vcmp.eq.f32.partialorder %v1194_v29, 8.507059e+37  ;;  %v1313_v62 = vmul.f32 %v1312_v49, %v1979_v35  ;;  %vm2623_vm14 = vcmp.gt.f32.partialorder %v1148_v56, 0.0  ;;  %s2637_s10 = spop %1621 }
 0x159   :  { %v1189_v23 = vadd.f32 %v2510_v48, %v1188_v40  ;;  %vm1191_vm15 = vweird.f32 %v2510_v48  ;;  %v1255_v28 = vmul.f32 %v2609_v9, %v2495_v24  ;;  %1729 = vlog2.f32 %v2607_v44 }
 0x15a   :  { %v2634_v20 = vpop.eup %1723  ;;  %v1046_v0 = vmul.f32 0.5, %v1045_v16  ;;  %v1132_v56 = vsub.f32 %v1130_v5, %v1131_v34  ;;  %v1245_v14 = vmul.f32 1.442695, %v1244_v26  ;;  %1731 = vrcp.f32 %v2607_v44  ;;  %vm2646_vm13 = vmor %vm1190_vm11, %vm1191_vm15 }
 0x15b   :  { %v1064_v2 = vand.u32 2147483647, %v1063_v43  ;;  %v1197_v58 = vor.u32 1.1754944e-38, %v1196_v27  ;;  %v1249_v54 = vmul.f32 1.442695, %v1248_v57  ;;  %v1317_v45 = vmul.f32 %v1312_v49, %v1982_v39 }
 0x15c   :  { %v2640_v4 = vmul.f32 0.5, %v1114_v59  ;;  %v1228_v50 = vstv %s2486_s29  ;;  %v1239_v7 = vstv %s2490_s30  ;;  %v1314_v11 = vmul.f32 1.442695, %v1313_v62 }
 0x15d   :  { %v1726_v60 = vpop.eup %1725  ;;  %v1193_v32 = vsel %vm2646_vm13, %v2510_v48, %v1189_v23  ;;  %v1256_v55 = vsub.f32 1.0, %v1255_v28  ;;  %v1324_v19 = vmul.f32 %v2634_v20, %v2542_v25  ;;  %v1424_v17 = vstv %s2637_s10 }
 0x15e   :  { %v1728_v15 = vpop.eup %1727  ;;  %v1068_v42 = vadd.f32 %v1046_v0, %v2552_v61  ;;  %v2659_v47 = vmul.f32 %v1064_v2, %v1046_v0  ;;  %v2661_v13 = vand.u32 2147483647, %v1132_v56  ;;  %1733 = vpow2.f32 %v1245_v14 }
 0x15f   :  { %v1730_v29 = vpop.eup %1729  ;;  %1735 = vpow2.f32 %v1249_v54  ;;  %vm1259_vm9 = vweird.f32 %v2495_v24  ;;  %v1263_v48 = vand.u32 2147483647, %v2495_v24  ;;  %v1318_v31 = vmul.f32 1.442695, %v1317_v45 }
 0x160   :  { %v2667_v40 = vmax.f32 %v1424_v17, 1.0  ;;  %v2669_v49 = vpop.eup %1731  ;;  %v2672_v61 = vadd.f32 %v2640_v4, %v1068_v42  ;;  %v1198_v16 = vsel %vm2616_vm12, %v1197_v58, %v1193_v32  ;;  %v1265_v5 = vand.u32 2147483648, %v2495_v24 }
 0x161   :  { %1737 = vpow2.f32 %v1314_v11  ;;  %vm2679_vm2 = vcmp.gt.f32.partialorder %v1217_v37, 0.0  ;;  %v1257_v26 = vmul.f32 %v2609_v9, %v1256_v55  ;;  %v1325_v43 = vsub.f32 1.0, %v1324_v19 }
 0x162   :  { %v1381_v27 = vmul.f32 0.6931472, %v1730_v29  ;;  %1739 = vlog2.f32 %v2667_v40  ;;  %v1178_v57 = vsel %vm2623_vm14, %v1726_v60, %v2033_v21  ;;  %v1182_v59 = vsel %vm2623_vm14, %v1728_v15, 0.0 }
 0x163   :  { %v1332_v3 = vand.u32 2147483647, %v2542_v25  ;;  %1741 = vrcp.f32 %v2667_v40  ;;  %vm2694_vm4 = vcmp.gt.f32.partialorder %v1286_v36, 0.0  ;;  %v1393_v28 = vmul.f32 %v2669_v49, %v2607_v44 }
 0x164   :  { %1743 = vpow2.f32 %v1318_v31  ;;  %v1382_v62 = vmul.f32 %v1381_v27, %v1979_v35  ;;  %v1386_v23 = vmul.f32 %v1381_v27, %v1982_v39  ;;  %v1734_v0 = vpop.eup %1733  ;;  %v2704_v56 = vmul.f32 %v1198_v16, %v1159_v10 }
 0x165   :  { %v2708_v14 = vmul.f32 %v1198_v16, %v1170_v63  ;;  %vm1260_vm5 = vweird.f32 %v2609_v9  ;;  %v1334_v36 = vand.u32 2147483648, %v2542_v25  ;;  %v1736_v2 = vpop.eup %1735  ;;  %v1258_v58 = vadd.f32 %v2609_v9, %v1257_v26 }
 0x166   :  { %v1326_v54 = vmul.f32 %v2634_v20, %v1325_v43  ;;  %v1383_v45 = vmul.f32 1.442695, %v1382_v62  ;;  %v1387_v46 = vmul.f32 1.442695, %v1386_v23  ;;  %vm2714_vm7 = vcmp.eq.f32.partialorder %v1263_v48, 8.507059e+37  ;;  %vm2729_vm11 = vmor %vm1259_vm9, %vm1260_vm5 }
 0x167   :  { %v1738_v11 = vpop.eup %1737  ;;  %v1266_v10 = vor.u32 1.1754944e-38, %v1265_v5  ;;  %v1297_v32 = vstv %s2544_s5  ;;  %v1308_v63 = vstv %s2557_s6  ;;  %v1183_v19 = vadd.f32 %v1182_v59, %v1178_v57 }
 0x168   :  { %v1740_v55 = vpop.eup %1739  ;;  %vm1328_vm10 = vweird.f32 %v2542_v25  ;;  %1745 = vpow2.f32 %v1383_v45  ;;  %v1394_v15 = vsub.f32 1.0, %v1393_v28  ;;  %v1201_v29 = vsub.f32 %v2704_v56, %v2708_v14 }
 0x169   :  { %v2721_v42 = vpop.eup %1741  ;;  %v1335_v31 = vor.u32 1.1754944e-38, %v1334_v36  ;;  %1747 = vpow2.f32 %v1387_v46  ;;  %v1450_v16 = vmul.f32 0.6931472, %v1740_v55  ;;  %v1262_v26 = vsel %vm2729_vm11, %v2609_v9, %v1258_v58 }
 0x16a   :  { %v1744_v5 = vpop.eup %1743  ;;  %v1327_v43 = vadd.f32 %v2634_v20, %v1326_v54  ;;  %vm1329_vm12 = vweird.f32 %v2634_v20  ;;  %vm2738_vm15 = vcmp.eq.f32.partialorder %v1332_v3, 8.507059e+37  ;;  %v1462_v24 = vmul.f32 %v2721_v42, %v2667_v40 }
 0x16b   :  { %v1247_v57 = vsel %vm2679_vm2, %v1734_v0, %v2033_v21  ;;  %v1251_v59 = vsel %vm2679_vm2, %v1736_v2, 0.0  ;;  %v1451_v9 = vmul.f32 %v1450_v16, %v1979_v35  ;;  %v1455_v62 = vmul.f32 %v1450_v16, %v1982_v39  ;;  %vm2771_vm9 = vmor %vm1328_vm10, %vm1329_vm12 }
 0x16c   :  { %v2751_v23 = vmul.f32 0.5, %v1183_v19  ;;  %vm2755_vm13 = vcmp.gt.f32.partialorder %v1355_v22, 0.0  ;;  %v1395_v28 = vmul.f32 %v2669_v49, %v1394_v15  ;;  %v1463_v36 = vsub.f32 1.0, %v1462_v24 }
 0x16d   :  { %v1316_v0 = vsel %vm2694_vm4, %v1738_v11, %v2033_v21  ;;  %v1320_v2 = vsel %vm2694_vm4, %v1744_v5, 0.0  ;;  %v1452_v35 = vmul.f32 1.442695, %v1451_v9  ;;  %v1456_v58 = vmul.f32 1.442695, %v1455_v62 }
 0x16e   :  { %v1746_v39 = vpop.eup %1745  ;;  %v1252_v54 = vadd.f32 %v1251_v59, %v1247_v57  ;;  %v1267_v22 = vsel %vm2714_vm7, %v1266_v10, %v1262_v26  ;;  %v1366_v46 = vstv %s2614_s8  ;;  %v1464_v11 = vmul.f32 %v2721_v42, %v1463_v36 }
 0x16f   :  { %v1748_v55 = vpop.eup %1747  ;;  %v1331_v19 = vsel %vm2771_vm9, %v2634_v20, %v1327_v43  ;;  %v1385_v60 = vsel %vm2755_vm13, %v1746_v39, %v2033_v21  ;;  %vm1398_vm5 = vweird.f32 %v2669_v49  ;;  %1749 = vpow2.f32 %v1452_v35 }
 0x170   :  { %v1321_v25 = vadd.f32 %v1320_v2, %v1316_v0  ;;  %v1389_v10 = vsel %vm2755_vm13, %v1748_v55, 0.0  ;;  %v1396_v15 = vadd.f32 %v2669_v49, %v1395_v28  ;;  %1751 = vpow2.f32 %v1456_v58 }
 0x171   :  { %v1206_v48 = vadd.f32 %v2751_v23, %v2672_v61  ;;  %vm1397_vm7 = vweird.f32 %v2607_v44  ;;  %v1401_v20 = vand.u32 2147483647, %v2607_v44  ;;  %v1403_v16 = vand.u32 2147483648, %v2607_v44 }
 0x172   :  { %v1253_v5 = vmul.f32 0.5, %v1252_v54  ;;  %v1390_v26 = vadd.f32 %v1389_v10, %v1385_v60  ;;  %v1465_v43 = vadd.f32 %v2721_v42, %v1464_v11  ;;  %vm1467_vm10 = vweird.f32 %v2721_v42  ;;  %vm2800_vm11 = vmor %vm1397_vm7, %vm1398_vm5  ;;  %s1624_s11 = spop %1623 }
 0x173   :  { %v1268_v24 = vmul.f32 %v1267_v22, %v1228_v50  ;;  %v1336_v57 = vsel %vm2738_vm15, %v1335_v31, %v1331_v19  ;;  %v1377_v59 = vstv %s2632_s9  ;;  %v1472_v44 = vand.u32 2147483648, %v2667_v40 }
 0x174   :  { %v1322_v9 = vmul.f32 0.5, %v1321_v25  ;;  %v1400_v62 = vsel %vm2800_vm11, %v2669_v49, %v1396_v15  ;;  %vm1466_vm12 = vweird.f32 %v2667_v40  ;;  %v1470_v50 = vand.u32 2147483647, %v2667_v40 }
 0x175   :  { %v1750_v31 = vpop.eup %1749  ;;  %v1269_v27 = vmul.f32 %v1267_v22, %v1239_v7  ;;  %vm1402_vm15 = vcmp.eq.f32.partialorder %v1401_v20, 8.507059e+37  ;;  %v1404_v28 = vor.u32 1.1754944e-38, %v1403_v16  ;;  %vm2815_vm9 = vcmp.gt.f32.partialorder %v1424_v17, 0.0  ;;  %vm2821_vm5 = vmor %vm1466_vm12, %vm1467_vm10  ;;  %s1626_s12 = spop %1625 }
 0x176   :  { %v1752_v0 = vpop.eup %1751  ;;  %v1275_v40 = vadd.f32 %v1253_v5, %v1206_v48  ;;  %v1391_v2 = vmul.f32 0.5, %v1390_v26  ;;  %v1454_v7 = vsel %vm2815_vm9, %v1750_v31, %v2033_v21  ;;  %v1469_v17 = vsel %vm2821_vm5, %v2721_v42, %v1465_v43 }
 0x177   :  { %v1337_v35 = vmul.f32 %v1336_v57, %v1297_v32  ;;  %v1405_v58 = vsel %vm1402_vm15, %v1404_v28, %v1400_v62  ;;  %v1458_v39 = vsel %vm2815_vm9, %v1752_v0, 0.0  ;;  %v1473_v54 = vor.u32 1.1754944e-38, %v1472_v44 }
 0x178   :  { %v1344_v22 = vadd.f32 %v1322_v9, %v1275_v40  ;;  %v1338_v45 = vmul.f32 %v1336_v57, %v1308_v63  ;;  %v1459_v11 = vadd.f32 %v1458_v39, %v1454_v7  ;;  %vm1471_vm7 = vcmp.eq.f32.partialorder %v1470_v50, 8.507059e+37 }
 0x179   :  { %v1270_v55 = vsub.f32 %v1268_v24, %v1269_v27  ;;  %v1435_v19 = vstv %s1624_s11  ;;  %v1474_v21 = vsel %vm1471_vm7, %v1473_v54, %v1469_v17  ;;  %v1446_v60 = vstv %s1626_s12 }
 0x17a   :  { %v1413_v25 = vadd.f32 %v1391_v2, %v1344_v22  ;;  %v1406_v10 = vmul.f32 %v1405_v58, %v1366_v46  ;;  %v1407_v42 = vmul.f32 %v1405_v58, %v1377_v59  ;;  %v1460_v15 = vmul.f32 0.5, %v1459_v11 }
 0x17b   :  { %v860_v32 = vadd.f32 %v859_v51, %v2404_v8  ;;  %v997_v63 = vsel %vm2422_vm8, %v2559_v1, 0.0  ;;  %v1134_v48 = vmul.f32 %v2661_v13, %v2640_v4  ;;  %v1202_v20 = vand.u32 2147483647, %v1201_v29 }
 0x17c   :  { %v1339_v46 = vsub.f32 %v1337_v35, %v1338_v45  ;;  %v1482_v16 = vadd.f32 %v1460_v15, %v1413_v25  ;;  %v1475_v26 = vmul.f32 %v1474_v21, %v1435_v19  ;;  %v1476_v43 = vmul.f32 %v1474_v21, %v1446_v60 }
 0x17d   :  { %v929_v6 = vadd.f32 %v928_v52, %v860_v32  ;;  %v1066_v8 = vsel %vm2515_vm0, %v2659_v47, 0.0  ;;  %v1203_v30 = vmul.f32 %v1202_v20, %v2751_v23  ;;  %v1271_v12 = vand.u32 2147483647, %v1270_v55 }
 0x17e   :  { %v1408_v51 = vsub.f32 %v1406_v10, %v1407_v42  ;;  %1753 = vrcp.f32 %v1482_v16  ;;  %v1135_v4 = vsel %vm2533_vm3, %v1134_v48, 0.0  ;;  %v1340_v56 = vand.u32 2147483647, %v1339_v46 }
 0x17f   :  { %v998_v1 = vadd.f32 %v997_v63, %v929_v6  ;;  %v1272_v13 = vmul.f32 %v1271_v12, %v1253_v5  ;;  %v1477_v14 = vsub.f32 %v1475_v26, %v1476_v43  ;;  %v1204_v33 = vsel %vm2623_vm14, %v1203_v30, 0.0 }
 0x180   :  { %v1341_v52 = vmul.f32 %v1340_v56, %v1322_v9  ;;  %v1409_v29 = vand.u32 2147483647, %v1408_v51  ;;  %v1494_v9 = vand.u32 2147483648, %v1482_v16  ;;  %v1492_v27 = vand.u32 2147483647, %v1482_v16 }
 0x181   :  { %v1067_v41 = vadd.f32 %v1066_v8, %v998_v1  ;;  %v1273_v23 = vsel %vm2679_vm2, %v1272_v13, 0.0  ;;  %v1478_v57 = vand.u32 2147483647, %v1477_v14  ;;  %vm1488_vm6 = vweird.f32 %v1482_v16 }
 0x182   :  { %v1410_v24 = vmul.f32 %v1409_v29, %v1391_v2  ;;  %v1342_v38 = vsel %vm2694_vm4, %v1341_v52, 0.0  ;;  %v1495_v37 = vor.u32 1.1754944e-38, %v1494_v9  ;;  %vm1493_vm0 = vcmp.eq.f32.partialorder %v1492_v27, 8.507059e+37 }
 0x183   :  { %v1136_v53 = vadd.f32 %v1135_v4, %v1067_v41  ;;  %v1479_v5 = vmul.f32 %v1478_v57, %v1460_v15  ;;  %vm1498_vm3 = vcmask 0  }
 0x184   :  { %v1754_v47 = vpop.eup %1753  ;;  %v1411_v18 = vsel %vm2755_vm13, %v1410_v24, 0.0 }
 0x185   :  { %v1205_v61 = vadd.f32 %v1204_v33, %v1136_v53  ;;  %v1484_v59 = vmul.f32 %v1754_v47, %v1482_v16  ;;  %vm1489_vm1 = vweird.f32 %v1754_v47  ;;  %v1480_v34 = vsel %vm2815_vm9, %v1479_v5, 0.0 }
 0x186   :  { %vm1490_vm8 = vmor %vm1488_vm6, %vm1489_vm1 }
 0x187   :  { %v1274_v44 = vadd.f32 %v1273_v23, %v1205_v61  ;;  %v1485_v62 = vsub.f32 1.0, %v1484_v59 }
 0x189   :  { %v1343_v50 = vadd.f32 %v1342_v38, %v1274_v44  ;;  %v1486_v31 = vmul.f32 %v1754_v47, %v1485_v62 }
 0x18b   :  { %v1412_v28 = vadd.f32 %v1411_v18, %v1343_v50  ;;  %v1487_v49 = vadd.f32 %v1754_v47, %v1486_v31 }
 0x18d   :  { %v1481_v3 = vadd.f32 %v1480_v34, %v1412_v28  ;;  %v1491_v0 = vsel %vm1490_vm8, %v1754_v47, %v1487_v49 }
 0x18e   :  { %v1496_v40 = vsel %vm1493_vm0, %v1495_v37, %v1491_v0 }
 0x18f   :  { %v1497_v2 = vmul.f32 %v1496_v40, %v1481_v3 }
 0x191   :  { %1499 = vst.msk [vmem:[#allocation13] sm:$0x1] %vm1498_vm3, %v1497_v2 }
 0x192   :  { %1510 = dma.vmem_to_hbm [thread:$0]  %s1506_s14, 16, %s1508_s17, [#allocation10]  }
 0x193   :  { %1831 = dma.done.wait [#allocation10], 16  }
 0x194   :  { %1832 = vsyncadd [#allocation10], 4294967280 }
 0x195   :  { %1515 = vsyncpa [#allocation9], 1 }
 0x196   :  { %1516 = vsyncpa [#allocation12], 1 }
 0x197   :  { %1517 = vsyncpa [#allocation10], 1 }

</bundles_post_ra>
